<compile_context>
chip_gen: v7x
topology: tpu7x:2x2x1
jax: 0.10.0
libtpu: 0.0.40
codegen_flags: <defaults>
</compile_context>

<pallas_src>
import functools

import jax
import jax.numpy as jnp
from jax.experimental import pallas as pl
from jax.experimental.pallas import tpu as pltpu


def _round_up(x, m):
    return (x + m - 1) // m * m


def _pad_gate_cols(w, H, Hp):
    """(..., 4H) -> (..., 4Hp): gate k moved to columns [k*Hp, k*Hp+H), rest 0."""
    pad = [(0, 0)] * (w.ndim - 1) + [(0, Hp - H)]
    return jnp.concatenate(
        [jnp.pad(w[..., k * H:(k + 1) * H], pad) for k in range(4)], axis=-1)


def _lstm_fc_kernel(
    x_ref,        # (Tc*Bt, Ep)   embedded time-chunk (time-major rows), cdtype
    wih1_ref,     # (Ep, 4*Hp)    layer-1 input->hidden (gate-aligned cols)
    whh1_ref,     # (Hp, 4*Hp)    layer-1 hidden->hidden
    b1_ref,       # (1, 4*Hp)     layer-1 bias (b_ih + b_hh), f32
    wih2_ref,     # (Hp, 4*Hp)    layer-2 input->hidden
    whh2_ref,     # (Hp, 4*Hp)    layer-2 hidden->hidden
    b2_ref,       # (1, 4*Hp)     layer-2 bias, f32
    bfc_ref,      # (1, Vp)       FC bias, f32
    wfc_hbm_ref,  # (Hp, Vp)      FC weight, left in HBM (pl.ANY)
    out_ref,      # (Bt, Vp)      logits, f32
    g1_ref,       # VMEM (Tc*Bt, 4*Hp) f32: hoisted layer-1 input gates
    state_ref,    # VMEM (4, Bt, Hp) f32: h1, c1, h2, c2 carried across chunks
    wfc_buf,      # VMEM (Hp, Vp) cdtype: streamed FC weight
    wfc_sem,      # DMA semaphore
    *, T, Tc, Bt, Hp, cdtype, mask_tail,
):
    f32 = jnp.float32
    t_chunk = pl.program_id(1)
    last_chunk = pl.num_programs(1) - 1

    wfc_copy = pltpu.make_async_copy(wfc_hbm_ref, wfc_buf, wfc_sem)

    @pl.when(t_chunk == 0)
    def _init():
        state_ref[...] = jnp.zeros_like(state_ref)
        # FC weight is only needed after the last chunk's recurrence: start the
        # DMA now so it is fully hidden behind T timesteps of compute.
        wfc_copy.start()

    # Chunk prologue: layer-1 x @ W_ih has no sequential dependence -> one MXU
    # matmul over all Tc timesteps of this chunk (bias folded in).
    g1_ref[...] = (
        jnp.dot(x_ref[...], wih1_ref[...], preferred_element_type=f32)
        + b1_ref[...]
    )

    whh1 = whh1_ref[...]
    wih2 = wih2_ref[...]
    whh2 = whh2_ref[...]
    b2b = jnp.broadcast_to(b2_ref[...], (Bt, 4 * Hp))  # hoisted (no per-step bcast)

    h1 = state_ref[0]
    c1 = state_ref[1]
    h2 = state_ref[2]
    c2 = state_ref[3]

    def gates_to_hc(g, c):
        # PyTorch gate order i, f, g, o; each gate is a 128-lane-aligned block.
        i = jax.nn.sigmoid(g[:, 0 * Hp:1 * Hp])
        f = jax.nn.sigmoid(g[:, 1 * Hp:2 * Hp])
        gg = jnp.tanh(g[:, 2 * Hp:3 * Hp])
        o = jax.nn.sigmoid(g[:, 3 * Hp:4 * Hp])
        c_new = f * c + i * gg
        return o * jnp.tanh(c_new), c_new

    def step(t, carry):
        h1, c1, h2, c2 = carry
        # Layer-2 hidden->hidden projection depends only on the previous carry:
        # issue it first so it overlaps layer-1's matmul + EUP chain.
        g2 = jnp.dot(h2.astype(cdtype), whh2, preferred_element_type=f32) + b2b
        # Layer 1: only the recurrent matmul remains in the serial chain.
        row = pl.multiple_of(t * Bt, 8)
        g1 = g1_ref[pl.ds(row, Bt), :] + jnp.dot(
            h1.astype(cdtype), whh1, preferred_element_type=f32)
        h1n, c1n = gates_to_hc(g1, c1)
        # Layer 2: add the input (h1) projection once h1 is ready (no concat).
        g2 = g2 + jnp.dot(h1n.astype(cdtype), wih2, preferred_element_type=f32)
        h2n, c2n = gates_to_hc(g2, c2)
        if mask_tail:  # static python flag: only emitted when T % Tc != 0
            valid = (t_chunk * Tc + t) < T
            h1n = jnp.where(valid, h1n, h1)
            c1n = jnp.where(valid, c1n, c1)
            h2n = jnp.where(valid, h2n, h2)
            c2n = jnp.where(valid, c2n, c2)
        return h1n, c1n, h2n, c2n

    h1, c1, h2, c2 = jax.lax.fori_loop(
        0, Tc, step, (h1, c1, h2, c2), unroll=min(Tc, 4))

    state_ref[0] = h1
    state_ref[1] = c1
    state_ref[2] = h2
    state_ref[3] = c2

    @pl.when(t_chunk == last_chunk)
    def _epilogue():
        # Final Linear on the last timestep's layer-2 hidden state.
        wfc_copy.wait()
        out_ref[...] = (
            jnp.dot(h2.astype(cdtype), wfc_buf[...], preferred_element_type=f32)
            + bfc_ref[...]
        ).astype(out_ref.dtype)


def prepare_params(params, compute_dtype=jnp.bfloat16):
    """One-time re-layout: gate-aligned 128-lane column blocks, zero-padded rows,
    pre-transposed, cast to the MXU operand dtype. Cache the result across calls."""
    emb = params["embedding"]
    V, E = emb.shape
    H = params["whh1_t"].shape[0]
    Hp = _round_up(H, 128)
    Ep = _round_up(E, 128)
    Vp = _round_up(V, 128)
    cd = compute_dtype
    f32 = jnp.float32
    prepped = {
        "emb_p": jnp.pad(emb, ((0, 0), (0, Ep - E))).astype(cd),
        "wih1": jnp.pad(_pad_gate_cols(params["wih1_t"], H, Hp),
                        ((0, Ep - E), (0, 0))).astype(cd),
        "whh1": jnp.pad(_pad_gate_cols(params["whh1_t"], H, Hp),
                        ((0, Hp - H), (0, 0))).astype(cd),
        "b1": _pad_gate_cols(params["b1"], H, Hp).astype(f32),
        "wih2": jnp.pad(_pad_gate_cols(params["wih2_t"], H, Hp),
                        ((0, Hp - H), (0, 0))).astype(cd),
        "whh2": jnp.pad(_pad_gate_cols(params["whh2_t"], H, Hp),
                        ((0, Hp - H), (0, 0))).astype(cd),
        "b2": _pad_gate_cols(params["b2"], H, Hp).astype(f32),
        "wfc": jnp.pad(params["wfc_t"], ((0, Hp - H), (0, Vp - V))).astype(cd),
        "bfc": jnp.pad(params["bfc"], ((0, 0), (0, Vp - V))).astype(f32),
    }
    dims = dict(H=H, E=E, V=V, Hp=Hp, Ep=Ep, Vp=Vp, compute_dtype=cd)
    return prepped, dims


def simple_lstm_forward(seq_in, prepped, dims, *, time_chunk=16, batch_tile=128):
    """seq_in: (batch, seq_len) int32 token ids -> (batch, n_vocab) f32 logits."""
    B, T = seq_in.shape
    assert T >= 1, "sequence length must be >= 1"
    Hp, Ep, Vp, V = dims["Hp"], dims["Ep"], dims["Vp"], dims["V"]
    cd = dims["compute_dtype"]
    isz = jnp.dtype(cd).itemsize

    Bt = min(_round_up(B, 8), batch_tile)   # batch tile (sublane-aligned)
    n_bt = -(-B // Bt)
    Bp = n_bt * Bt
    Tc = max(1, min(time_chunk, T))         # timesteps per streamed chunk
    n_tc = -(-T // Tc)
    Tp = n_tc * Tc
    mask_tail = (Tp != T)

    # Embedding lookup (pure gather glue), time-major like `seq_in.t()`.
    # TODO(synk): move in-kernel via scalar-prefetched token ids + DMA row gather.
    x = prepped["emb_p"][seq_in.T]                              # (T, B, Ep)
    x = jnp.pad(x, ((0, Tp - T), (0, Bp - B), (0, 0)))          # (Tp, Bp, Ep)
    # Batch-tile-major layout so each (batch-tile, time-chunk) block is contiguous.
    x = x.reshape(Tp, n_bt, Bt, Ep).transpose(1, 0, 2, 3).reshape(n_bt, Tp * Bt, Ep)

    kernel = functools.partial(
        _lstm_fc_kernel, T=T, Tc=Tc, Bt=Bt, Hp=Hp, cdtype=cd, mask_tail=mask_tail)

    # VMEM budget (double-buffered BlockSpec inputs/outputs + scratch) with margin.
    vmem_est = (
        2 * Tc * Bt * Ep * isz                   # x chunk
        + 2 * (Ep + 3 * Hp) * 4 * Hp * isz       # wih1, whh1, wih2, whh2
        + 2 * (8 * Hp + Vp) * 4                  # b1, b2, bfc (f32)
        + 2 * Bt * Vp * 4                        # out
        + Tc * Bt * 4 * Hp * 4                   # g1 scratch (f32)
        + 4 * Bt * Hp * 4                        # carried state
        + Hp * Vp * isz                          # streamed FC weight buffer
    )
    vmem_limit = int(min(110 << 20, max(32 << 20, vmem_est * 3 // 2 + (2 << 20))))

    cost = pl.CostEstimate(
        flops=int(2 * Tp * Bp * 4 * Hp * (Ep + 3 * Hp) + 2 * Bp * Hp * Vp),
        transcendentals=int(10 * Tp * Bp * Hp),
        bytes_accessed=int(
            Tp * Bp * Ep * isz
            + (Ep + 3 * Hp) * 4 * Hp * isz
            + n_bt * Hp * Vp * isz
            + (8 * Hp + Vp) * 4
            + Bp * Vp * 4),
    )

    grid_spec = pltpu.PrefetchScalarGridSpec(
        num_scalar_prefetch=0,
        grid=(n_bt, n_tc),
        in_specs=[
            pl.BlockSpec((None, Tc * Bt, Ep), lambda b, t: (b, t, 0)),  # x chunk
            pl.BlockSpec((Ep, 4 * Hp), lambda b, t: (0, 0)),            # wih1
            pl.BlockSpec((Hp, 4 * Hp), lambda b, t: (0, 0)),            # whh1
            pl.BlockSpec((1, 4 * Hp), lambda b, t: (0, 0)),             # b1
            pl.BlockSpec((Hp, 4 * Hp), lambda b, t: (0, 0)),            # wih2
            pl.BlockSpec((Hp, 4 * Hp), lambda b, t: (0, 0)),            # whh2
            pl.BlockSpec((1, 4 * Hp), lambda b, t: (0, 0)),             # b2
            pl.BlockSpec((1, Vp), lambda b, t: (0, 0)),                 # bfc
            pl.BlockSpec(memory_space=pl.ANY),                          # wfc (HBM)
        ],
        out_specs=pl.BlockSpec((Bt, Vp), lambda b, t: (b, 0)),
        scratch_shapes=[
            pltpu.VMEM((Tc * Bt, 4 * Hp), jnp.float32),  # hoisted layer-1 gates
            pltpu.VMEM((4, Bt, Hp), jnp.float32),        # h1,c1,h2,c2 carry
            pltpu.VMEM((Hp, Vp), cd),                    # streamed FC weight
            pltpu.SemaphoreType.DMA,
        ],
    )

    out = pl.pallas_call(
        kernel,
        out_shape=jax.ShapeDtypeStruct((Bp, Vp), jnp.float32),
        grid_spec=grid_spec,
        compiler_params=pltpu.CompilerParams(
            dimension_semantics=("parallel", "arbitrary"),
            vmem_limit_bytes=vmem_limit),
        cost_estimate=cost,
    )(x, prepped["wih1"], prepped["whh1"], prepped["b1"],
      prepped["wih2"], prepped["whh2"], prepped["b2"],
      prepped["bfc"], prepped["wfc"])

    return out[:B, :V]


def make_params(key, n_vocab, hidden_dim, embedding_dim):
    """Deterministic parameter init (PyTorch-style uniform(-1/sqrt(H), 1/sqrt(H)))."""
    ks = jax.random.split(key, 12)
    s = 1.0 / jnp.sqrt(hidden_dim)
    u = lambda k, shape: jax.random.uniform(k, shape, jnp.float32, -s, s)
    H, E, V = hidden_dim, embedding_dim, n_vocab
    return {
        "embedding": jax.random.normal(ks[0], (V, E), jnp.float32),
        # Pre-transposed LSTM weights: (in_features, 4H); gate order i,f,g,o.
        "wih1_t": u(ks[1], (E, 4 * H)),
        "whh1_t": u(ks[2], (H, 4 * H)),
        "b1": (u(ks[3], (1, 4 * H)) + u(ks[4], (1, 4 * H))),  # b_ih + b_hh
        "wih2_t": u(ks[5], (H, 4 * H)),
        "whh2_t": u(ks[6], (H, 4 * H)),
        "b2": (u(ks[7], (1, 4 * H)) + u(ks[8], (1, 4 * H))),
        "wfc_t": u(ks[9], (H, V)),
        "bfc": u(ks[10], (1, V)),
    }


def reference_forward(seq_in, params):
    """Independent pure-JAX f32 reference (unpadded layout) for correctness check."""
    H = params["whh1_t"].shape[0]
    x = params["embedding"][seq_in.T].astype(jnp.float32)  # (T, B, E)
    B = x.shape[1]

    def cell(x_t, h, c, w_ih_t, w_hh_t, b):
        gates = x_t @ w_ih_t + h @ w_hh_t + b
        i, f, g, o = jnp.split(gates, 4, axis=-1)
        c_new = jax.nn.sigmoid(f) * c + jax.nn.sigmoid(i) * jnp.tanh(g)
        h_new = jax.nn.sigmoid(o) * jnp.tanh(c_new)
        return h_new, c_new

    def step(carry, x_t):
        h1, c1, h2, c2 = carry
        h1, c1 = cell(x_t, h1, c1, params["wih1_t"], params["whh1_t"], params["b1"])
        h2, c2 = cell(h1, h2, c2, params["wih2_t"], params["whh2_t"], params["b2"])
        return (h1, c1, h2, c2), None

    z = jnp.zeros((B, H), jnp.float32)
    (h1, c1, h2, c2), _ = jax.lax.scan(step, (z, z, z, z), x)
    return h2 @ params["wfc_t"] + params["bfc"]


if __name__ == "__main__":
    # Test 1: tile-aligned toy sizes; exact f32 check + bf16 (MXU-native) check.
    n_vocab, hidden_dim, embedding_dim = 64, 32, 32
    batch, seq_len = 4, 8
    pkey, dkey = jax.random.split(jax.random.PRNGKey(0))
    params = make_params(pkey, n_vocab, hidden_dim, embedding_dim)
    seq_in = jax.random.randint(dkey, (batch, seq_len), 0, n_vocab, jnp.int32)
    ref = reference_forward(seq_in, params)

    prep_f32, dims_f32 = prepare_params(params, compute_dtype=jnp.float32)
    out_f32 = jax.block_until_ready(
        simple_lstm_forward(seq_in, prep_f32, dims_f32, time_chunk=4))
    assert out_f32.shape == (batch, n_vocab)
    assert jnp.allclose(out_f32, ref, rtol=1e-3, atol=1e-3), "f32 mismatch vs ref"

    prep_bf16, dims_bf16 = prepare_params(params, compute_dtype=jnp.bfloat16)
    out_bf16 = jax.block_until_ready(
        simple_lstm_forward(seq_in, prep_bf16, dims_bf16, time_chunk=4))
    assert jnp.allclose(out_bf16, ref, rtol=5e-2, atol=5e-2), "bf16 mismatch vs ref"

    # Test 2: non-multiple-of-tile sizes (ragged last time chunk + padded dims).
    pkey2, dkey2 = jax.random.split(jax.random.PRNGKey(1))
    params2 = make_params(pkey2, 100, 40, 48)
    seq_in2 = jax.random.randint(dkey2, (3, 7), 0, 100, jnp.int32)
    ref2 = reference_forward(seq_in2, params2)
    prep2, dims2 = prepare_params(params2, compute_dtype=jnp.float32)
    out2 = jax.block_until_ready(
        simple_lstm_forward(seq_in2, prep2, dims2, time_chunk=4))
    assert out2.shape == (3, 100)
    assert jnp.allclose(out2, ref2, rtol=1e-3, atol=1e-3), "ragged mismatch vs ref"

    print("KERNEL_OK")
</pallas_src>

<mosaic_0001>
module attributes {stable_mosaic.version = 11 : i64} {
  func.func @_lstm_fc_kernel(%arg0: i32, %arg1: i32, %arg2: memref<1x32x128xf32, #tpu.memory_space<vmem>>, %arg3: memref<128x512xf32, #tpu.memory_space<vmem>>, %arg4: memref<128x512xf32, #tpu.memory_space<vmem>>, %arg5: memref<1x512xf32, #tpu.memory_space<vmem>>, %arg6: memref<128x512xf32, #tpu.memory_space<vmem>>, %arg7: memref<128x512xf32, #tpu.memory_space<vmem>>, %arg8: memref<1x512xf32, #tpu.memory_space<vmem>>, %arg9: memref<1x128xf32, #tpu.memory_space<vmem>>, %arg10: memref<128x128xf32, #tpu.memory_space<any>>, %arg11: memref<8x128xf32, #tpu.memory_space<vmem>>, %arg12: memref<32x512xf32, #tpu.memory_space<vmem>>, %arg13: memref<4x8x128xf32, #tpu.memory_space<vmem>>, %arg14: memref<128x128xf32, #tpu.memory_space<vmem>>, %arg15: memref<!tpu.dma_semaphore, #tpu.memory_space<semaphore_mem>>) attributes {dimension_semantics = [#tpu.dimension_semantics<parallel>, #tpu.dimension_semantics<arbitrary>], iteration_bounds = array<i64: 1, 2>, scalar_prefetch = 0 : i64, scratch_operands = 4 : i64, tpu.core_type = #tpu.core_type<tc>, window_params = [{transform_indices = @transform_0, window_bounds = array<i64: 1, 32, 128>}, {pipeline_mode = #tpu.pipeline_mode<synchronous>, transform_indices = @transform_1, window_bounds = array<i64: 128, 512>}, {pipeline_mode = #tpu.pipeline_mode<synchronous>, transform_indices = @transform_2, window_bounds = array<i64: 128, 512>}, {pipeline_mode = #tpu.pipeline_mode<synchronous>, transform_indices = @transform_3, window_bounds = array<i64: 1, 512>}, {pipeline_mode = #tpu.pipeline_mode<synchronous>, transform_indices = @transform_4, window_bounds = array<i64: 128, 512>}, {pipeline_mode = #tpu.pipeline_mode<synchronous>, transform_indices = @transform_5, window_bounds = array<i64: 128, 512>}, {pipeline_mode = #tpu.pipeline_mode<synchronous>, transform_indices = @transform_6, window_bounds = array<i64: 1, 512>}, {pipeline_mode = #tpu.pipeline_mode<synchronous>, transform_indices = @transform_7, window_bounds = array<i64: 1, 128>}, {}, {transform_indices = @transform_9, window_bounds = array<i64: 8, 128>}]} {
    %c0_i32 = arith.constant 0 : i32
    %0 = arith.cmpi eq, %arg1, %c0_i32 : i32
    %1 = arith.extui %0 : i1 to i32
    %c0_i32_0 = arith.constant 0 : i32
    %2 = arith.cmpi ne, %1, %c0_i32_0 : i32
    scf.if %2 {
      %cst_84 = arith.constant 0.000000e+00 : f32
      %280 = vector.broadcast %cst_84 : f32 to vector<4x8x128xf32>
      %c0_85 = arith.constant 0 : index
      %c0_86 = arith.constant 0 : index
      %c0_87 = arith.constant 0 : index
      %281 = vector.load %arg13[%c0_85, %c0_86, %c0_87] : memref<4x8x128xf32, #tpu.memory_space<vmem>>, vector<4x8x128xf32>
      tpu.vector_store %arg13[%c0_85, %c0_86, %c0_87], %280 {strides = array<i32>} : memref<4x8x128xf32, #tpu.memory_space<vmem>>, vector<4x8x128xf32>,
      tpu.enqueue_dma source(%arg10 : memref<128x128xf32, #tpu.memory_space<any>>) target(%arg14 : memref<128x128xf32, #tpu.memory_space<vmem>>) target_semaphore(%arg15 : memref<!tpu.dma_semaphore, #tpu.memory_space<semaphore_mem>>)
    } else {
    }
    %c0 = arith.constant 0 : index
    %c0_1 = arith.constant 0 : index
    %c0_2 = arith.constant 0 : index
    %3 = vector.load %arg2[%c0, %c0_1, %c0_2] : memref<1x32x128xf32, #tpu.memory_space<vmem>>, vector<1x32x128xf32>
    %4 = vector.shape_cast %3 : vector<1x32x128xf32> to vector<32x128xf32>
    %c0_3 = arith.constant 0 : index
    %c0_4 = arith.constant 0 : index
    %5 = vector.load %arg3[%c0_3, %c0_4] : memref<128x512xf32, #tpu.memory_space<vmem>>, vector<128x512xf32>
    %cst = arith.constant dense<0.000000e+00> : vector<32x512xf32>
    %6 = tpu.matmul %4, %5, %cst {dimension_numbers = #tpu.dot_dimension_numbers<[1], [0], [0], [1], [0, 0, 1, 1], [], []>} : vector<32x128xf32>, vector<128x512xf32>, vector<32x512xf32> -> vector<32x512xf32>
    %c0_5 = arith.constant 0 : index
    %c0_6 = arith.constant 0 : index
    %7 = vector.load %arg5[%c0_5, %c0_6] : memref<1x512xf32, #tpu.memory_space<vmem>>, vector<1x512xf32>
    %8 = vector.broadcast %7 : vector<1x512xf32> to vector<32x512xf32>
    %9 = arith.addf %6, %8 : vector<32x512xf32>
    %c0_7 = arith.constant 0 : index
    %c0_8 = arith.constant 0 : index
    %10 = vector.load %arg12[%c0_7, %c0_8] : memref<32x512xf32, #tpu.memory_space<vmem>>, vector<32x512xf32>
    tpu.vector_store %arg12[%c0_7, %c0_8], %9 {strides = array<i32>} : memref<32x512xf32, #tpu.memory_space<vmem>>, vector<32x512xf32>,
    %c0_9 = arith.constant 0 : index
    %c0_10 = arith.constant 0 : index
    %11 = vector.load %arg4[%c0_9, %c0_10] : memref<128x512xf32, #tpu.memory_space<vmem>>, vector<128x512xf32>
    %c0_11 = arith.constant 0 : index
    %c0_12 = arith.constant 0 : index
    %12 = vector.load %arg6[%c0_11, %c0_12] : memref<128x512xf32, #tpu.memory_space<vmem>>, vector<128x512xf32>
    %c0_13 = arith.constant 0 : index
    %c0_14 = arith.constant 0 : index
    %13 = vector.load %arg7[%c0_13, %c0_14] : memref<128x512xf32, #tpu.memory_space<vmem>>, vector<128x512xf32>
    %c0_15 = arith.constant 0 : index
    %c0_16 = arith.constant 0 : index
    %14 = vector.load %arg8[%c0_15, %c0_16] : memref<1x512xf32, #tpu.memory_space<vmem>>, vector<1x512xf32>
    %15 = vector.shape_cast %14 : vector<1x512xf32> to vector<1x512xf32>
    %16 = vector.broadcast %15 : vector<1x512xf32> to vector<8x512xf32>
    %c0_17 = arith.constant 0 : index
    %c0_18 = arith.constant 0 : index
    %c0_19 = arith.constant 0 : index
    %17 = vector.load %arg13[%c0_17, %c0_18, %c0_19] : memref<4x8x128xf32, #tpu.memory_space<vmem>>, vector<1x8x128xf32>
    %18 = vector.shape_cast %17 : vector<1x8x128xf32> to vector<8x128xf32>
    %c1 = arith.constant 1 : index
    %c0_20 = arith.constant 0 : index
    %c0_21 = arith.constant 0 : index
    %19 = vector.load %arg13[%c1, %c0_20, %c0_21] : memref<4x8x128xf32, #tpu.memory_space<vmem>>, vector<1x8x128xf32>
    %20 = vector.shape_cast %19 : vector<1x8x128xf32> to vector<8x128xf32>
    %c2 = arith.constant 2 : index
    %c0_22 = arith.constant 0 : index
    %c0_23 = arith.constant 0 : index
    %21 = vector.load %arg13[%c2, %c0_22, %c0_23] : memref<4x8x128xf32, #tpu.memory_space<vmem>>, vector<1x8x128xf32>
    %22 = vector.shape_cast %21 : vector<1x8x128xf32> to vector<8x128xf32>
    %c3 = arith.constant 3 : index
    %c0_24 = arith.constant 0 : index
    %c0_25 = arith.constant 0 : index
    %23 = vector.load %arg13[%c3, %c0_24, %c0_25] : memref<4x8x128xf32, #tpu.memory_space<vmem>>, vector<1x8x128xf32>
    %24 = vector.shape_cast %23 : vector<1x8x128xf32> to vector<8x128xf32>
    %c0_i32_26 = arith.constant 0 : i32
    %cst_27 = arith.constant dense<0.000000e+00> : vector<8x512xf32>
    %25 = tpu.matmul %22, %13, %cst_27 {dimension_numbers = #tpu.dot_dimension_numbers<[1], [0], [0], [1], [0, 0, 1, 1], [], []>} : vector<8x128xf32>, vector<128x512xf32>, vector<8x512xf32> -> vector<8x512xf32>
    %26 = arith.addf %25, %16 : vector<8x512xf32>
    %c8_i32 = arith.constant 8 : i32
    %27 = arith.muli %c0_i32_26, %c8_i32 : i32
    %28 = tpu.assume_multiple %27, 8 : i32
    %29 = arith.index_cast %28 : i32 to index
    %c0_28 = arith.constant 0 : index
    %30 = vector.load %arg12[%29, %c0_28] : memref<32x512xf32, #tpu.memory_space<vmem>>, vector<8x512xf32>
    %cst_29 = arith.constant dense<0.000000e+00> : vector<8x512xf32>
    %31 = tpu.matmul %18, %11, %cst_29 {dimension_numbers = #tpu.dot_dimension_numbers<[1], [0], [0], [1], [0, 0, 1, 1], [], []>} : vector<8x128xf32>, vector<128x512xf32>, vector<8x512xf32> -> vector<8x512xf32>
    %32 = arith.addf %30, %31 : vector<8x512xf32>
    %33 = vector.extract_strided_slice %32 {offsets = [0, 0], sizes = [8, 128], strides = [1, 1]} : vector<8x512xf32> to vector<8x128xf32>
    %34 = arith.negf %33 : vector<8x128xf32>
    %35 = math.exp %34 : vector<8x128xf32>
    %cst_30 = arith.constant 1.000000e+00 : f32
    %36 = vector.broadcast %cst_30 : f32 to vector<8x128xf32>
    %37 = arith.addf %36, %35 : vector<8x128xf32>
    %38 = arith.divf %36, %37 : vector<8x128xf32>
    %39 = vector.extract_strided_slice %32 {offsets = [0, 128], sizes = [8, 128], strides = [1, 1]} : vector<8x512xf32> to vector<8x128xf32>
    %40 = arith.negf %39 : vector<8x128xf32>
    %41 = math.exp %40 : vector<8x128xf32>
    %cst_31 = arith.constant 1.000000e+00 : f32
    %42 = vector.broadcast %cst_31 : f32 to vector<8x128xf32>
    %43 = arith.addf %42, %41 : vector<8x128xf32>
    %44 = arith.divf %42, %43 : vector<8x128xf32>
    %45 = vector.extract_strided_slice %32 {offsets = [0, 256], sizes = [8, 128], strides = [1, 1]} : vector<8x512xf32> to vector<8x128xf32>
    %46 = math.tanh %45 : vector<8x128xf32>
    %47 = vector.extract_strided_slice %32 {offsets = [0, 384], sizes = [8, 128], strides = [1, 1]} : vector<8x512xf32> to vector<8x128xf32>
    %48 = arith.negf %47 : vector<8x128xf32>
    %49 = math.exp %48 : vector<8x128xf32>
    %cst_32 = arith.constant 1.000000e+00 : f32
    %50 = vector.broadcast %cst_32 : f32 to vector<8x128xf32>
    %51 = arith.addf %50, %49 : vector<8x128xf32>
    %52 = arith.divf %50, %51 : vector<8x128xf32>
    %53 = arith.mulf %44, %20 : vector<8x128xf32>
    %54 = arith.mulf %38, %46 : vector<8x128xf32>
    %55 = arith.addf %53, %54 : vector<8x128xf32>
    %56 = math.tanh %55 : vector<8x128xf32>
    %57 = arith.mulf %52, %56 : vector<8x128xf32>
    %cst_33 = arith.constant dense<0.000000e+00> : vector<8x512xf32>
    %58 = tpu.matmul %57, %12, %cst_33 {dimension_numbers = #tpu.dot_dimension_numbers<[1], [0], [0], [1], [0, 0, 1, 1], [], []>} : vector<8x128xf32>, vector<128x512xf32>, vector<8x512xf32> -> vector<8x512xf32>
    %59 = arith.addf %26, %58 : vector<8x512xf32>
    %60 = vector.extract_strided_slice %59 {offsets = [0, 0], sizes = [8, 128], strides = [1, 1]} : vector<8x512xf32> to vector<8x128xf32>
    %61 = arith.negf %60 : vector<8x128xf32>
    %62 = math.exp %61 : vector<8x128xf32>
    %cst_34 = arith.constant 1.000000e+00 : f32
    %63 = vector.broadcast %cst_34 : f32 to vector<8x128xf32>
    %64 = arith.addf %63, %62 : vector<8x128xf32>
    %65 = arith.divf %63, %64 : vector<8x128xf32>
    %66 = vector.extract_strided_slice %59 {offsets = [0, 128], sizes = [8, 128], strides = [1, 1]} : vector<8x512xf32> to vector<8x128xf32>
    %67 = arith.negf %66 : vector<8x128xf32>
    %68 = math.exp %67 : vector<8x128xf32>
    %cst_35 = arith.constant 1.000000e+00 : f32
    %69 = vector.broadcast %cst_35 : f32 to vector<8x128xf32>
    %70 = arith.addf %69, %68 : vector<8x128xf32>
    %71 = arith.divf %69, %70 : vector<8x128xf32>
    %72 = vector.extract_strided_slice %59 {offsets = [0, 256], sizes = [8, 128], strides = [1, 1]} : vector<8x512xf32> to vector<8x128xf32>
    %73 = math.tanh %72 : vector<8x128xf32>
    %74 = vector.extract_strided_slice %59 {offsets = [0, 384], sizes = [8, 128], strides = [1, 1]} : vector<8x512xf32> to vector<8x128xf32>
    %75 = arith.negf %74 : vector<8x128xf32>
    %76 = math.exp %75 : vector<8x128xf32>
    %cst_36 = arith.constant 1.000000e+00 : f32
    %77 = vector.broadcast %cst_36 : f32 to vector<8x128xf32>
    %78 = arith.addf %77, %76 : vector<8x128xf32>
    %79 = arith.divf %77, %78 : vector<8x128xf32>
    %80 = arith.mulf %71, %24 : vector<8x128xf32>
    %81 = arith.mulf %65, %73 : vector<8x128xf32>
    %82 = arith.addf %80, %81 : vector<8x128xf32>
    %83 = math.tanh %82 : vector<8x128xf32>
    %84 = arith.mulf %79, %83 : vector<8x128xf32>
    %c1_i32 = arith.constant 1 : i32
    %cst_37 = arith.constant dense<0.000000e+00> : vector<8x512xf32>
    %85 = tpu.matmul %84, %13, %cst_37 {dimension_numbers = #tpu.dot_dimension_numbers<[1], [0], [0], [1], [0, 0, 1, 1], [], []>} : vector<8x128xf32>, vector<128x512xf32>, vector<8x512xf32> -> vector<8x512xf32>
    %86 = arith.addf %85, %16 : vector<8x512xf32>
    %c8_i32_38 = arith.constant 8 : i32
    %87 = arith.muli %c1_i32, %c8_i32_38 : i32
    %88 = tpu.assume_multiple %87, 8 : i32
    %89 = arith.index_cast %88 : i32 to index
    %c0_39 = arith.constant 0 : index
    %90 = vector.load %arg12[%89, %c0_39] : memref<32x512xf32, #tpu.memory_space<vmem>>, vector<8x512xf32>
    %cst_40 = arith.constant dense<0.000000e+00> : vector<8x512xf32>
    %91 = tpu.matmul %57, %11, %cst_40 {dimension_numbers = #tpu.dot_dimension_numbers<[1], [0], [0], [1], [0, 0, 1, 1], [], []>} : vector<8x128xf32>, vector<128x512xf32>, vector<8x512xf32> -> vector<8x512xf32>
    %92 = arith.addf %90, %91 : vector<8x512xf32>
    %93 = vector.extract_strided_slice %92 {offsets = [0, 0], sizes = [8, 128], strides = [1, 1]} : vector<8x512xf32> to vector<8x128xf32>
    %94 = arith.negf %93 : vector<8x128xf32>
    %95 = math.exp %94 : vector<8x128xf32>
    %cst_41 = arith.constant 1.000000e+00 : f32
    %96 = vector.broadcast %cst_41 : f32 to vector<8x128xf32>
    %97 = arith.addf %96, %95 : vector<8x128xf32>
    %98 = arith.divf %96, %97 : vector<8x128xf32>
    %99 = vector.extract_strided_slice %92 {offsets = [0, 128], sizes = [8, 128], strides = [1, 1]} : vector<8x512xf32> to vector<8x128xf32>
    %100 = arith.negf %99 : vector<8x128xf32>
    %101 = math.exp %100 : vector<8x128xf32>
    %cst_42 = arith.constant 1.000000e+00 : f32
    %102 = vector.broadcast %cst_42 : f32 to vector<8x128xf32>
    %103 = arith.addf %102, %101 : vector<8x128xf32>
    %104 = arith.divf %102, %103 : vector<8x128xf32>
    %105 = vector.extract_strided_slice %92 {offsets = [0, 256], sizes = [8, 128], strides = [1, 1]} : vector<8x512xf32> to vector<8x128xf32>
    %106 = math.tanh %105 : vector<8x128xf32>
    %107 = vector.extract_strided_slice %92 {offsets = [0, 384], sizes = [8, 128], strides = [1, 1]} : vector<8x512xf32> to vector<8x128xf32>
    %108 = arith.negf %107 : vector<8x128xf32>
    %109 = math.exp %108 : vector<8x128xf32>
    %cst_43 = arith.constant 1.000000e+00 : f32
    %110 = vector.broadcast %cst_43 : f32 to vector<8x128xf32>
    %111 = arith.addf %110, %109 : vector<8x128xf32>
    %112 = arith.divf %110, %111 : vector<8x128xf32>
    %113 = arith.mulf %104, %55 : vector<8x128xf32>
    %114 = arith.mulf %98, %106 : vector<8x128xf32>
    %115 = arith.addf %113, %114 : vector<8x128xf32>
    %116 = math.tanh %115 : vector<8x128xf32>
    %117 = arith.mulf %112, %116 : vector<8x128xf32>
    %cst_44 = arith.constant dense<0.000000e+00> : vector<8x512xf32>
    %118 = tpu.matmul %117, %12, %cst_44 {dimension_numbers = #tpu.dot_dimension_numbers<[1], [0], [0], [1], [0, 0, 1, 1], [], []>} : vector<8x128xf32>, vector<128x512xf32>, vector<8x512xf32> -> vector<8x512xf32>
    %119 = arith.addf %86, %118 : vector<8x512xf32>
    %120 = vector.extract_strided_slice %119 {offsets = [0, 0], sizes = [8, 128], strides = [1, 1]} : vector<8x512xf32> to vector<8x128xf32>
    %121 = arith.negf %120 : vector<8x128xf32>
    %122 = math.exp %121 : vector<8x128xf32>
    %cst_45 = arith.constant 1.000000e+00 : f32
    %123 = vector.broadcast %cst_45 : f32 to vector<8x128xf32>
    %124 = arith.addf %123, %122 : vector<8x128xf32>
    %125 = arith.divf %123, %124 : vector<8x128xf32>
    %126 = vector.extract_strided_slice %119 {offsets = [0, 128], sizes = [8, 128], strides = [1, 1]} : vector<8x512xf32> to vector<8x128xf32>
    %127 = arith.negf %126 : vector<8x128xf32>
    %128 = math.exp %127 : vector<8x128xf32>
    %cst_46 = arith.constant 1.000000e+00 : f32
    %129 = vector.broadcast %cst_46 : f32 to vector<8x128xf32>
    %130 = arith.addf %129, %128 : vector<8x128xf32>
    %131 = arith.divf %129, %130 : vector<8x128xf32>
    %132 = vector.extract_strided_slice %119 {offsets = [0, 256], sizes = [8, 128], strides = [1, 1]} : vector<8x512xf32> to vector<8x128xf32>
    %133 = math.tanh %132 : vector<8x128xf32>
    %134 = vector.extract_strided_slice %119 {offsets = [0, 384], sizes = [8, 128], strides = [1, 1]} : vector<8x512xf32> to vector<8x128xf32>
    %135 = arith.negf %134 : vector<8x128xf32>
    %136 = math.exp %135 : vector<8x128xf32>
    %cst_47 = arith.constant 1.000000e+00 : f32
    %137 = vector.broadcast %cst_47 : f32 to vector<8x128xf32>
    %138 = arith.addf %137, %136 : vector<8x128xf32>
    %139 = arith.divf %137, %138 : vector<8x128xf32>
    %140 = arith.mulf %131, %82 : vector<8x128xf32>
    %141 = arith.mulf %125, %133 : vector<8x128xf32>
    %142 = arith.addf %140, %141 : vector<8x128xf32>
    %143 = math.tanh %142 : vector<8x128xf32>
    %144 = arith.mulf %139, %143 : vector<8x128xf32>
    %c2_i32 = arith.constant 2 : i32
    %cst_48 = arith.constant dense<0.000000e+00> : vector<8x512xf32>
    %145 = tpu.matmul %144, %13, %cst_48 {dimension_numbers = #tpu.dot_dimension_numbers<[1], [0], [0], [1], [0, 0, 1, 1], [], []>} : vector<8x128xf32>, vector<128x512xf32>, vector<8x512xf32> -> vector<8x512xf32>
    %146 = arith.addf %145, %16 : vector<8x512xf32>
    %c8_i32_49 = arith.constant 8 : i32
    %147 = arith.muli %c2_i32, %c8_i32_49 : i32
    %148 = tpu.assume_multiple %147, 8 : i32
    %149 = arith.index_cast %148 : i32 to index
    %c0_50 = arith.constant 0 : index
    %150 = vector.load %arg12[%149, %c0_50] : memref<32x512xf32, #tpu.memory_space<vmem>>, vector<8x512xf32>
    %cst_51 = arith.constant dense<0.000000e+00> : vector<8x512xf32>
    %151 = tpu.matmul %117, %11, %cst_51 {dimension_numbers = #tpu.dot_dimension_numbers<[1], [0], [0], [1], [0, 0, 1, 1], [], []>} : vector<8x128xf32>, vector<128x512xf32>, vector<8x512xf32> -> vector<8x512xf32>
    %152 = arith.addf %150, %151 : vector<8x512xf32>
    %153 = vector.extract_strided_slice %152 {offsets = [0, 0], sizes = [8, 128], strides = [1, 1]} : vector<8x512xf32> to vector<8x128xf32>
    %154 = arith.negf %153 : vector<8x128xf32>
    %155 = math.exp %154 : vector<8x128xf32>
    %cst_52 = arith.constant 1.000000e+00 : f32
    %156 = vector.broadcast %cst_52 : f32 to vector<8x128xf32>
    %157 = arith.addf %156, %155 : vector<8x128xf32>
    %158 = arith.divf %156, %157 : vector<8x128xf32>
    %159 = vector.extract_strided_slice %152 {offsets = [0, 128], sizes = [8, 128], strides = [1, 1]} : vector<8x512xf32> to vector<8x128xf32>
    %160 = arith.negf %159 : vector<8x128xf32>
    %161 = math.exp %160 : vector<8x128xf32>
    %cst_53 = arith.constant 1.000000e+00 : f32
    %162 = vector.broadcast %cst_53 : f32 to vector<8x128xf32>
    %163 = arith.addf %162, %161 : vector<8x128xf32>
    %164 = arith.divf %162, %163 : vector<8x128xf32>
    %165 = vector.extract_strided_slice %152 {offsets = [0, 256], sizes = [8, 128], strides = [1, 1]} : vector<8x512xf32> to vector<8x128xf32>
    %166 = math.tanh %165 : vector<8x128xf32>
    %167 = vector.extract_strided_slice %152 {offsets = [0, 384], sizes = [8, 128], strides = [1, 1]} : vector<8x512xf32> to vector<8x128xf32>
    %168 = arith.negf %167 : vector<8x128xf32>
    %169 = math.exp %168 : vector<8x128xf32>
    %cst_54 = arith.constant 1.000000e+00 : f32
    %170 = vector.broadcast %cst_54 : f32 to vector<8x128xf32>
    %171 = arith.addf %170, %169 : vector<8x128xf32>
    %172 = arith.divf %170, %171 : vector<8x128xf32>
    %173 = arith.mulf %164, %115 : vector<8x128xf32>
    %174 = arith.mulf %158, %166 : vector<8x128xf32>
    %175 = arith.addf %173, %174 : vector<8x128xf32>
    %176 = math.tanh %175 : vector<8x128xf32>
    %177 = arith.mulf %172, %176 : vector<8x128xf32>
    %cst_55 = arith.constant dense<0.000000e+00> : vector<8x512xf32>
    %178 = tpu.matmul %177, %12, %cst_55 {dimension_numbers = #tpu.dot_dimension_numbers<[1], [0], [0], [1], [0, 0, 1, 1], [], []>} : vector<8x128xf32>, vector<128x512xf32>, vector<8x512xf32> -> vector<8x512xf32>
    %179 = arith.addf %146, %178 : vector<8x512xf32>
    %180 = vector.extract_strided_slice %179 {offsets = [0, 0], sizes = [8, 128], strides = [1, 1]} : vector<8x512xf32> to vector<8x128xf32>
    %181 = arith.negf %180 : vector<8x128xf32>
    %182 = math.exp %181 : vector<8x128xf32>
    %cst_56 = arith.constant 1.000000e+00 : f32
    %183 = vector.broadcast %cst_56 : f32 to vector<8x128xf32>
    %184 = arith.addf %183, %182 : vector<8x128xf32>
    %185 = arith.divf %183, %184 : vector<8x128xf32>
    %186 = vector.extract_strided_slice %179 {offsets = [0, 128], sizes = [8, 128], strides = [1, 1]} : vector<8x512xf32> to vector<8x128xf32>
    %187 = arith.negf %186 : vector<8x128xf32>
    %188 = math.exp %187 : vector<8x128xf32>
    %cst_57 = arith.constant 1.000000e+00 : f32
    %189 = vector.broadcast %cst_57 : f32 to vector<8x128xf32>
    %190 = arith.addf %189, %188 : vector<8x128xf32>
    %191 = arith.divf %189, %190 : vector<8x128xf32>
    %192 = vector.extract_strided_slice %179 {offsets = [0, 256], sizes = [8, 128], strides = [1, 1]} : vector<8x512xf32> to vector<8x128xf32>
    %193 = math.tanh %192 : vector<8x128xf32>
    %194 = vector.extract_strided_slice %179 {offsets = [0, 384], sizes = [8, 128], strides = [1, 1]} : vector<8x512xf32> to vector<8x128xf32>
    %195 = arith.negf %194 : vector<8x128xf32>
    %196 = math.exp %195 : vector<8x128xf32>
    %cst_58 = arith.constant 1.000000e+00 : f32
    %197 = vector.broadcast %cst_58 : f32 to vector<8x128xf32>
    %198 = arith.addf %197, %196 : vector<8x128xf32>
    %199 = arith.divf %197, %198 : vector<8x128xf32>
    %200 = arith.mulf %191, %142 : vector<8x128xf32>
    %201 = arith.mulf %185, %193 : vector<8x128xf32>
    %202 = arith.addf %200, %201 : vector<8x128xf32>
    %203 = math.tanh %202 : vector<8x128xf32>
    %204 = arith.mulf %199, %203 : vector<8x128xf32>
    %c3_i32 = arith.constant 3 : i32
    %cst_59 = arith.constant dense<0.000000e+00> : vector<8x512xf32>
    %205 = tpu.matmul %204, %13, %cst_59 {dimension_numbers = #tpu.dot_dimension_numbers<[1], [0], [0], [1], [0, 0, 1, 1], [], []>} : vector<8x128xf32>, vector<128x512xf32>, vector<8x512xf32> -> vector<8x512xf32>
    %206 = arith.addf %205, %16 : vector<8x512xf32>
    %c8_i32_60 = arith.constant 8 : i32
    %207 = arith.muli %c3_i32, %c8_i32_60 : i32
    %208 = tpu.assume_multiple %207, 8 : i32
    %209 = arith.index_cast %208 : i32 to index
    %c0_61 = arith.constant 0 : index
    %210 = vector.load %arg12[%209, %c0_61] : memref<32x512xf32, #tpu.memory_space<vmem>>, vector<8x512xf32>
    %cst_62 = arith.constant dense<0.000000e+00> : vector<8x512xf32>
    %211 = tpu.matmul %177, %11, %cst_62 {dimension_numbers = #tpu.dot_dimension_numbers<[1], [0], [0], [1], [0, 0, 1, 1], [], []>} : vector<8x128xf32>, vector<128x512xf32>, vector<8x512xf32> -> vector<8x512xf32>
    %212 = arith.addf %210, %211 : vector<8x512xf32>
    %213 = vector.extract_strided_slice %212 {offsets = [0, 0], sizes = [8, 128], strides = [1, 1]} : vector<8x512xf32> to vector<8x128xf32>
    %214 = arith.negf %213 : vector<8x128xf32>
    %215 = math.exp %214 : vector<8x128xf32>
    %cst_63 = arith.constant 1.000000e+00 : f32
    %216 = vector.broadcast %cst_63 : f32 to vector<8x128xf32>
    %217 = arith.addf %216, %215 : vector<8x128xf32>
    %218 = arith.divf %216, %217 : vector<8x128xf32>
    %219 = vector.extract_strided_slice %212 {offsets = [0, 128], sizes = [8, 128], strides = [1, 1]} : vector<8x512xf32> to vector<8x128xf32>
    %220 = arith.negf %219 : vector<8x128xf32>
    %221 = math.exp %220 : vector<8x128xf32>
    %cst_64 = arith.constant 1.000000e+00 : f32
    %222 = vector.broadcast %cst_64 : f32 to vector<8x128xf32>
    %223 = arith.addf %222, %221 : vector<8x128xf32>
    %224 = arith.divf %222, %223 : vector<8x128xf32>
    %225 = vector.extract_strided_slice %212 {offsets = [0, 256], sizes = [8, 128], strides = [1, 1]} : vector<8x512xf32> to vector<8x128xf32>
    %226 = math.tanh %225 : vector<8x128xf32>
    %227 = vector.extract_strided_slice %212 {offsets = [0, 384], sizes = [8, 128], strides = [1, 1]} : vector<8x512xf32> to vector<8x128xf32>
    %228 = arith.negf %227 : vector<8x128xf32>
    %229 = math.exp %228 : vector<8x128xf32>
    %cst_65 = arith.constant 1.000000e+00 : f32
    %230 = vector.broadcast %cst_65 : f32 to vector<8x128xf32>
    %231 = arith.addf %230, %229 : vector<8x128xf32>
    %232 = arith.divf %230, %231 : vector<8x128xf32>
    %233 = arith.mulf %224, %175 : vector<8x128xf32>
    %234 = arith.mulf %218, %226 : vector<8x128xf32>
    %235 = arith.addf %233, %234 : vector<8x128xf32>
    %236 = math.tanh %235 : vector<8x128xf32>
    %237 = arith.mulf %232, %236 : vector<8x128xf32>
    %cst_66 = arith.constant dense<0.000000e+00> : vector<8x512xf32>
    %238 = tpu.matmul %237, %12, %cst_66 {dimension_numbers = #tpu.dot_dimension_numbers<[1], [0], [0], [1], [0, 0, 1, 1], [], []>} : vector<8x128xf32>, vector<128x512xf32>, vector<8x512xf32> -> vector<8x512xf32>
    %239 = arith.addf %206, %238 : vector<8x512xf32>
    %240 = vector.extract_strided_slice %239 {offsets = [0, 0], sizes = [8, 128], strides = [1, 1]} : vector<8x512xf32> to vector<8x128xf32>
    %241 = arith.negf %240 : vector<8x128xf32>
    %242 = math.exp %241 : vector<8x128xf32>
    %cst_67 = arith.constant 1.000000e+00 : f32
    %243 = vector.broadcast %cst_67 : f32 to vector<8x128xf32>
    %244 = arith.addf %243, %242 : vector<8x128xf32>
    %245 = arith.divf %243, %244 : vector<8x128xf32>
    %246 = vector.extract_strided_slice %239 {offsets = [0, 128], sizes = [8, 128], strides = [1, 1]} : vector<8x512xf32> to vector<8x128xf32>
    %247 = arith.negf %246 : vector<8x128xf32>
    %248 = math.exp %247 : vector<8x128xf32>
    %cst_68 = arith.constant 1.000000e+00 : f32
    %249 = vector.broadcast %cst_68 : f32 to vector<8x128xf32>
    %250 = arith.addf %249, %248 : vector<8x128xf32>
    %251 = arith.divf %249, %250 : vector<8x128xf32>
    %252 = vector.extract_strided_slice %239 {offsets = [0, 256], sizes = [8, 128], strides = [1, 1]} : vector<8x512xf32> to vector<8x128xf32>
    %253 = math.tanh %252 : vector<8x128xf32>
    %254 = vector.extract_strided_slice %239 {offsets = [0, 384], sizes = [8, 128], strides = [1, 1]} : vector<8x512xf32> to vector<8x128xf32>
    %255 = arith.negf %254 : vector<8x128xf32>
    %256 = math.exp %255 : vector<8x128xf32>
    %cst_69 = arith.constant 1.000000e+00 : f32
    %257 = vector.broadcast %cst_69 : f32 to vector<8x128xf32>
    %258 = arith.addf %257, %256 : vector<8x128xf32>
    %259 = arith.divf %257, %258 : vector<8x128xf32>
    %260 = arith.mulf %251, %202 : vector<8x128xf32>
    %261 = arith.mulf %245, %253 : vector<8x128xf32>
    %262 = arith.addf %260, %261 : vector<8x128xf32>
    %263 = math.tanh %262 : vector<8x128xf32>
    %264 = arith.mulf %259, %263 : vector<8x128xf32>
    %c4_i32 = arith.constant 4 : i32
    %c0_70 = arith.constant 0 : index
    %c0_71 = arith.constant 0 : index
    %c0_72 = arith.constant 0 : index
    %265 = vector.load %arg13[%c0_70, %c0_71, %c0_72] : memref<4x8x128xf32, #tpu.memory_space<vmem>>, vector<1x8x128xf32>
    %266 = vector.shape_cast %265 : vector<1x8x128xf32> to vector<8x128xf32>
    %267 = vector.shape_cast %237 : vector<8x128xf32> to vector<1x8x128xf32>
    tpu.vector_store %arg13[%c0_70, %c0_71, %c0_72], %267 {strides = array<i32>} : memref<4x8x128xf32, #tpu.memory_space<vmem>>, vector<1x8x128xf32>,
    %c1_73 = arith.constant 1 : index
    %c0_74 = arith.constant 0 : index
    %c0_75 = arith.constant 0 : index
    %268 = vector.load %arg13[%c1_73, %c0_74, %c0_75] : memref<4x8x128xf32, #tpu.memory_space<vmem>>, vector<1x8x128xf32>
    %269 = vector.shape_cast %268 : vector<1x8x128xf32> to vector<8x128xf32>
    %270 = vector.shape_cast %235 : vector<8x128xf32> to vector<1x8x128xf32>
    tpu.vector_store %arg13[%c1_73, %c0_74, %c0_75], %270 {strides = array<i32>} : memref<4x8x128xf32, #tpu.memory_space<vmem>>, vector<1x8x128xf32>,
    %c2_76 = arith.constant 2 : index
    %c0_77 = arith.constant 0 : index
    %c0_78 = arith.constant 0 : index
    %271 = vector.load %arg13[%c2_76, %c0_77, %c0_78] : memref<4x8x128xf32, #tpu.memory_space<vmem>>, vector<1x8x128xf32>
    %272 = vector.shape_cast %271 : vector<1x8x128xf32> to vector<8x128xf32>
    %273 = vector.shape_cast %264 : vector<8x128xf32> to vector<1x8x128xf32>
    tpu.vector_store %arg13[%c2_76, %c0_77, %c0_78], %273 {strides = array<i32>} : memref<4x8x128xf32, #tpu.memory_space<vmem>>, vector<1x8x128xf32>,
    %c3_79 = arith.constant 3 : index
    %c0_80 = arith.constant 0 : index
    %c0_81 = arith.constant 0 : index
    %274 = vector.load %arg13[%c3_79, %c0_80, %c0_81] : memref<4x8x128xf32, #tpu.memory_space<vmem>>, vector<1x8x128xf32>
    %275 = vector.shape_cast %274 : vector<1x8x128xf32> to vector<8x128xf32>
    %276 = vector.shape_cast %262 : vector<8x128xf32> to vector<1x8x128xf32>
    tpu.vector_store %arg13[%c3_79, %c0_80, %c0_81], %276 {strides = array<i32>} : memref<4x8x128xf32, #tpu.memory_space<vmem>>, vector<1x8x128xf32>,
    %c1_i32_82 = arith.constant 1 : i32
    %277 = arith.cmpi eq, %arg1, %c1_i32_82 : i32
    %278 = arith.extui %277 : i1 to i32
    %c0_i32_83 = arith.constant 0 : i32
    %279 = arith.cmpi ne, %278, %c0_i32_83 : i32
    scf.if %279 {
      tpu.wait_dma2 semaphore(%arg15 : memref<!tpu.dma_semaphore, #tpu.memory_space<semaphore_mem>>) src(%arg10 : memref<128x128xf32, #tpu.memory_space<any>>) dst(%arg14 : memref<128x128xf32, #tpu.memory_space<vmem>>)
      %c0_84 = arith.constant 0 : index
      %c0_85 = arith.constant 0 : index
      %280 = vector.load %arg14[%c0_84, %c0_85] : memref<128x128xf32, #tpu.memory_space<vmem>>, vector<128x128xf32>
      %cst_86 = arith.constant dense<0.000000e+00> : vector<8x128xf32>
      %281 = tpu.matmul %264, %280, %cst_86 {dimension_numbers = #tpu.dot_dimension_numbers<[1], [0], [0], [1], [0, 0, 1, 1], [], []>} : vector<8x128xf32>, vector<128x128xf32>, vector<8x128xf32> -> vector<8x128xf32>
      %c0_87 = arith.constant 0 : index
      %c0_88 = arith.constant 0 : index
      %282 = vector.load %arg9[%c0_87, %c0_88] : memref<1x128xf32, #tpu.memory_space<vmem>>, vector<1x128xf32>
      %283 = vector.broadcast %282 : vector<1x128xf32> to vector<8x128xf32>
      %284 = arith.addf %281, %283 : vector<8x128xf32>
      %c0_89 = arith.constant 0 : index
      %c0_90 = arith.constant 0 : index
      %285 = vector.load %arg11[%c0_89, %c0_90] : memref<8x128xf32, #tpu.memory_space<vmem>>, vector<8x128xf32>
      tpu.vector_store %arg11[%c0_89, %c0_90], %284 {strides = array<i32>} : memref<8x128xf32, #tpu.memory_space<vmem>>, vector<8x128xf32>,
    } else {
    }
    return
  }
  func.func @transform_0(%arg0: i32, %arg1: i32) -> (i32, i32, i32) {
    %c0_i32 = arith.constant 0 : i32
    %c0_i32_0 = arith.constant 0 : i32
    return %arg0, %arg1, %c0_i32 : i32, i32, i32
  }
  func.func @transform_1(%arg0: i32, %arg1: i32) -> (i32, i32) {
    %c0_i32 = arith.constant 0 : i32
    %c0_i32_0 = arith.constant 0 : i32
    %c0_i32_1 = arith.constant 0 : i32
    return %c0_i32, %c0_i32_0 : i32, i32
  }
  func.func @transform_2(%arg0: i32, %arg1: i32) -> (i32, i32) {
    %c0_i32 = arith.constant 0 : i32
    %c0_i32_0 = arith.constant 0 : i32
    %c0_i32_1 = arith.constant 0 : i32
    return %c0_i32, %c0_i32_0 : i32, i32
  }
  func.func @transform_3(%arg0: i32, %arg1: i32) -> (i32, i32) {
    %c0_i32 = arith.constant 0 : i32
    %c0_i32_0 = arith.constant 0 : i32
    %c0_i32_1 = arith.constant 0 : i32
    return %c0_i32, %c0_i32_0 : i32, i32
  }
  func.func @transform_4(%arg0: i32, %arg1: i32) -> (i32, i32) {
    %c0_i32 = arith.constant 0 : i32
    %c0_i32_0 = arith.constant 0 : i32
    %c0_i32_1 = arith.constant 0 : i32
    return %c0_i32, %c0_i32_0 : i32, i32
  }
  func.func @transform_5(%arg0: i32, %arg1: i32) -> (i32, i32) {
    %c0_i32 = arith.constant 0 : i32
    %c0_i32_0 = arith.constant 0 : i32
    %c0_i32_1 = arith.constant 0 : i32
    return %c0_i32, %c0_i32_0 : i32, i32
  }
  func.func @transform_6(%arg0: i32, %arg1: i32) -> (i32, i32) {
    %c0_i32 = arith.constant 0 : i32
    %c0_i32_0 = arith.constant 0 : i32
    %c0_i32_1 = arith.constant 0 : i32
    return %c0_i32, %c0_i32_0 : i32, i32
  }
  func.func @transform_7(%arg0: i32, %arg1: i32) -> (i32, i32) {
    %c0_i32 = arith.constant 0 : i32
    %c0_i32_0 = arith.constant 0 : i32
    %c0_i32_1 = arith.constant 0 : i32
    return %c0_i32, %c0_i32_0 : i32, i32
  }
  func.func @transform_9(%arg0: i32, %arg1: i32) -> (i32, i32) {
    %c0_i32 = arith.constant 0 : i32
    %c0_i32_0 = arith.constant 0 : i32
    return %arg0, %c0_i32 : i32, i32
  }
}

</mosaic_0001>

<bundles_post_ra>
// kernel: tpu_custom_call.1
= control target key start
LH: loop header
LB: loop body
LE: loop exit
PB: predicated region body
PF: predicated region fallthrough
CT: control target
= control target key end

     0   :  { %s5711_s0 = inlined_call_operand.hbm [shape: f32[1,64,128], index: 0, kind: input, shape index: {}]   ;;  %s5712_s1 = inlined_call_operand.hbm [shape: f32[128,512], index: 1, kind: input, shape index: {}]   ;;  %s5713_s2 = inlined_call_operand.hbm [shape: f32[128,512], index: 2, kind: input, shape index: {}]   ;;  %s5714_s3 = inlined_call_operand.vmem [shape: f32[1,512], index: 3, kind: input, shape index: {}]   ;;  %s5715_s4 = inlined_call_operand.hbm [shape: f32[128,512], index: 4, kind: input, shape index: {}]   ;;  %s5716_s5 = inlined_call_operand.hbm [shape: f32[128,512], index: 5, kind: input, shape index: {}]   ;;  %s5717_s6 = inlined_call_operand.vmem [shape: f32[1,512], index: 6, kind: input, shape index: {}]   ;;  %s5718_s7 = inlined_call_operand.vmem [shape: f32[1,128], index: 7, kind: input, shape index: {}]   ;;  %s5719_s8 = inlined_call_operand.hbm [shape: f32[128,128], index: 8, kind: input, shape index: {}]   ;;  %s5720_s9 = inlined_call_operand.hbm [shape: f32[8,128], index: 9, kind: output, shape index: {}]  }
   0x1   :  { %5861 = sst [smem:[#allocation90_spill]] %s5717_s6 }
   0x2   :  { %5862 = sst [smem:[#allocation91_spill]] %s5718_s7 }
   0x3   :  { %5863 = sst [smem:[#allocation92_spill]] %s5720_s9 }
   0x4   :  { %14 = vsyncpa [#allocation7], 0 }
   0x5   :  { %16 = vsyncpa [#allocation7 + $0x1], 0 }
   0x6   :  { %17 = vsyncpa [#allocation10], 0 }
   0x7   :  { %18 = vsyncpa [#allocation13], 0 }
   0x8   :  { %19 = vsyncpa [#allocation8], 0  ;;  %s4682_s30 = smov 0   ;;  %s4684_s10 = smov 0  }
   0x9   :  { %s4686_s11 = smov 0   ;;  %s4688_s12 = smov 0  }
   0xa   :  { %s4690_s13 = smov 0   ;;  %s4692_s14 = smov 0  }
   0xb LB: > { %s5723_s15 = sadd.s32 4294967295, %s4614_s14   ;;  %p59_p0 = scmp.ne.s32.totalorder %s4598_s10, %s4594_s30  ;;  %s4614_s14 = sphi %s4692_s14, %s25_s14   ;;  %s4610_s13 = sphi %s4690_s13, %s6123_s13   ;;  %s4606_s12 = sphi %s4688_s12, %s6122_s12   ;;  %s4602_s11 = sphi %s4686_s11, %s6121_s11   ;;  %s4598_s10 = sphi %s4684_s10, %s6120_s10   ;;  %s4594_s30 = sphi %s4682_s30, %s6119_s30  }
   0xc   : > { %p4714_p1 = scmp.eq.s32.totalorder %s5723_s15, 0  ;;  %p3099_p2 = scmp.ge.s32.totalorder %s4614_s14, 1 }
   0xd   : > { %p243_p3 = scmp.lt.s32.totalorder %s4614_s14, 3  ;;  %s4616_s19 = smov [#allocation9]  }
   0xe   : > { %s5864_s16 = scalar_select %p4714_p1, 1, 0 }
   0xf   : > { %p4722_p4 = por %p4714_p1, %p59_p0  ;;  %p4726_p5 = pnand %p3099_p2, %p243_p3 }
  0x10   : > { %s255_s20 = sshll.u32 %s4616_s19, 4  ;;  %s4617_s22 = smov [#allocation12]   ;;  %s4730_s20 = int_to_ptr.vmem [resolvable:$true] %s255_s20 }
  0x11   : > { %s5865_s17 = scalar_select %p4722_p4, 1, 0 }
  0x12   : > { %s5866_s18 = scalar_select %p4726_p5, 1, 0 }
  0x13   : > { %p4141_p6 = pneg %p4726_p5  ;;  %s284_s23 = sshll.u32 %s4617_s22, 4  ;;  %s4740_s23 = int_to_ptr.vmem [resolvable:$true] %s284_s23 }
  0x14   : > { %s4618_s24 = smov [#allocation11]   ;;  %s4360_s28 = scalar_lea.hbm %s5712_s1, 8192 }
  0x15   : > { %p4736_p7 = pnand %p4141_p6, %p4714_p1  ;;  %s4742_s25 = sshll.u32 %s4618_s24, 4  ;;  %s269_s25 = int_to_ptr.vmem [resolvable:$true] %s4742_s25 }
  0x16   : > { %p4361_p8 = scmp.ne.s32.totalorder %s5712_s1, %s4360_s28  ;;  %p4367_p12 = scmp.lt.u32.totalorder %s4360_s28, %s5712_s1 }
  0x17   : > { %p4752_p9 = pneg %p4736_p7 }
  0x19   : > { %p4363_p10 = pnand %p4752_p9, %p4361_p8 }
  0x1b   : > { %p4364_p11 = pneg %p4363_p10 }
  0x1d   : > { %p4369_p13 = pnand %p4367_p12, %p4364_p11 }
  0x1f   : > { %4372 = shalt.err (!%p4369_p13)
}
  0x20   : > { %s4373_s26 = scalar_lea.vmem %s4730_s20, 8192  ;;  %p4381_p6 = scmp.lt.s32.totalorder %s4730_s20, %s4730_s20 }
  0x21   : > { %p4374_p0 = scmp.ne.s32.totalorder %s4730_s20, %s4373_s26  ;;  %p4382_p1 = scmp.lt.s32.totalorder %s4373_s26, %s4373_s26 }
  0x23   : > { %p4376_p2 = pnand %p4374_p0, %p4752_p9  ;;  %p4383_p8 = por %p4382_p1, %p4381_p6 }
  0x25   : > { %p4377_p3 = pneg %p4376_p2 }
  0x27   : > { %p4384_p10 = pnand %p4383_p8, %p4377_p3 }
  0x29   : > { %4387 = shalt.err (!%p4384_p10)
}
  0x2a   : > { %s4619_s27 = smov 512   ;;  %s4620_s28 = smov 32  }
  0x2b   : > { %4144 = dma.hbm_to_vmem [thread:$0]  (!%p4736_p7), %s5712_s1, 8192, %s4730_s20, [#allocation10], %s4619_s27, %s4619_s27, %s4620_s28  }
  0x2c   : > { %s4388_s26 = scalar_lea.hbm %s5715_s4, 8192 }
  0x2d   : > { %p4389_p1 = scmp.ne.s32.totalorder %s5715_s4, %s4388_s26  ;;  %p4395_p13 = scmp.lt.u32.totalorder %s4388_s26, %s5715_s4 }
  0x2f   : > { %p4391_p11 = pnand %p4389_p1, %p4752_p9 }
  0x31   : > { %p4392_p12 = pneg %p4391_p11 }
  0x33   : > { %p4397_p0 = pnand %p4395_p13, %p4392_p12 }
  0x35   : > { %4400 = shalt.err (!%p4397_p0)
}
  0x36   : > { %s4401_s20 = scalar_lea.vmem %s4740_s23, 8192  ;;  %p4409_p8 = scmp.lt.s32.totalorder %s4740_s23, %s4740_s23 }
  0x37   : > { %p4402_p2 = scmp.ne.s32.totalorder %s4740_s23, %s4401_s20  ;;  %p4410_p10 = scmp.lt.s32.totalorder %s4401_s20, %s4401_s20 }
  0x39   : > { %p4404_p3 = pnand %p4402_p2, %p4752_p9  ;;  %p4411_p1 = por %p4410_p10, %p4409_p8 }
  0x3b   : > { %p4405_p6 = pneg %p4404_p3 }
  0x3d   : > { %p4412_p11 = pnand %p4411_p1, %p4405_p6 }
  0x3f   : > { %4415 = shalt.err (!%p4412_p11)
}
  0x40   : > { %4150 = dma.hbm_to_vmem [thread:$0]  (!%p4736_p7), %s5715_s4, 8192, %s4740_s23, [#allocation13], %s4619_s27, %s4619_s27, %s4620_s28  }
  0x41   : > { %s4416_s29 = scalar_lea.hbm %s5713_s2, 8192 }
  0x42   : > { %p4417_p12 = scmp.ne.s32.totalorder %s5713_s2, %s4416_s29  ;;  %p4423_p2 = scmp.lt.u32.totalorder %s4416_s29, %s5713_s2 }
  0x44   : > { %p4419_p13 = pnand %p4417_p12, %p4752_p9 }
  0x46   : > { %p4420_p0 = pneg %p4419_p13 }
  0x48   : > { %p4425_p3 = pnand %p4423_p2, %p4420_p0 }
  0x4a   : > { %4428 = shalt.err (!%p4425_p3)
}
  0x4b   : > { %s4429_s20 = scalar_lea.vmem %s269_s25, 8192  ;;  %p4437_p1 = scmp.lt.s32.totalorder %s269_s25, %s269_s25 }
  0x4c   : > { %p4430_p6 = scmp.ne.s32.totalorder %s269_s25, %s4429_s20  ;;  %p4438_p11 = scmp.lt.s32.totalorder %s4429_s20, %s4429_s20 }
  0x4e   : > { %p4432_p8 = pnand %p4430_p6, %p4752_p9  ;;  %p4439_p4 = por %p4438_p11, %p4437_p1 }
  0x50   : > { %p4433_p10 = pneg %p4432_p8 }
  0x52   : > { %p4440_p5 = pnand %p4439_p4, %p4433_p10 }
  0x54   : > { %4443 = shalt.err (!%p4440_p5)
}
  0x55   : > { %4147 = dma.hbm_to_vmem [thread:$0]  (!%p4736_p7), %s5713_s2, 8192, %s269_s25, [#allocation10], %s4619_s27, %s4619_s27, %s4620_s28  }
  0x56   : > { %s4621_s7 = smov [#allocation14]   ;;  %s4444_s30 = scalar_lea.hbm %s5716_s5, 8192 }
  0x57   : > { %s297_s9 = sshll.u32 %s4621_s7, 4  ;;  %p4445_p4 = scmp.ne.s32.totalorder %s5716_s5, %s4444_s30  ;;  %s298_s9 = int_to_ptr.vmem [resolvable:$true] %s297_s9 }
  0x58   : > { %p4451_p13 = scmp.lt.u32.totalorder %s4444_s30, %s5716_s5 }
  0x59   : > { %p4447_p5 = pnand %p4445_p4, %p4752_p9 }
  0x5b   : > { %p4448_p12 = pneg %p4447_p5 }
  0x5d   : > { %p4453_p0 = pnand %p4451_p13, %p4448_p12 }
  0x5f   : > { %4456 = shalt.err (!%p4453_p0)
}
  0x60   : > { %s4457_s25 = scalar_lea.vmem %s298_s9, 8192  ;;  %p4465_p8 = scmp.lt.s32.totalorder %s298_s9, %s298_s9 }
  0x61   : > { %p4458_p2 = scmp.ne.s32.totalorder %s298_s9, %s4457_s25  ;;  %p4466_p10 = scmp.lt.s32.totalorder %s4457_s25, %s4457_s25 }
  0x63   : > { %p4460_p3 = pnand %p4458_p2, %p4752_p9  ;;  %p4467_p1 = por %p4466_p10, %p4465_p8 }
  0x65   : > { %p4461_p6 = pneg %p4460_p3 }
  0x67   : > { %p4468_p11 = pnand %p4467_p1, %p4461_p6 }
  0x69   : > { %4471 = shalt.err (!%p4468_p11)
}
  0x6a   : > { %4153 = dma.hbm_to_vmem [thread:$0]  (!%p4736_p7), %s5716_s5, 8192, %s298_s9, [#allocation13], %s4619_s27, %s4619_s27, %s4620_s28  }
  0x6b   : > { %s34_s19 = sadd.s32 1, %s4610_s13  ;;  %s46_s7 = sadd.s32 1, %s4602_s11 }
  0x6c   : > { %p35_p9 = scmp.ge.s32.totalorder %s34_s19, 2  ;;  %p53_p4 = scmp.ne.s32.totalorder %s4602_s11, %s4598_s10 }
  0x6d   : > { %p54_p5 = scmp.eq.s32.totalorder %s4614_s14, 0  ;;  %p4162_p12 = scmp.lt.s32.totalorder %s4614_s14, 2 }
  0x6e   : > { %s6125_s19 = smov (%p35_p9, %s34_s19), 0  ;;  %s317_s21 = sand.u32 1, %s4602_s11  }
  0x6f   : > { %p55_p13 = por %p54_p5, %p53_p4  ;;  %s42_s15 = ssub.s32 %s4610_s13, %s6125_s19 }
  0x70   : > { %p44_p0 = scmp.eq.s32.totalorder %s42_s15, 0  ;;  %s3105_s29 = sshll.u32 %s317_s21, 5 }
  0x71   : > { %s3146_s30 = sshll.u32 %s4610_s13, 9  ;;  %s321_s9 = scalar_lea.vmem [#allocation6], %s3105_s29 }
  0x72   : > { %s4858_s22 = scalar_select %p44_p0, %s4602_s11, %s46_s7  }
  0x73   : > { %s4863_s28 = scalar_lea.hbm %s5711_s0, %s3146_s30  ;;  %s330_s26 = sshll.u32 %s321_s9, 4  ;;  %s4865_s26 = int_to_ptr.vmem [resolvable:$true] %s330_s26 }
  0x74   : > { %p4869_p7 = pnand %p4162_p12, %p55_p13  ;;  %s4873_s25 = scalar_lea.sflag [#allocation7], %s317_s21 }
  0x75   : > { %s4472_s23 = scalar_lea.hbm %s4863_s28, 512  ;;  %s4477_s15 = scalar_lea.hbm %s5711_s0, 1024 }
  0x76   : > { %p4473_p2 = scmp.ne.s32.totalorder %s4863_s28, %s4472_s23  ;;  %p4474_p3 = pneg %p4869_p7 }
  0x77   : > { %p4478_p10 = scmp.lt.u32.totalorder %s4863_s28, %s5711_s0  ;;  %p4479_p1 = scmp.lt.u32.totalorder %s4477_s15, %s4472_s23 }
  0x78   : > { %p4475_p6 = pnand %p4474_p3, %p4473_p2  ;;  %p4481_p9 = scmp.lt.u32.totalorder %s4472_s23, %s4863_s28 }
  0x79   : > { %p4480_p11 = por %p4479_p1, %p4478_p10 }
  0x7a   : > { %p4476_p8 = pneg %p4475_p6 }
  0x7b   : > { %p4482_p4 = por %p4481_p9, %p4480_p11 }
  0x7d   : > { %p4483_p5 = pnand %p4482_p4, %p4476_p8 }
  0x7f   : > { %4486 = shalt.err (!%p4483_p5)
}
  0x80   : > { %s4487_s21 = scalar_lea.vmem %s4865_s26, 512  ;;  %s4622_s24 = smov [#allocation6]  }
  0x81   : > { %p4488_p12 = scmp.ne.s32.totalorder %s4865_s26, %s4487_s21  ;;  %s4492_s27 = sshll.u32 %s4622_s24, 4  ;;  %s4493_s27 = int_to_ptr.vmem [resolvable:$false] %s4492_s27 }
  0x82   : > { %s4494_s9 = scalar_lea.vmem %s4493_s27, 1024  ;;  %p4495_p2 = scmp.lt.s32.totalorder %s4865_s26, %s4493_s27 }
  0x83   : > { %p4490_p13 = pnand %p4488_p12, %p4474_p3  ;;  %p4496_p6 = scmp.lt.s32.totalorder %s4494_s9, %s4487_s21 }
  0x85   : > { %p4491_p0 = pneg %p4490_p13  ;;  %p4497_p10 = por %p4496_p6, %p4495_p2 }
  0x87   : > { %p4498_p1 = pnand %p4497_p10, %p4491_p0 }
  0x89   : > { %4501 = shalt.err (!%p4498_p1)
}
  0x8a   : > { %s4623_s23 = smov 128   ;;  %s4624_s6 = smov 8  }
  0x8b   : > { %4157 = dma.hbm_to_vmem [thread:$0]  (!%p4869_p7), %s4863_s28, 512, %s4865_s26, %s4873_s25, %s4623_s23, %s4623_s23, %s4624_s6  }
  0x8c   : > { %p5870_p3 = scmp.ne.s32.totalorder %s5866_s18, 0 }
  0x8e   : > { %342 = sbr.rel (%p5870_p3) target bundleno = 2720 (0xaa0), region = 52 }
  0x95   : > { %s344_s7 = sand.u32 1, %s4598_s10   ;;  %p5871_p8 = scmp.ne.s32.totalorder %s5865_s17, 0 }
  0x96   : > { %s3109_s15 = sshll.u32 %s344_s7, 5  ;;  %s345_s29 = scalar_lea.sflag [#allocation7], %s344_s7 }
  0x97   : > { %s4904_s30 = scalar_lea.vmem [#allocation6], %s3109_s15 }
  0x98   : > { %4575 = dma.done.wait (%p5871_p8), %s345_s29, 512  }
  0x99   : > { %4577 = vsyncadd (%p5871_p8), %s345_s29, 4294966784  ;;  %p5872_p11 = scmp.ne.s32.totalorder %s5864_s16, 0 }
  0x9b   : > { %4579 = dma.done.wait (%p5872_p11), [#allocation10], 16384  }
  0x9c   : > { %4581 = vsyncadd (%p5872_p11), [#allocation10], 4294950912 }
  0x9d   : > { %4583 = dma.done.wait (%p5872_p11), [#allocation13], 16384  }
  0x9e   : > { %4585 = vsyncadd (%p5872_p11), [#allocation13], 4294950912  ;;  %p3114_p7 = scmp.ne.s32.totalorder %s4606_s12, 0 }
  0x9f   : > { %v4625_v0 = vmov (!%p3114_p7), 0.0   ;;  %s4626_s17 = smov (!%p3114_p7), [#allocation4]   ;;  %s4502_s20 = scalar_lea.hbm (!%p3114_p7), %s5719_s8, 2048 }
  0xa0   : > { %396 = sbr.rel (%p3114_p7) target bundleno = 177 (0xb1), region = 76  ;;  %397 = vst [vmem:[#allocation3] sm:$0xff] (!%p3114_p7), %v4625_v0  ;;  %398 = vst [vmem:[#allocation3 + $0x8] sm:$0xff] (!%p3114_p7), %v4625_v0  ;;  %s408_s18 = sshll.u32 (!%p3114_p7), %s4626_s17, 4  ;;  %s409_s18 = int_to_ptr.vmem [resolvable:$true] %s408_s18 }
  0xa1   : > { %399 = vst [vmem:[#allocation3 + $0x10] sm:$0xff] (!%p3114_p7), %v4625_v0  ;;  %400 = vst [vmem:[#allocation3 + $0x18] sm:$0xff] (!%p3114_p7), %v4625_v0  ;;  %p4503_p9 = scmp.ne.s32.totalorder (!%p3114_p7), %s5719_s8, %s4502_s20  ;;  %p4506_p4 = scmp.lt.u32.totalorder (!%p3114_p7), %s4502_s20, %s5719_s8 }
  0xa3   : > { %p4508_p5 = pnand (!%p3114_p7), %p4506_p4, %p4503_p9 }
  0xa7   : > { %4511 = shalt.err (!%p4508_p5)  }
  0xa8   : > { %s4512_s27 = scalar_lea.vmem %s409_s18, 2048  ;;  %p4517_p13 = scmp.lt.s32.totalorder %s409_s18, %s409_s18 }
  0xa9   : > { %p4513_p12 = scmp.ne.s32.totalorder %s409_s18, %s4512_s27  ;;  %p4518_p0 = scmp.lt.s32.totalorder %s4512_s27, %s4512_s27 }
  0xab   : > { %p4519_p2 = por %p4518_p0, %p4517_p13 }
  0xad   : > { %p4520_p6 = pnand %p4519_p2, %p4513_p12 }
  0xaf   : > { %4523 = shalt.err (!%p4520_p6)  }
  0xb0   : > { %411 = dma.hbm_to_vmem [thread:$0]  %s5719_s8, 2048, %s409_s18, [#allocation5] }
  0xb1 PF: > { %v417_v1 = vld [vmem:[#allocation9 + $0x8] sm:$0xff]  ;;  %v419_v3 = vld [vmem:[#allocation9 + $0x18] sm:$0xff]  ;;  %v416_v6 = vld [vmem:[#allocation9] sm:$0xff]  ;;  %v5727_v8 = vmov 0.0   ;;  %p3139_p10 = scmp.ne.s32.totalorder %s4606_s12, 1 }
  0xb2   : > { %v421_v2 = vld [vmem:[#allocation9 + $0x28] sm:$0xff]  ;;  %v423_v5 = vld [vmem:[#allocation9 + $0x38] sm:$0xff]  ;;  %v420_v7 = vld [vmem:[#allocation9 + $0x20] sm:$0xff]  ;;  %566 = vmatprep.mubr.f32.mxu0 %v5727_v8  ;;  %655 = vmatprep.mubr.f32.mxu1 %v5727_v8 }
  0xb3   : > { %v3199_v4 = vpack.c.bf16 %v421_v2, %v417_v1  ;;  %v3231_v9 = vpack.c.bf16 %v423_v5, %v419_v3  ;;  %v3201_v10 = vpack.c.bf16 %v420_v7, %v416_v6  ;;  %v418_v11 = vld [vmem:[#allocation9 + $0x10] sm:$0xff]  ;;  %v425_v13 = vld [vmem:[#allocation9 + $0x48] sm:$0xff]  ;;  %v427_v16 = vld [vmem:[#allocation9 + $0x58] sm:$0xff] }
  0xb4   : > { %v422_v12 = vld [vmem:[#allocation9 + $0x30] sm:$0xff]  ;;  %v429_v15 = vld [vmem:[#allocation9 + $0x68] sm:$0xff]  ;;  %v431_v17 = vld [vmem:[#allocation9 + $0x78] sm:$0xff] }
  0xb5   : > { %3200 = vmatprep.subr.bf16.mxu0 %v3199_v4  ;;  %v3233_v14 = vpack.c.bf16 %v422_v12, %v418_v11  ;;  %3232 = vmatprep.subr.bf16.mxu1 %v3231_v9  ;;  %v3203_v18 = vpack.c.bf16 %v429_v15, %v425_v13  ;;  %v3235_v19 = vpack.c.bf16 %v431_v17, %v427_v16  ;;  %v424_v20 = vld [vmem:[#allocation9 + $0x40] sm:$0xff]  ;;  %v426_v22 = vld [vmem:[#allocation9 + $0x50] sm:$0xff]  ;;  %v433_v25 = vld [vmem:[#allocation9 + $0x88] sm:$0xff] }
  0xb6   : > { %3202 = vmatpush1.bf16.msra.mxu0 %v3201_v10  ;;  %v428_v21 = vld [vmem:[#allocation9 + $0x60] sm:$0xff]  ;;  %v430_v24 = vld [vmem:[#allocation9 + $0x70] sm:$0xff]  ;;  %v437_v26 = vld [vmem:[#allocation9 + $0xa8] sm:$0xff] }
  0xb7   : > { %3234 = vmatpush1.bf16.msra.mxu1 %v3233_v14  ;;  %v3205_v23 = vpack.c.bf16 %v428_v21, %v424_v20  ;;  %3204 = vmatprep.subr.bf16.mxu0 %v3203_v18  ;;  %v3237_v27 = vpack.c.bf16 %v430_v24, %v426_v22  ;;  %v3207_v28 = vpack.c.bf16 %v437_v26, %v433_v25  ;;  %v435_v29 = vld [vmem:[#allocation9 + $0x98] sm:$0xff]  ;;  %v432_v31 = vld [vmem:[#allocation9 + $0x80] sm:$0xff]  ;;  %v434_v34 = vld [vmem:[#allocation9 + $0x90] sm:$0xff] }
  0xb8   : > { %3236 = vmatprep.subr.bf16.mxu1 %v3235_v19  ;;  %v439_v30 = vld [vmem:[#allocation9 + $0xb8] sm:$0xff]  ;;  %v436_v33 = vld [vmem:[#allocation9 + $0xa0] sm:$0xff]  ;;  %v438_v35 = vld [vmem:[#allocation9 + $0xb0] sm:$0xff] }
  0xb9   : > { %v3239_v32 = vpack.c.bf16 %v439_v30, %v435_v29  ;;  %v3209_v36 = vpack.c.bf16 %v436_v33, %v432_v31  ;;  %v441_v37 = vld [vmem:[#allocation9 + $0xc8] sm:$0xff]  ;;  %v443_v39 = vld [vmem:[#allocation9 + $0xd8] sm:$0xff]  ;;  %v3241_v40 = vpack.c.bf16 %v438_v35, %v434_v34  ;;  %v440_v43 = vld [vmem:[#allocation9 + $0xc0] sm:$0xff] }
  0xba   : > { %3206 = vmatpush1.bf16.msra.mxu0 %v3205_v23  ;;  %v445_v38 = vld [vmem:[#allocation9 + $0xe8] sm:$0xff]  ;;  %v447_v42 = vld [vmem:[#allocation9 + $0xf8] sm:$0xff]  ;;  %v444_v44 = vld [vmem:[#allocation9 + $0xe0] sm:$0xff] }
  0xbb   : > { %3238 = vmatpush1.bf16.msra.mxu1 %v3237_v27  ;;  %3208 = vmatprep.subr.bf16.mxu0 %v3207_v28  ;;  %v3211_v41 = vpack.c.bf16 %v445_v38, %v441_v37  ;;  %v3243_v45 = vpack.c.bf16 %v447_v42, %v443_v39  ;;  %v442_v46 = vld [vmem:[#allocation9 + $0xd0] sm:$0xff]  ;;  %v449_v48 = vld [vmem:[#allocation9 + $0x108] sm:$0xff]  ;;  %v451_v50 = vld [vmem:[#allocation9 + $0x118] sm:$0xff]  ;;  %v3213_v52 = vpack.c.bf16 %v444_v44, %v440_v43 }
  0xbc   : > { %3240 = vmatprep.subr.bf16.mxu1 %v3239_v32  ;;  %v446_v47 = vld [vmem:[#allocation9 + $0xf0] sm:$0xff]  ;;  %v453_v49 = vld [vmem:[#allocation9 + $0x128] sm:$0xff]  ;;  %v455_v51 = vld [vmem:[#allocation9 + $0x138] sm:$0xff] }
  0xbd   : > { %v3245_v53 = vpack.c.bf16 %v446_v47, %v442_v46  ;;  %v3215_v54 = vpack.c.bf16 %v453_v49, %v449_v48  ;;  %v448_v55 = vld [vmem:[#allocation9 + $0x100] sm:$0xff]  ;;  %v450_v57 = vld [vmem:[#allocation9 + $0x110] sm:$0xff]  ;;  %v3247_v58 = vpack.c.bf16 %v455_v51, %v451_v50  ;;  %v457_v60 = vld [vmem:[#allocation9 + $0x148] sm:$0xff] }
  0xbe   : > { %3210 = vmatpush1.bf16.msra.mxu0 %v3209_v36  ;;  %v452_v56 = vld [vmem:[#allocation9 + $0x120] sm:$0xff]  ;;  %v454_v59 = vld [vmem:[#allocation9 + $0x130] sm:$0xff]  ;;  %v461_v61 = vld [vmem:[#allocation9 + $0x168] sm:$0xff] }
  0xbf   : > { %3242 = vmatpush1.bf16.msra.mxu1 %v3241_v40  ;;  %3212 = vmatprep.subr.bf16.mxu0 %v3211_v41  ;;  %v459_v62 = vld [vmem:[#allocation9 + $0x158] sm:$0xff]  ;;  %v3217_v0 = vpack.c.bf16 %v452_v56, %v448_v55  ;;  %v3249_v1 = vpack.c.bf16 %v454_v59, %v450_v57  ;;  %v3219_v2 = vpack.c.bf16 %v461_v61, %v457_v60  ;;  %v456_v3 = vld [vmem:[#allocation9 + $0x140] sm:$0xff]  ;;  %v458_v5 = vld [vmem:[#allocation9 + $0x150] sm:$0xff] }
  0xc0   : > { %3244 = vmatprep.subr.bf16.mxu1 %v3243_v45  ;;  %v463_v63 = vld [vmem:[#allocation9 + $0x178] sm:$0xff]  ;;  %v460_v4 = vld [vmem:[#allocation9 + $0x160] sm:$0xff]  ;;  %v462_v7 = vld [vmem:[#allocation9 + $0x170] sm:$0xff] }
  0xc1   : > { %v3251_v6 = vpack.c.bf16 %v463_v63, %v459_v62  ;;  %v465_v9 = vld [vmem:[#allocation9 + $0x188] sm:$0xff]  ;;  %v467_v11 = vld [vmem:[#allocation9 + $0x198] sm:$0xff]  ;;  %v3221_v13 = vpack.c.bf16 %v460_v4, %v456_v3  ;;  %v3253_v14 = vpack.c.bf16 %v462_v7, %v458_v5  ;;  %v464_v16 = vld [vmem:[#allocation9 + $0x180] sm:$0xff] }
  0xc2   : > { %3214 = vmatpush1.bf16.msra.mxu0 %v3213_v52  ;;  %v469_v10 = vld [vmem:[#allocation9 + $0x1a8] sm:$0xff]  ;;  %v471_v12 = vld [vmem:[#allocation9 + $0x1b8] sm:$0xff]  ;;  %v468_v17 = vld [vmem:[#allocation9 + $0x1a0] sm:$0xff] }
  0xc3   : > { %3246 = vmatpush1.bf16.msra.mxu1 %v3245_v53  ;;  %3216 = vmatprep.subr.bf16.mxu0 %v3215_v54  ;;  %v3223_v15 = vpack.c.bf16 %v469_v10, %v465_v9  ;;  %v466_v18 = vld [vmem:[#allocation9 + $0x190] sm:$0xff]  ;;  %v3255_v19 = vpack.c.bf16 %v471_v12, %v467_v11  ;;  %v473_v21 = vld [vmem:[#allocation9 + $0x1c8] sm:$0xff]  ;;  %v475_v23 = vld [vmem:[#allocation9 + $0x1d8] sm:$0xff]  ;;  %v3225_v25 = vpack.c.bf16 %v468_v17, %v464_v16 }
  0xc4   : > { %3248 = vmatprep.subr.bf16.mxu1 %v3247_v58  ;;  %v470_v20 = vld [vmem:[#allocation9 + $0x1b0] sm:$0xff]  ;;  %v477_v22 = vld [vmem:[#allocation9 + $0x1e8] sm:$0xff]  ;;  %v479_v24 = vld [vmem:[#allocation9 + $0x1f8] sm:$0xff] }
  0xc5   : > { %v3257_v26 = vpack.c.bf16 %v470_v20, %v466_v18  ;;  %v3227_v27 = vpack.c.bf16 %v477_v22, %v473_v21  ;;  %v472_v28 = vld [vmem:[#allocation9 + $0x1c0] sm:$0xff]  ;;  %v474_v30 = vld [vmem:[#allocation9 + $0x1d0] sm:$0xff]  ;;  %v3259_v31 = vpack.c.bf16 %v479_v24, %v475_v23  ;;  %v825_v33 = vld [vmem:[#allocation14 + $0x8] sm:$0xff] }
  0xc6   : > { %3218 = vmatpush1.bf16.msra.mxu0 %v3217_v0  ;;  %v476_v29 = vld [vmem:[#allocation9 + $0x1e0] sm:$0xff]  ;;  %v478_v32 = vld [vmem:[#allocation9 + $0x1f0] sm:$0xff]  ;;  %v829_v34 = vld [vmem:[#allocation14 + $0x28] sm:$0xff] }
  0xc7   : > { %3250 = vmatpush1.bf16.msra.mxu1 %v3249_v1  ;;  %3220 = vmatprep.subr.bf16.mxu0 %v3219_v2  ;;  %v827_v35 = vld [vmem:[#allocation14 + $0x18] sm:$0xff]  ;;  %v3229_v37 = vpack.c.bf16 %v476_v29, %v472_v28  ;;  %v3261_v38 = vpack.c.bf16 %v478_v32, %v474_v30  ;;  %v4933_v39 = vpack.c.bf16 %v829_v34, %v825_v33  ;;  %v824_v40 = vld [vmem:[#allocation14] sm:$0xff]  ;;  %v826_v42 = vld [vmem:[#allocation14 + $0x10] sm:$0xff] }
  0xc8   : > { %3252 = vmatprep.subr.bf16.mxu1 %v3251_v6  ;;  %v831_v36 = vld [vmem:[#allocation14 + $0x38] sm:$0xff]  ;;  %v828_v41 = vld [vmem:[#allocation14 + $0x20] sm:$0xff]  ;;  %v830_v44 = vld [vmem:[#allocation14 + $0x30] sm:$0xff] }
  0xc9   : > { %5873 = vst [vmem:[#allocation25_spill] sm:$0xff] %v4933_v39  ;;  %v4935_v43 = vpack.c.bf16 %v831_v36, %v827_v35  ;;  %v833_v45 = vld [vmem:[#allocation14 + $0x48] sm:$0xff]  ;;  %v835_v47 = vld [vmem:[#allocation14 + $0x58] sm:$0xff]  ;;  %v412_v49 = vld [vmem:[%s4904_s30] sm:$0xff]  ;;  %v4938_v50 = vpack.c.bf16 %v828_v41, %v824_v40  ;;  %v4941_v51 = vpack.c.bf16 %v830_v44, %v826_v42 }
  0xca   : > { %3222 = vmatpush1.bf16.msra.mxu0 %v3221_v13  ;;  %v837_v46 = vld [vmem:[#allocation14 + $0x68] sm:$0xff]  ;;  %v839_v48 = vld [vmem:[#allocation14 + $0x78] sm:$0xff]  ;;  %v832_v53 = vld [vmem:[#allocation14 + $0x40] sm:$0xff] }
  0xcb   : > { %3254 = vmatpush1.bf16.msra.mxu1 %v3253_v14  ;;  %3224 = vmatprep.subr.bf16.mxu0 %v3223_v15  ;;  %5874 = vst [vmem:[#allocation26_spill] sm:$0xff] %v4935_v43  ;;  %v4943_v52 = vpack.c.bf16 %v837_v46, %v833_v45  ;;  %v836_v54 = vld [vmem:[#allocation14 + $0x60] sm:$0xff]  ;;  %v834_v55 = vld [vmem:[#allocation14 + $0x50] sm:$0xff]  ;;  %v4946_v56 = vpack.c.bf16 %v839_v48, %v835_v47  ;;  %v841_v58 = vld [vmem:[#allocation14 + $0x88] sm:$0xff] }
  0xcc   : > { %3256 = vmatprep.subr.bf16.mxu1 %v3255_v19  ;;  %v838_v57 = vld [vmem:[#allocation14 + $0x70] sm:$0xff]  ;;  %v845_v59 = vld [vmem:[#allocation14 + $0xa8] sm:$0xff]  ;;  %v843_v60 = vld [vmem:[#allocation14 + $0x98] sm:$0xff]  ;;  %v4949_v62 = vpack.c.bf16 %v836_v54, %v832_v53 }
  0xcd   : > { %v847_v61 = vld [vmem:[#allocation14 + $0xb8] sm:$0xff]  ;;  %v413_v63 = vld [vmem:[%s4904_s30 + $0x8] sm:$0xff]  ;;  %v4954_v0 = vpack.c.bf16 %v838_v57, %v834_v55  ;;  %v4956_v1 = vpack.c.bf16 %v845_v59, %v841_v58  ;;  %v840_v2 = vld [vmem:[#allocation14 + $0x80] sm:$0xff] }
  0xce   : > { %3226 = vmatpush1.bf16.msra.mxu0 %v3225_v25  ;;  %v844_v3 = vld [vmem:[#allocation14 + $0xa0] sm:$0xff]  ;;  %v842_v4 = vld [vmem:[#allocation14 + $0x90] sm:$0xff]  ;;  %v4959_v5 = vpack.c.bf16 %v847_v61, %v843_v60  ;;  %v849_v7 = vld [vmem:[#allocation14 + $0xc8] sm:$0xff] }
  0xcf   : > { %3258 = vmatpush1.bf16.msra.mxu1 %v3257_v26  ;;  %3228 = vmatprep.subr.bf16.mxu0 %v3227_v27  ;;  %v846_v6 = vld [vmem:[#allocation14 + $0xb0] sm:$0xff]  ;;  %v853_v9 = vld [vmem:[#allocation14 + $0xe8] sm:$0xff]  ;;  %v851_v10 = vld [vmem:[#allocation14 + $0xd8] sm:$0xff]  ;;  %v4964_v12 = vpack.c.bf16 %v844_v3, %v840_v2 }
  0xd0   : > { %3260 = vmatprep.subr.bf16.mxu1 %v3259_v31  ;;  %v855_v11 = vld [vmem:[#allocation14 + $0xf8] sm:$0xff]  ;;  %v414_v13 = vld [vmem:[%s4904_s30 + $0x10] sm:$0xff]  ;;  %v4969_v14 = vpack.c.bf16 %v846_v6, %v842_v4  ;;  %v4971_v15 = vpack.c.bf16 %v853_v9, %v849_v7  ;;  %v848_v16 = vld [vmem:[#allocation14 + $0xc0] sm:$0xff] }
  0xd1   : > { %v852_v17 = vld [vmem:[#allocation14 + $0xe0] sm:$0xff]  ;;  %v850_v18 = vld [vmem:[#allocation14 + $0xd0] sm:$0xff]  ;;  %v4974_v19 = vpack.c.bf16 %v855_v11, %v851_v10  ;;  %v857_v21 = vld [vmem:[#allocation14 + $0x108] sm:$0xff] }
  0xd2   : > { %3230 = vmatpush1.bf16.msra.mxu0 %v3229_v37  ;;  %v854_v20 = vld [vmem:[#allocation14 + $0xf0] sm:$0xff]  ;;  %v861_v22 = vld [vmem:[#allocation14 + $0x128] sm:$0xff]  ;;  %v859_v23 = vld [vmem:[#allocation14 + $0x118] sm:$0xff]  ;;  %v4979_v25 = vpack.c.bf16 %v852_v17, %v848_v16 }
  0xd3   : > { %3262 = vmatpush1.bf16.msra.mxu1 %v3261_v38  ;;  %3264 = vmatprep.subr.bf16.mxu0 %v4933_v39  ;;  %v863_v24 = vld [vmem:[#allocation14 + $0x138] sm:$0xff]  ;;  %v4984_v27 = vpack.c.bf16 %v854_v20, %v850_v18  ;;  %v4986_v28 = vpack.c.bf16 %v861_v22, %v857_v21  ;;  %v856_v29 = vld [vmem:[#allocation14 + $0x100] sm:$0xff]  ;;  %v858_v31 = vld [vmem:[#allocation14 + $0x110] sm:$0xff] }
  0xd4   : > { %3296 = vmatprep.subr.bf16.mxu1 %v4935_v43  ;;  %v415_v26 = vld [vmem:[%s4904_s30 + $0x18] sm:$0xff]  ;;  %v860_v30 = vld [vmem:[#allocation14 + $0x120] sm:$0xff]  ;;  %v4989_v32 = vpack.c.bf16 %v863_v24, %v859_v23  ;;  %v862_v33 = vld [vmem:[#allocation14 + $0x130] sm:$0xff]  ;;  %s5937_s30 = sld [smem:[#allocation90_spill]] }
  0xd5   : > { %567 = vmatmul.mubr.f32.vlgmr.msra.gmra.mrb[0].mxu0 %v412_v49  ;;  %v865_v34 = vld [vmem:[#allocation14 + $0x148] sm:$0xff]  ;;  %v867_v36 = vld [vmem:[#allocation14 + $0x158] sm:$0xff]  ;;  %v4994_v38 = vpack.c.bf16 %v860_v30, %v856_v29  ;;  %v4998_v40 = vpack.c.bf16 %v862_v33, %v858_v31  ;;  %v864_v42 = vld [vmem:[#allocation14 + $0x140] sm:$0xff] }
  0xd6   : > { %656 = vmatmul.mubr.f32.vlgmr.msra.gmra.mrb[0].mxu1 %v412_v49  ;;  %3266 = vmatpush1.bf16.msra.mxu0 %v4938_v50  ;;  %v869_v35 = vld [vmem:[#allocation14 + $0x168] sm:$0xff]  ;;  %v871_v37 = vld [vmem:[#allocation14 + $0x178] sm:$0xff]  ;;  %v868_v44 = vld [vmem:[#allocation14 + $0x160] sm:$0xff] }
  0xd7   : > { %3298 = vmatpush1.bf16.msra.mxu1 %v4941_v51  ;;  %3268 = vmatprep.subr.bf16.mxu0 %v4943_v52  ;;  %v5000_v41 = vpack.c.bf16 %v869_v35, %v865_v34  ;;  %v866_v45 = vld [vmem:[#allocation14 + $0x150] sm:$0xff]  ;;  %v5003_v46 = vpack.c.bf16 %v871_v37, %v867_v36  ;;  %v873_v48 = vld [vmem:[#allocation14 + $0x188] sm:$0xff]  ;;  %v875_v53 = vld [vmem:[#allocation14 + $0x198] sm:$0xff]  ;;  %v5008_v55 = vpack.c.bf16 %v868_v44, %v864_v42 }
  0xd8   : > { %3300 = vmatprep.subr.bf16.mxu1 %v4946_v56  ;;  %572 = vmatprep.mubr.f32.mxu0 %v5727_v8  ;;  %v870_v47 = vld [vmem:[#allocation14 + $0x170] sm:$0xff]  ;;  %v877_v49 = vld [vmem:[#allocation14 + $0x1a8] sm:$0xff]  ;;  %v879_v54 = vld [vmem:[#allocation14 + $0x1b8] sm:$0xff] }
  0xd9   : > { %661 = vmatprep.mubr.f32.mxu1 %v5727_v8  ;;  %573 = vmatmul.mubr.f32.gmra.mrb[2].mxu0 %v413_v63  ;;  %v5012_v57 = vpack.c.bf16 %v870_v47, %v866_v45  ;;  %v5014_v58 = vpack.c.bf16 %v877_v49, %v873_v48  ;;  %v872_v59 = vld [vmem:[#allocation14 + $0x180] sm:$0xff]  ;;  %v874_v61 = vld [vmem:[#allocation14 + $0x190] sm:$0xff]  ;;  %v881_v3 = vld [vmem:[#allocation14 + $0x1c8] sm:$0xff] }
  0xda   : > { %3270 = vmatpush1.bf16.msra.mxu0 %v4949_v62  ;;  %662 = vmatmul.mubr.f32.gmra.mrb[2].mxu1 %v413_v63  ;;  %v876_v60 = vld [vmem:[#allocation14 + $0x1a0] sm:$0xff]  ;;  %v5017_v63 = vpack.c.bf16 %v879_v54, %v875_v53  ;;  %v878_v2 = vld [vmem:[#allocation14 + $0x1b0] sm:$0xff]  ;;  %v885_v4 = vld [vmem:[#allocation14 + $0x1e8] sm:$0xff] }
  0xdb   : > { %3302 = vmatpush1.bf16.msra.mxu1 %v4954_v0  ;;  %3272 = vmatprep.subr.bf16.mxu0 %v4956_v1  ;;  %v883_v6 = vld [vmem:[#allocation14 + $0x1d8] sm:$0xff]  ;;  %v5020_v9 = vpack.c.bf16 %v876_v60, %v872_v59  ;;  %v5024_v10 = vpack.c.bf16 %v878_v2, %v874_v61  ;;  %v5026_v11 = vpack.c.bf16 %v885_v4, %v881_v3  ;;  %v884_v16 = vld [vmem:[#allocation14 + $0x1e0] sm:$0xff]  ;;  %v882_v17 = vld [vmem:[#allocation14 + $0x1d0] sm:$0xff] }
  0xdc   : > { %3304 = vmatprep.subr.bf16.mxu1 %v4959_v5  ;;  %578 = vmatprep.mubr.f32.mxu0 %v5727_v8  ;;  %v887_v7 = vld [vmem:[#allocation14 + $0x1f8] sm:$0xff]  ;;  %v886_v20 = vld [vmem:[#allocation14 + $0x1f0] sm:$0xff]  ;;  %v697_v21 = vld [vmem:[#allocation11 + $0x8] sm:$0xff] }
  0xdd   : > { %667 = vmatprep.mubr.f32.mxu1 %v5727_v8  ;;  %579 = vmatmul.mubr.f32.gmra.mrb[4].mxu0 %v414_v13  ;;  %v5029_v18 = vpack.c.bf16 %v887_v7, %v883_v6  ;;  %v701_v22 = vld [vmem:[#allocation11 + $0x28] sm:$0xff]  ;;  %v699_v23 = vld [vmem:[#allocation11 + $0x18] sm:$0xff]  ;;  %v5036_v29 = vpack.c.bf16 %v886_v20, %v882_v17  ;;  %v696_v31 = vld [vmem:[#allocation11] sm:$0xff] }
  0xde   : > { %3274 = vmatpush1.bf16.msra.mxu0 %v4964_v12  ;;  %668 = vmatmul.mubr.f32.gmra.mrb[4].mxu1 %v414_v13  ;;  %v880_v13 = vld [vmem:[#allocation14 + $0x1c0] sm:$0xff]  ;;  %v703_v24 = vld [vmem:[#allocation11 + $0x38] sm:$0xff]  ;;  %v5038_v30 = vpack.c.bf16 %v701_v22, %v697_v21  ;;  %v698_v34 = vld [vmem:[#allocation11 + $0x10] sm:$0xff] }
  0xdf   : > { %3306 = vmatpush1.bf16.msra.mxu1 %v4969_v14  ;;  %3276 = vmatprep.subr.bf16.mxu0 %v4971_v15  ;;  %5875 = vst [vmem:[#allocation27_spill] sm:$0xff] %v5029_v18  ;;  %5877 = vst [vmem:[#allocation29_spill] sm:$0xff] %v5036_v29  ;;  %v700_v33 = vld [vmem:[#allocation11 + $0x20] sm:$0xff]  ;;  %v5041_v35 = vpack.c.bf16 %v703_v24, %v699_v23  ;;  %v702_v36 = vld [vmem:[#allocation11 + $0x30] sm:$0xff] }
  0xe0   : > { %3308 = vmatprep.subr.bf16.mxu1 %v4974_v19  ;;  %584 = vmatprep.mubr.f32.mxu0 %v5727_v8  ;;  %5878 = vst [vmem:[#allocation30_spill] sm:$0xff] %v5038_v30  ;;  %v705_v37 = vld [vmem:[#allocation11 + $0x48] sm:$0xff]  ;;  %v707_v44 = vld [vmem:[#allocation11 + $0x58] sm:$0xff]  ;;  %v914_v47 = vld [vmem:[#allocation3 + $0x10] sm:$0xff]  ;;  %v5044_v48 = vpack.c.bf16 %v700_v33, %v696_v31  ;;  %v5048_v49 = vpack.c.bf16 %v702_v36, %v698_v34 }
  0xe1   : > { %673 = vmatprep.mubr.f32.mxu1 %v5727_v8  ;;  %585 = vmatmul.mubr.f32.gmra.mrb[6].mxu0 %v415_v26  ;;  %5879 = vst [vmem:[#allocation31_spill] sm:$0xff] %v5041_v35  ;;  %v709_v42 = vld [vmem:[#allocation11 + $0x68] sm:$0xff]  ;;  %v711_v45 = vld [vmem:[#allocation11 + $0x78] sm:$0xff]  ;;  %v704_v54 = vld [vmem:[#allocation11 + $0x40] sm:$0xff] }
  0xe2   : > { %3278 = vmatpush1.bf16.msra.mxu0 %v4979_v25  ;;  %674 = vmatmul.mubr.f32.gmra.mrb[6].mxu1 %v415_v26  ;;  %v5032_v26 = vpack.c.bf16 %v884_v16, %v880_v13  ;;  %v5050_v53 = vpack.c.bf16 %v709_v42, %v705_v37  ;;  %v708_v59 = vld [vmem:[#allocation11 + $0x60] sm:$0xff]  ;;  %v706_v60 = vld [vmem:[#allocation11 + $0x50] sm:$0xff]  ;;  %v5053_v61 = vpack.c.bf16 %v711_v45, %v707_v44  ;;  %v713_v3 = vld [vmem:[#allocation11 + $0x88] sm:$0xff] }
  0xe3   : > { %3310 = vmatpush1.bf16.msra.mxu1 %v4984_v27  ;;  %3280 = vmatprep.subr.bf16.mxu0 %v4986_v28  ;;  %v710_v2 = vld [vmem:[#allocation11 + $0x70] sm:$0xff]  ;;  %v717_v4 = vld [vmem:[#allocation11 + $0xa8] sm:$0xff]  ;;  %v715_v6 = vld [vmem:[#allocation11 + $0x98] sm:$0xff]  ;;  %v5056_v13 = vpack.c.bf16 %v708_v59, %v704_v54 }
  0xe4   : > { %3312 = vmatprep.subr.bf16.mxu1 %v4989_v32  ;;  %981 = vmatprep.mubr.f32.mxu0 %v5727_v8  ;;  %5876 = vst [vmem:[#allocation28_spill] sm:$0xff] %v5032_v26  ;;  %v719_v7 = vld [vmem:[#allocation11 + $0xb8] sm:$0xff]  ;;  %v5060_v16 = vpack.c.bf16 %v710_v2, %v706_v60  ;;  %v5062_v17 = vpack.c.bf16 %v717_v4, %v713_v3  ;;  %v712_v20 = vld [vmem:[#allocation11 + $0x80] sm:$0xff]  ;;  %v714_v22 = vld [vmem:[#allocation11 + $0x90] sm:$0xff] }
  0xe5   : > { %1052 = vmatprep.mubr.f32.mxu1 %v5727_v8  ;;  %v716_v21 = vld [vmem:[#allocation11 + $0xa0] sm:$0xff]  ;;  %v5065_v23 = vpack.c.bf16 %v719_v7, %v715_v6  ;;  %v718_v24 = vld [vmem:[#allocation11 + $0xb0] sm:$0xff]  ;;  %v721_v31 = vld [vmem:[#allocation11 + $0xc8] sm:$0xff] }
  0xe6   : > { %3282 = vmatpush1.bf16.msra.mxu0 %v4994_v38  ;;  %v725_v33 = vld [vmem:[#allocation11 + $0xe8] sm:$0xff]  ;;  %v723_v34 = vld [vmem:[#allocation11 + $0xd8] sm:$0xff]  ;;  %v5070_v37 = vpack.c.bf16 %v716_v21, %v712_v20  ;;  %v5074_v42 = vpack.c.bf16 %v718_v24, %v714_v22  ;;  %v720_v45 = vld [vmem:[#allocation11 + $0xc0] sm:$0xff] }
  0xe7   : > { %3314 = vmatpush1.bf16.msra.mxu1 %v4998_v40  ;;  %3284 = vmatprep.subr.bf16.mxu0 %v5000_v41  ;;  %v727_v36 = vld [vmem:[#allocation11 + $0xf8] sm:$0xff]  ;;  %v5076_v44 = vpack.c.bf16 %v725_v33, %v721_v31  ;;  %v722_v54 = vld [vmem:[#allocation11 + $0xd0] sm:$0xff]  ;;  %v729_v2 = vld [vmem:[#allocation11 + $0x108] sm:$0xff] }
  0xe8   : > { %3316 = vmatprep.subr.bf16.mxu1 %v5003_v46  ;;  %5880 = vst [vmem:[#allocation32_spill] sm:$0xff] %v5074_v42  ;;  %v5079_v59 = vpack.c.bf16 %v727_v36, %v723_v34  ;;  %v726_v60 = vld [vmem:[#allocation11 + $0xf0] sm:$0xff]  ;;  %v733_v3 = vld [vmem:[#allocation11 + $0x128] sm:$0xff]  ;;  %v731_v4 = vld [vmem:[#allocation11 + $0x118] sm:$0xff] }
  0xe9   : > { %5881 = vst [vmem:[#allocation33_spill] sm:$0xff] %v5076_v44  ;;  %v735_v6 = vld [vmem:[#allocation11 + $0x138] sm:$0xff]  ;;  %v5086_v20 = vpack.c.bf16 %v726_v60, %v722_v54  ;;  %v5088_v21 = vpack.c.bf16 %v733_v3, %v729_v2  ;;  %v728_v22 = vld [vmem:[#allocation11 + $0x100] sm:$0xff]  ;;  %v730_v31 = vld [vmem:[#allocation11 + $0x110] sm:$0xff] }
  0xea   : > { %3286 = vmatpush1.bf16.msra.mxu0 %v5008_v55  ;;  %5882 = vst [vmem:[#allocation34_spill] sm:$0xff] %v5079_v59  ;;  %v732_v24 = vld [vmem:[#allocation11 + $0x120] sm:$0xff]  ;;  %v5091_v33 = vpack.c.bf16 %v735_v6, %v731_v4  ;;  %v734_v34 = vld [vmem:[#allocation11 + $0x130] sm:$0xff]  ;;  %v737_v36 = vld [vmem:[#allocation11 + $0x148] sm:$0xff] }
  0xeb   : > { %3318 = vmatpush1.bf16.msra.mxu1 %v5012_v57  ;;  %3288 = vmatprep.subr.bf16.mxu0 %v5014_v58  ;;  %5884 = vst [vmem:[#allocation36_spill] sm:$0xff] %v5086_v20  ;;  %5885 = vst [vmem:[#allocation37_spill] sm:$0xff] %v5088_v21  ;;  %v5098_v54 = vpack.c.bf16 %v734_v34, %v730_v31  ;;  %v736_v2 = vld [vmem:[#allocation11 + $0x140] sm:$0xff]  ;;  %v738_v4 = vld [vmem:[#allocation11 + $0x150] sm:$0xff] }
  0xec   : > { %3320 = vmatprep.subr.bf16.mxu1 %v5017_v63  ;;  %5886 = vst [vmem:[#allocation38_spill] sm:$0xff] %v5091_v33  ;;  %v740_v3 = vld [vmem:[#allocation11 + $0x160] sm:$0xff] }
  0xed   : > { %5888 = vst [vmem:[#allocation40_spill] sm:$0xff] %v5098_v54  ;;  %v744_v34 = vld [vmem:[#allocation11 + $0x180] sm:$0xff] }
  0xee   : > { %3290 = vmatpush1.bf16.msra.mxu0 %v5020_v9 }
  0xef   : > { %3322 = vmatpush1.bf16.msra.mxu1 %v5024_v10  ;;  %3292 = vmatprep.subr.bf16.mxu0 %v5026_v11 }
  0xf0   : > { %3324 = vmatprep.subr.bf16.mxu1 %v5029_v18 }
  0xf2   : > { %3294 = vmatpush1.bf16.msra.mxu0 %v5032_v26 }
  0xf3   : > { %3326 = vmatpush1.bf16.msra.mxu1 %v5036_v29  ;;  %3328 = vmatprep.subr.bf16.mxu0 %v5038_v30 }
  0xf4   : > { %3360 = vmatprep.subr.bf16.mxu1 %v5041_v35 }
  0xf5   : > { %982 = vmatmul.mubr.f32.vlgmr.msra.gmra.mrb[8].mxu0 %v914_v47 }
  0xf6   : > { %1053 = vmatmul.mubr.f32.vlgmr.msra.gmra.mrb[8].mxu1 %v914_v47  ;;  %3330 = vmatpush1.bf16.msra.mxu0 %v5044_v48  ;;  %v724_v47 = vld [vmem:[#allocation11 + $0xe0] sm:$0xff] }
  0xf7   : > { %3362 = vmatpush1.bf16.msra.mxu1 %v5048_v49  ;;  %3332 = vmatprep.subr.bf16.mxu0 %v5050_v53  ;;  %v5082_v7 = vpack.c.bf16 %v724_v47, %v720_v45  ;;  %v739_v45 = vld [vmem:[#allocation11 + $0x158] sm:$0xff] }
  0xf8   : > { %3364 = vmatprep.subr.bf16.mxu1 %v5053_v61  ;;  %1130 = vmatprep.mubr.f32.mxu0 %v5727_v8  ;;  %v743_v47 = vld [vmem:[#allocation11 + $0x178] sm:$0xff] }
  0xf9   : > { %1201 = vmatprep.mubr.f32.mxu1 %v5727_v8  ;;  %5883 = vst [vmem:[#allocation35_spill] sm:$0xff] %v5082_v7  ;;  %v741_v8 = vld [vmem:[#allocation11 + $0x168] sm:$0xff]  ;;  %v5103_v6 = vpack.c.bf16 %v743_v47, %v739_v45  ;;  %v746_v45 = vld [vmem:[#allocation11 + $0x190] sm:$0xff] }
  0xfa   : > { %3334 = vmatpush1.bf16.msra.mxu0 %v5056_v13  ;;  %v5100_v60 = vpack.c.bf16 %v741_v8, %v737_v36  ;;  %v748_v36 = vld [vmem:[#allocation11 + $0x1a0] sm:$0xff] }
  0xfb   : > { %3366 = vmatpush1.bf16.msra.mxu1 %v5060_v16  ;;  %3336 = vmatprep.subr.bf16.mxu0 %v5062_v17  ;;  %5890 = vst [vmem:[#allocation42_spill] sm:$0xff] %v5103_v6 }
  0xfc   : > { %3368 = vmatprep.subr.bf16.mxu1 %v5065_v23  ;;  %5889 = vst [vmem:[#allocation41_spill] sm:$0xff] %v5100_v60 }
  0xfe   : > { %3338 = vmatpush1.bf16.msra.mxu0 %v5070_v37 }
  0xff   : > { %3370 = vmatpush1.bf16.msra.mxu1 %v5074_v42  ;;  %3340 = vmatprep.subr.bf16.mxu0 %v5076_v44  ;;  %v5094_v42 = vpack.c.bf16 %v732_v24, %v728_v22  ;;  %v745_v44 = vld [vmem:[#allocation11 + $0x188] sm:$0xff]  ;;  %v747_v22 = vld [vmem:[#allocation11 + $0x198] sm:$0xff] }
 0x100   : > { %3372 = vmatprep.subr.bf16.mxu1 %v5079_v59  ;;  %v742_v59 = vld [vmem:[#allocation11 + $0x170] sm:$0xff]  ;;  %v751_v24 = vld [vmem:[#allocation11 + $0x1b8] sm:$0xff] }
 0x101   : > { %5887 = vst [vmem:[#allocation39_spill] sm:$0xff] %v5094_v42  ;;  %v5110_v8 = vpack.c.bf16 %v742_v59, %v738_v4  ;;  %v5115_v47 = vpack.c.bf16 %v751_v24, %v747_v22  ;;  %v756_v4 = vld [vmem:[#allocation11 + $0x1e0] sm:$0xff]  ;;  %v754_v24 = vld [vmem:[#allocation11 + $0x1d0] sm:$0xff] }
 0x102   : > { %3342 = vmatpush1.bf16.msra.mxu0 %v5082_v7  ;;  %v749_v7 = vld [vmem:[#allocation11 + $0x1a8] sm:$0xff] }
 0x103   : > { %3374 = vmatpush1.bf16.msra.mxu1 %v5086_v20  ;;  %3344 = vmatprep.subr.bf16.mxu0 %v5088_v21  ;;  %v5106_v20 = vpack.c.bf16 %v740_v3, %v736_v2  ;;  %5892 = vst [vmem:[#allocation44_spill] sm:$0xff] %v5110_v8  ;;  %v5112_v31 = vpack.c.bf16 %v749_v7, %v745_v44  ;;  %5894 = vst [vmem:[#allocation46_spill] sm:$0xff] %v5115_v47  ;;  %v753_v21 = vld [vmem:[#allocation11 + $0x1c8] sm:$0xff]  ;;  %v755_v2 = vld [vmem:[#allocation11 + $0x1d8] sm:$0xff] }
 0x104   : > { %3376 = vmatprep.subr.bf16.mxu1 %v5091_v33  ;;  %v750_v33 = vld [vmem:[#allocation11 + $0x1b0] sm:$0xff]  ;;  %v759_v3 = vld [vmem:[#allocation11 + $0x1f8] sm:$0xff]  ;;  %v752_v7 = vld [vmem:[#allocation11 + $0x1c0] sm:$0xff] }
 0x105   : > { %5891 = vst [vmem:[#allocation43_spill] sm:$0xff] %v5106_v20  ;;  %5893 = vst [vmem:[#allocation45_spill] sm:$0xff] %v5112_v31  ;;  %v5122_v44 = vpack.c.bf16 %v750_v33, %v746_v45  ;;  %v5127_v22 = vpack.c.bf16 %v759_v3, %v755_v2  ;;  %v765_v45 = vld [vmem:[#allocation12 + $0x28] sm:$0xff]  ;;  %v763_v2 = vld [vmem:[#allocation12 + $0x18] sm:$0xff] }
 0x106   : > { %3346 = vmatpush1.bf16.msra.mxu0 %v5094_v42  ;;  %v757_v42 = vld [vmem:[#allocation11 + $0x1e8] sm:$0xff] }
 0x107   : > { %3378 = vmatpush1.bf16.msra.mxu1 %v5098_v54  ;;  %3348 = vmatprep.subr.bf16.mxu0 %v5100_v60  ;;  %v5118_v54 = vpack.c.bf16 %v748_v36, %v744_v34  ;;  %5896 = vst [vmem:[#allocation48_spill] sm:$0xff] %v5122_v44  ;;  %v5124_v59 = vpack.c.bf16 %v757_v42, %v753_v21  ;;  %5898 = vst [vmem:[#allocation50_spill] sm:$0xff] %v5127_v22  ;;  %v910_v42 = vld [vmem:[#allocation3] sm:$0xff]  ;;  %v5901_v21 = vmov 0.0   ;;  %v761_v36 = vld [vmem:[#allocation12 + $0x8] sm:$0xff] }
 0x108   : > { %3380 = vmatprep.subr.bf16.mxu1 %v5103_v6  ;;  %v758_v6 = vld [vmem:[#allocation11 + $0x1f0] sm:$0xff]  ;;  %v5130_v34 = vpack.c.bf16 %v756_v4, %v752_v7  ;;  %v5141_v3 = vpack.c.bf16 %v765_v45, %v761_v36  ;;  %v760_v7 = vld [vmem:[#allocation12] sm:$0xff]  ;;  %v773_v36 = vld [vmem:[#allocation12 + $0x68] sm:$0xff] }
 0x109   : > { %5895 = vst [vmem:[#allocation47_spill] sm:$0xff] %v5118_v54  ;;  %5897 = vst [vmem:[#allocation49_spill] sm:$0xff] %v5124_v59  ;;  %v5134_v33 = vpack.c.bf16 %v758_v6, %v754_v24  ;;  %v767_v6 = vld [vmem:[#allocation12 + $0x38] sm:$0xff]  ;;  %v764_v4 = vld [vmem:[#allocation12 + $0x20] sm:$0xff] }
 0x10a   : > { %3350 = vmatpush1.bf16.msra.mxu0 %v5106_v20  ;;  %5899 = vst [vmem:[#allocation51_spill] sm:$0xff] %v5130_v34  ;;  %5902 = vst [vmem:[#allocation53_spill] sm:$0xff] %v5141_v3  ;;  %v5143_v24 = vpack.c.bf16 %v767_v6, %v763_v2  ;;  %v771_v45 = vld [vmem:[#allocation12 + $0x58] sm:$0xff]  ;;  %v768_v6 = vld [vmem:[#allocation12 + $0x40] sm:$0xff] }
 0x10b   : > { %3382 = vmatpush1.bf16.msra.mxu1 %v5110_v8  ;;  %3352 = vmatprep.subr.bf16.mxu0 %v5112_v31  ;;  %5900 = vst [vmem:[#allocation52_spill] sm:$0xff] %v5134_v33  ;;  %v775_v2 = vld [vmem:[#allocation12 + $0x78] sm:$0xff]  ;;  %v821_v8 = vld [vmem:[#allocation12 + $0x1e8] sm:$0xff]  ;;  %v818_v20 = vld [vmem:[#allocation12 + $0x1d0] sm:$0xff] }
 0x10c   : > { %3384 = vmatprep.subr.bf16.mxu1 %v5115_v47  ;;  %5903 = vst [vmem:[#allocation54_spill] sm:$0xff] %v5143_v24  ;;  %v803_v47 = vld [vmem:[#allocation12 + $0x158] sm:$0xff] }
 0x10e   : > { %3354 = vmatpush1.bf16.msra.mxu0 %v5118_v54 }
 0x10f   : > { %3386 = vmatpush1.bf16.msra.mxu1 %v5122_v44  ;;  %3356 = vmatprep.subr.bf16.mxu0 %v5124_v59  ;;  %v769_v59 = vld [vmem:[#allocation12 + $0x48] sm:$0xff] }
 0x110   : > { %3388 = vmatprep.subr.bf16.mxu1 %v5127_v22  ;;  %v762_v22 = vld [vmem:[#allocation12 + $0x10] sm:$0xff]  ;;  %v5153_v44 = vpack.c.bf16 %v773_v36, %v769_v59  ;;  %v781_v59 = vld [vmem:[#allocation12 + $0xa8] sm:$0xff]  ;;  %v779_v36 = vld [vmem:[#allocation12 + $0x98] sm:$0xff] }
 0x112   : > { %3358 = vmatpush1.bf16.msra.mxu0 %v5130_v34  ;;  %v5145_v34 = vpack.c.bf16 %v764_v4, %v760_v7  ;;  %5906 = vst [vmem:[#allocation57_spill] sm:$0xff] %v5153_v44  ;;  %v772_v7 = vld [vmem:[#allocation12 + $0x60] sm:$0xff]  ;;  %v5155_v4 = vpack.c.bf16 %v775_v2, %v771_v45  ;;  %v783_v45 = vld [vmem:[#allocation12 + $0xb8] sm:$0xff] }
 0x113   : > { %3390 = vmatpush1.bf16.msra.mxu1 %v5134_v33  ;;  %v766_v33 = vld [vmem:[#allocation12 + $0x30] sm:$0xff]  ;;  %3392 = vmatprep.subr.bf16.mxu0 %v5141_v3  ;;  %v5157_v54 = vpack.c.bf16 %v772_v7, %v768_v6  ;;  %v776_v2 = vld [vmem:[#allocation12 + $0x80] sm:$0xff]  ;;  %v5167_v7 = vpack.c.bf16 %v783_v45, %v779_v36  ;;  %v791_v36 = vld [vmem:[#allocation12 + $0xf8] sm:$0xff] }
 0x114   : > { %5904 = vst [vmem:[#allocation55_spill] sm:$0xff] %v5145_v34  ;;  %3424 = vmatprep.subr.bf16.mxu1 %v5143_v24  ;;  %5907 = vst [vmem:[#allocation58_spill] sm:$0xff] %v5155_v4  ;;  %v780_v6 = vld [vmem:[#allocation12 + $0xa0] sm:$0xff] }
 0x115   : > { %1131 = vmatmul.mubr.f32.vlgmr.msra.gmra.mrb[0].mxu0 %v910_v42  ;;  %5908 = vst [vmem:[#allocation59_spill] sm:$0xff] %v5157_v54  ;;  %5911 = vst [vmem:[#allocation62_spill] sm:$0xff] %v5167_v7  ;;  %v5169_v3 = vpack.c.bf16 %v780_v6, %v776_v2  ;;  %v784_v45 = vld [vmem:[#allocation12 + $0xc0] sm:$0xff] }
 0x116   : > { %1202 = vmatmul.mubr.f32.vlgmr.msra.gmra.mrb[0].mxu1 %v910_v42  ;;  %1300 = vmatprep.mubr.f32.mxu0 %v5901_v21  ;;  %v5148_v42 = vpack.c.bf16 %v766_v33, %v762_v22  ;;  %v770_v22 = vld [vmem:[#allocation12 + $0x50] sm:$0xff]  ;;  %v788_v2 = vld [vmem:[#allocation12 + $0xe0] sm:$0xff] }
 0x117   : > { %1371 = vmatprep.mubr.f32.mxu1 %v5901_v21  ;;  %3394 = vmatpush1.bf16.msra.mxu0 %v5145_v34  ;;  %v774_v33 = vld [vmem:[#allocation12 + $0x70] sm:$0xff]  ;;  %5912 = vst [vmem:[#allocation63_spill] sm:$0xff] %v5169_v3 }
 0x118   : > { %5905 = vst [vmem:[#allocation56_spill] sm:$0xff] %v5148_v42  ;;  %3426 = vmatpush1.bf16.msra.mxu1 %v5148_v42  ;;  %3396 = vmatprep.subr.bf16.mxu0 %v5153_v44  ;;  %v5160_v24 = vpack.c.bf16 %v774_v33, %v770_v22  ;;  %v777_v42 = vld [vmem:[#allocation12 + $0x88] sm:$0xff]  ;;  %v778_v22 = vld [vmem:[#allocation12 + $0x90] sm:$0xff]  ;;  %v5181_v44 = vpack.c.bf16 %v788_v2, %v784_v45  ;;  %v792_v45 = vld [vmem:[#allocation12 + $0x100] sm:$0xff] }
 0x119   : > { %3428 = vmatprep.subr.bf16.mxu1 %v5155_v4  ;;  %v5165_v34 = vpack.c.bf16 %v781_v59, %v777_v42  ;;  %v782_v33 = vld [vmem:[#allocation12 + $0xb0] sm:$0xff]  ;;  %v789_v42 = vld [vmem:[#allocation12 + $0xe8] sm:$0xff]  ;;  %v787_v59 = vld [vmem:[#allocation12 + $0xd8] sm:$0xff] }
 0x11a   : > { %5909 = vst [vmem:[#allocation60_spill] sm:$0xff] %v5160_v24  ;;  %v5172_v4 = vpack.c.bf16 %v782_v33, %v778_v22  ;;  %v5179_v6 = vpack.c.bf16 %v791_v36, %v787_v59  ;;  %5916 = vst [vmem:[#allocation67_spill] sm:$0xff] %v5181_v44  ;;  %v786_v22 = vld [vmem:[#allocation12 + $0xd0] sm:$0xff]  ;;  %v795_v59 = vld [vmem:[#allocation12 + $0x118] sm:$0xff] }
 0x11b   : > { %3398 = vmatpush1.bf16.msra.mxu0 %v5157_v54  ;;  %5910 = vst [vmem:[#allocation61_spill] sm:$0xff] %v5165_v34  ;;  %v790_v33 = vld [vmem:[#allocation12 + $0xf0] sm:$0xff]  ;;  %v799_v36 = vld [vmem:[#allocation12 + $0x138] sm:$0xff] }
 0x11c   : > { %3430 = vmatpush1.bf16.msra.mxu1 %v5160_v24  ;;  %3400 = vmatprep.subr.bf16.mxu0 %v5165_v34  ;;  %5913 = vst [vmem:[#allocation64_spill] sm:$0xff] %v5172_v4  ;;  %v785_v24 = vld [vmem:[#allocation12 + $0xc8] sm:$0xff]  ;;  %5915 = vst [vmem:[#allocation66_spill] sm:$0xff] %v5179_v6  ;;  %v5191_v2 = vpack.c.bf16 %v799_v36, %v795_v59  ;;  %v794_v34 = vld [vmem:[#allocation12 + $0x110] sm:$0xff] }
 0x11d   : > { %3432 = vmatprep.subr.bf16.mxu1 %v5167_v7  ;;  %v5177_v54 = vpack.c.bf16 %v789_v42, %v785_v24  ;;  %v5184_v7 = vpack.c.bf16 %v790_v33, %v786_v22  ;;  %v797_v24 = vld [vmem:[#allocation12 + $0x128] sm:$0xff]  ;;  %v804_v59 = vld [vmem:[#allocation12 + $0x160] sm:$0xff] }
 0x11e   : > { %5919 = vst [vmem:[#allocation70_spill] sm:$0xff] %v5191_v2 }
 0x11f   : > { %3402 = vmatpush1.bf16.msra.mxu0 %v5169_v3  ;;  %5914 = vst [vmem:[#allocation65_spill] sm:$0xff] %v5177_v54  ;;  %5917 = vst [vmem:[#allocation68_spill] sm:$0xff] %v5184_v7  ;;  %v796_v3 = vld [vmem:[#allocation12 + $0x120] sm:$0xff] }
 0x120   : > { %3434 = vmatpush1.bf16.msra.mxu1 %v5172_v4  ;;  %3404 = vmatprep.subr.bf16.mxu0 %v5177_v54  ;;  %v793_v4 = vld [vmem:[#allocation12 + $0x108] sm:$0xff]  ;;  %v798_v54 = vld [vmem:[#allocation12 + $0x130] sm:$0xff]  ;;  %v5194_v22 = vpack.c.bf16 %v796_v3, %v792_v45 }
 0x121   : > { %3436 = vmatprep.subr.bf16.mxu1 %v5179_v6  ;;  %v5189_v42 = vpack.c.bf16 %v797_v24, %v793_v4  ;;  %v5196_v33 = vpack.c.bf16 %v798_v54, %v794_v34  ;;  %v805_v6 = vld [vmem:[#allocation12 + $0x168] sm:$0xff]  ;;  %v807_v24 = vld [vmem:[#allocation12 + $0x178] sm:$0xff]  ;;  %v802_v54 = vld [vmem:[#allocation12 + $0x150] sm:$0xff] }
 0x122   : > { %5920 = vst [vmem:[#allocation71_spill] sm:$0xff] %v5194_v22  ;;  %v5203_v36 = vpack.c.bf16 %v807_v24, %v803_v47  ;;  %v806_v34 = vld [vmem:[#allocation12 + $0x170] sm:$0xff]  ;;  %v809_v45 = vld [vmem:[#allocation12 + $0x188] sm:$0xff]  ;;  %v808_v47 = vld [vmem:[#allocation12 + $0x180] sm:$0xff] }
 0x123   : > { %3406 = vmatpush1.bf16.msra.mxu0 %v5181_v44  ;;  %5918 = vst [vmem:[#allocation69_spill] sm:$0xff] %v5189_v42  ;;  %5921 = vst [vmem:[#allocation72_spill] sm:$0xff] %v5196_v33  ;;  %v801_v44 = vld [vmem:[#allocation12 + $0x148] sm:$0xff]  ;;  %v812_v24 = vld [vmem:[#allocation12 + $0x1a0] sm:$0xff] }
 0x124   : > { %3438 = vmatpush1.bf16.msra.mxu1 %v5184_v7  ;;  %3408 = vmatprep.subr.bf16.mxu0 %v5189_v42  ;;  %v5199_v4 = vpack.c.bf16 %v805_v6, %v801_v44  ;;  %v800_v7 = vld [vmem:[#allocation12 + $0x140] sm:$0xff]  ;;  %5923 = vst [vmem:[#allocation74_spill] sm:$0xff] %v5203_v36  ;;  %v5208_v42 = vpack.c.bf16 %v806_v34, %v802_v54  ;;  %v813_v44 = vld [vmem:[#allocation12 + $0x1a8] sm:$0xff]  ;;  %v811_v6 = vld [vmem:[#allocation12 + $0x198] sm:$0xff] }
 0x125   : > { %3440 = vmatprep.subr.bf16.mxu1 %v5191_v2  ;;  %v5205_v3 = vpack.c.bf16 %v804_v59, %v800_v7  ;;  %v815_v2 = vld [vmem:[#allocation12 + $0x1b8] sm:$0xff]  ;;  %v5211_v31 = vpack.c.bf16 %v813_v44, %v809_v45  ;;  %v810_v7 = vld [vmem:[#allocation12 + $0x190] sm:$0xff]  ;;  %v5217_v54 = vpack.c.bf16 %v812_v24, %v808_v47  ;;  %v816_v45 = vld [vmem:[#allocation12 + $0x1c0] sm:$0xff] }
 0x126   : > { %5922 = vst [vmem:[#allocation73_spill] sm:$0xff] %v5199_v4  ;;  %5925 = vst [vmem:[#allocation76_spill] sm:$0xff] %v5208_v42  ;;  %v814_v59 = vld [vmem:[#allocation12 + $0x1b0] sm:$0xff] }
 0x127   : > { %3410 = vmatpush1.bf16.msra.mxu0 %v5194_v22  ;;  %5924 = vst [vmem:[#allocation75_spill] sm:$0xff] %v5205_v3  ;;  %5926 = vst [vmem:[#allocation77_spill] sm:$0xff] %v5211_v31  ;;  %v5213_v22 = vpack.c.bf16 %v815_v2, %v811_v6  ;;  %v5219_v34 = vpack.c.bf16 %v814_v59, %v810_v7  ;;  %v820_v6 = vld [vmem:[#allocation12 + $0x1e0] sm:$0xff] }
 0x128   : > { %3442 = vmatpush1.bf16.msra.mxu1 %v5196_v33  ;;  %3412 = vmatprep.subr.bf16.mxu0 %v5199_v4  ;;  %v817_v33 = vld [vmem:[#allocation12 + $0x1c8] sm:$0xff]  ;;  %5928 = vst [vmem:[#allocation79_spill] sm:$0xff] %v5217_v54  ;;  %v819_v4 = vld [vmem:[#allocation12 + $0x1d8] sm:$0xff]  ;;  %v5229_v47 = vpack.c.bf16 %v820_v6, %v816_v45 }
 0x129   : > { %3444 = vmatprep.subr.bf16.mxu1 %v5203_v36  ;;  %5927 = vst [vmem:[#allocation78_spill] sm:$0xff] %v5213_v22  ;;  %5929 = vst [vmem:[#allocation80_spill] sm:$0xff] %v5219_v34  ;;  %v823_v36 = vld [vmem:[#allocation12 + $0x1f8] sm:$0xff]  ;;  %v5223_v2 = vpack.c.bf16 %v821_v8, %v817_v33  ;;  %v482_v8 = vlaneseq }
 0x12a   : > { %v5225_v44 = vpack.c.bf16 %v823_v36, %v819_v4  ;;  %5932 = vst [vmem:[#allocation83_spill] sm:$0xff] %v5229_v47 }
 0x12b   : > { %3414 = vmatpush1.bf16.msra.mxu0 %v5205_v3  ;;  %5930 = vst [vmem:[#allocation81_spill] sm:$0xff] %v5223_v2  ;;  %v822_v3 = vld [vmem:[#allocation12 + $0x1f0] sm:$0xff]  ;;  %v5239_v33 = vshrl.u32 %v482_v8, 7 }
 0x12c   : > { %3446 = vmatpush1.bf16.msra.mxu1 %v5208_v42  ;;  %3416 = vmatprep.subr.bf16.mxu0 %v5211_v31  ;;  %5931 = vst [vmem:[#allocation82_spill] sm:$0xff] %v5225_v44  ;;  %v5231_v24 = vpack.c.bf16 %v822_v3, %v818_v20  ;;  %v480_v20 = vld [vmem:[%s5714_s3] sm:$0xf] }
 0x12d   : > { %3448 = vmatprep.subr.bf16.mxu1 %v5213_v22  ;;  %v5825_v4 = vsub.s32 0, %v5239_v33  ;;  %v5826_v36 = vsub.s32 1, %v5239_v33  ;;  %v5833_v45 = vsub.s32 3, %v5239_v33 }
 0x12e   : > { %5933 = vst [vmem:[#allocation84_spill] sm:$0xff] %v5231_v24 }
 0x12f   : > { %3418 = vmatpush1.bf16.msra.mxu0 %v5217_v54  ;;  %v5248_v3 = vrot.slane %v480_v20, %v5825_v4  ;;  %v5252_v7 = vrot.slane %v480_v20, %v5826_v36  ;;  %v5259_v4 = vrot.slane %v480_v20, %v5833_v45  ;;  %v5842_v36 = vsub.s32 2, %v5239_v33 }
 0x130   : > { %3450 = vmatpush1.bf16.msra.mxu1 %v5219_v34  ;;  %3420 = vmatprep.subr.bf16.mxu0 %v5223_v2 }
 0x131   : > { %3452 = vmatprep.subr.bf16.mxu1 %v5225_v44  ;;  %5934 = vst [vmem:[#allocation85_spill] sm:$0xff] %v5248_v3  ;;  %5935 = vst [vmem:[#allocation86_spill] sm:$0xff] %v5252_v7 }
 0x132   : > { %5936 = vst [vmem:[#allocation87_spill] sm:$0xff] %v5259_v4 }
 0x133   : > { %3422 = vmatpush1.bf16.msra.mxu0 %v5229_v47 }
 0x134   : > { %3454 = vmatpush1.bf16.msra.mxu1 %v5231_v24  ;;  %3456 = vmatprep.subr.bf16.mxu0 %v4933_v39 }
 0x135   : > { %3488 = vmatprep.subr.bf16.mxu1 %v4935_v43 }
 0x1e8   : > { %v1132_v59 = vpop.f32.mrb[0].mxu0 }
 0x1e9   : > { %v4055_v6 = vadd.f32 %v1132_v59, %v5248_v3  ;;  %v1203_v8 = vpop.f32.mrb[0].mxu1  ;;  %v1134_v43 = vpop.f32.mrb[1].mxu0  ;;  %v5265_v59 = vrot.slane %v480_v20, %v5842_v36 }
 0x1ea   : > { %v4056_v39 = vadd.f32 %v1134_v43, %v5252_v7  ;;  %v1205_v24 = vpop.f32.mrb[1].mxu1 }
 0x1eb   : > { %v3115_v47 = vmul.f32 -1.442695, %v4055_v6  ;;  %v4064_v2 = vadd.f32 %v1205_v24, %v5259_v4  ;;  %v4063_v43 = vadd.f32 %v1203_v8, %v5265_v59 }
 0x1ec   : > { %v3116_v44 = vmul.f32 -1.442695, %v4056_v39 }
 0x1ed   : > { %4232 = vpow2.f32 %v3115_v47  ;;  %v3117_v3 = vmul.f32 -1.442695, %v4064_v2 }
 0x1ee   : > { %4234 = vpow2.f32 %v3116_v44  ;;  %v912_v44 = vld [vmem:[#allocation3 + $0x8] sm:$0xff] }
 0x1ef   : > { %4236 = vpow2.f32 %v3117_v3 }
 0x1f0   : > { %4238 = vtanh.f32 %v4063_v43 }
 0x1f7   : > { %v4233_v7 = vpop.eup %4232 }
 0x1f8   : > { %v4235_v6 = vpop.eup %4234  ;;  %v1215_v39 = vadd.f32 1.0, %v4233_v7 }
 0x1f9   : > { %v1221_v45 = vadd.f32 1.0, %v4235_v6  ;;  %v4237_v47 = vpop.eup %4236 }
 0x1fa   : > { %4240 = vrcp.f32 %v1215_v39  ;;  %v4239_v34 = vpop.eup %4238  ;;  %v1228_v22 = vadd.f32 1.0, %v4237_v47 }
 0x1fb   : > { %4242 = vrcp.f32 %v1221_v45 }
 0x1fc   : > { %4244 = vrcp.f32 %v1228_v22  ;;  %v888_v22 = vld [vmem:[%s5937_s30] sm:$0xf] }
 0x204   : > { %v4241_v54 = vpop.eup %4240 }
 0x205   : > { %v4243_v24 = vpop.eup %4242  ;;  %v1232_v4 = vmul.f32 %v4241_v54, %v4239_v34  ;;  %v5938_v54 = vsub.s32 0, %v5239_v33 }
 0x206   : > { %v1231_v20 = vmul.f32 %v4243_v24, %v912_v44  ;;  %v4245_v2 = vpop.eup %4244 }
 0x207   : > { %v5314_v34 = vrot.slane %v888_v22, %v5938_v54 }
 0x208   : > { %v5268_v36 = vadd.f32 %v1232_v4, %v1231_v20  ;;  %v5940_v4 = vsub.s32 1, %v5239_v33 }
 0x209   : > { %5939 = vst [vmem:[#allocation88_spill] sm:$0xff] %v5314_v34 }
 0x20a   : > { %4246 = vtanh.f32 %v5268_v36  ;;  %v5318_v45 = vrot.slane %v888_v22, %v5940_v4  ;;  %v5943_v4 = vsub.s32 2, %v5239_v33 }
 0x214   : > { %v4247_v7 = vpop.eup %4246 }
 0x215   : > { %v5271_v3 = vmul.f32 %v4247_v7, %v4245_v2  ;;  %v5941_v2 = vsub.s32 3, %v5239_v33 }
 0x217   : > { %1301 = vmatmul.mubr.f32.vlgmr.msra.gmra.mrb[8].mxu0 %v5271_v3  ;;  %1372 = vmatmul.mubr.f32.vlgmr.msra.gmra.mrb[8].mxu1 %v5271_v3  ;;  %v5324_v7 = vrot.slane %v888_v22, %v5941_v2 }
 0x218   : > { %3458 = vmatpush1.bf16.msra.mxu0 %v4938_v50  ;;  %3490 = vmatpush1.bf16.msra.mxu1 %v4941_v51 }
 0x219   : > { %3460 = vmatprep.subr.bf16.mxu0 %v4943_v52  ;;  %3492 = vmatprep.subr.bf16.mxu1 %v4946_v56  ;;  %5942 = vst [vmem:[#allocation89_spill] sm:$0xff] %v5324_v7 }
 0x21a   : > { %1470 = vmatprep.mubr.f32.mxu0 %v5901_v21  ;;  %1541 = vmatprep.mubr.f32.mxu1 %v5901_v21 }
 0x21c   : > { %3462 = vmatpush1.bf16.msra.mxu0 %v4949_v62  ;;  %3494 = vmatpush1.bf16.msra.mxu1 %v4954_v0 }
 0x21d   : > { %3464 = vmatprep.subr.bf16.mxu0 %v4956_v1  ;;  %3496 = vmatprep.subr.bf16.mxu1 %v4959_v5 }
 0x220   : > { %3466 = vmatpush1.bf16.msra.mxu0 %v4964_v12  ;;  %3498 = vmatpush1.bf16.msra.mxu1 %v4969_v14 }
 0x221   : > { %3468 = vmatprep.subr.bf16.mxu0 %v4971_v15  ;;  %3500 = vmatprep.subr.bf16.mxu1 %v4974_v19 }
 0x224   : > { %3470 = vmatpush1.bf16.msra.mxu0 %v4979_v25  ;;  %3502 = vmatpush1.bf16.msra.mxu1 %v4984_v27 }
 0x225   : > { %3472 = vmatprep.subr.bf16.mxu0 %v4986_v28  ;;  %3504 = vmatprep.subr.bf16.mxu1 %v4989_v32 }
 0x228   : > { %3474 = vmatpush1.bf16.msra.mxu0 %v4994_v38  ;;  %3506 = vmatpush1.bf16.msra.mxu1 %v4998_v40 }
 0x229   : > { %3476 = vmatprep.subr.bf16.mxu0 %v5000_v41  ;;  %3508 = vmatprep.subr.bf16.mxu1 %v5003_v46 }
 0x22c   : > { %3478 = vmatpush1.bf16.msra.mxu0 %v5008_v55  ;;  %3510 = vmatpush1.bf16.msra.mxu1 %v5012_v57 }
 0x22d   : > { %3480 = vmatprep.subr.bf16.mxu0 %v5014_v58  ;;  %3512 = vmatprep.subr.bf16.mxu1 %v5017_v63 }
 0x230   : > { %3482 = vmatpush1.bf16.msra.mxu0 %v5020_v9  ;;  %3514 = vmatpush1.bf16.msra.mxu1 %v5024_v10 }
 0x231   : > { %3484 = vmatprep.subr.bf16.mxu0 %v5026_v11  ;;  %3516 = vmatprep.subr.bf16.mxu1 %v5029_v18 }
 0x234   : > { %3486 = vmatpush1.bf16.msra.mxu0 %v5032_v26  ;;  %3518 = vmatpush1.bf16.msra.mxu1 %v5036_v29 }
 0x235   : > { %3520 = vmatprep.subr.bf16.mxu0 %v5038_v30  ;;  %3552 = vmatprep.subr.bf16.mxu1 %v5041_v35  ;;  %v5329_v35 = vrot.slane %v888_v22, %v5943_v4 }
 0x2ea   : > { %v1302_v8 = vpop.f32.mrb[8].mxu0  ;;  %v1373_v43 = vpop.f32.mrb[8].mxu1 }
 0x2eb   : > { %v4071_v6 = vadd.f32 %v1302_v8, %v5314_v34  ;;  %v1304_v39 = vpop.f32.mrb[9].mxu0  ;;  %v1375_v47 = vpop.f32.mrb[9].mxu1  ;;  %v4073_v8 = vadd.f32 %v1373_v43, %v5329_v35 }
 0x2ec   : > { %v4072_v44 = vadd.f32 %v1304_v39, %v5318_v45  ;;  %v4074_v54 = vadd.f32 %v1375_v47, %v5324_v7 }
 0x2ed   : > { %v3118_v24 = vmul.f32 -1.442695, %v4071_v6 }
 0x2ee   : > { %v3119_v20 = vmul.f32 -1.442695, %v4072_v44  ;;  %v3120_v30 = vmul.f32 -1.442695, %v4074_v54  ;;  %v5946_v54 = vld [vmem:[#allocation34_spill] sm:$0xff] }
 0x2ef   : > { %4248 = vpow2.f32 %v3118_v24 }
 0x2f0   : > { %4250 = vpow2.f32 %v3119_v20  ;;  %v916_v20 = vld [vmem:[#allocation3 + $0x18] sm:$0xff] }
 0x2f1   : > { %4252 = vpow2.f32 %v3120_v30 }
 0x2f2   : > { %4254 = vtanh.f32 %v4073_v8  ;;  %v5947_v8 = vld [vmem:[#allocation35_spill] sm:$0xff] }
 0x2f9   : > { %v4249_v34 = vpop.eup %4248 }
 0x2fa   : > { %v4251_v29 = vpop.eup %4250  ;;  %v1385_v39 = vadd.f32 1.0, %v4249_v34 }
 0x2fb   : > { %v1391_v6 = vadd.f32 1.0, %v4251_v29  ;;  %v4253_v44 = vpop.eup %4252  ;;  %v5944_v29 = vld [vmem:[#allocation32_spill] sm:$0xff] }
 0x2fc   : > { %4256 = vrcp.f32 %v1385_v39  ;;  %v4255_v24 = vpop.eup %4254  ;;  %v1398_v33 = vadd.f32 1.0, %v4253_v44  ;;  %v5948_v39 = vld [vmem:[#allocation36_spill] sm:$0xff]  ;;  %v5950_v44 = vld [vmem:[#allocation38_spill] sm:$0xff] }
 0x2fd   : > { %4258 = vrcp.f32 %v1391_v6  ;;  %v5949_v6 = vld [vmem:[#allocation37_spill] sm:$0xff] }
 0x2fe   : > { %4260 = vrcp.f32 %v1398_v33  ;;  %v5955_v33 = vld [vmem:[#allocation44_spill] sm:$0xff] }
 0x306   : > { %v4257_v2 = vpop.eup %4256 }
 0x307   : > { %v4259_v47 = vpop.eup %4258  ;;  %v1402_v7 = vmul.f32 %v4257_v2, %v4255_v24  ;;  %v5951_v24 = vld [vmem:[#allocation39_spill] sm:$0xff]  ;;  %v5953_v2 = vld [vmem:[#allocation42_spill] sm:$0xff] }
 0x308   : > { %v1401_v22 = vmul.f32 %v4259_v47, %v916_v20  ;;  %v4261_v43 = vpop.eup %4260  ;;  %v5952_v20 = vld [vmem:[#allocation40_spill] sm:$0xff]  ;;  %v5954_v47 = vld [vmem:[#allocation43_spill] sm:$0xff] }
 0x30a   : > { %v5332_v4 = vadd.f32 %v1402_v7, %v1401_v22  ;;  %v5945_v7 = vld [vmem:[#allocation33_spill] sm:$0xff] }
 0x30b   : > { %v5956_v22 = vld [vmem:[#allocation45_spill] sm:$0xff] }
 0x30c   : > { %4262 = vtanh.f32 %v5332_v4 }
 0x316   : > { %v4263_v34 = vpop.eup %4262 }
 0x317   : > { %v1405_v30 = vmul.f32 %v4263_v34, %v4261_v43  ;;  %v5957_v43 = vld [vmem:[#allocation46_spill] sm:$0xff]  ;;  %v5958_v34 = vld [vmem:[#allocation47_spill] sm:$0xff] }
 0x319   : > { %1471 = vmatmul.mubr.f32.vlgmr.msra.gmra.mrb[10].mxu0 %v1405_v30  ;;  %1542 = vmatmul.mubr.f32.vlgmr.msra.gmra.mrb[10].mxu1 %v1405_v30  ;;  %v5959_v30 = vld [vmem:[#allocation48_spill] sm:$0xff] }
 0x31a   : > { %3522 = vmatpush1.bf16.msra.mxu0 %v5044_v48  ;;  %3554 = vmatpush1.bf16.msra.mxu1 %v5048_v49 }
 0x31b   : > { %3524 = vmatprep.subr.bf16.mxu0 %v5050_v53  ;;  %3556 = vmatprep.subr.bf16.mxu1 %v5053_v61 }
 0x31c   : > { %1619 = vmatprep.mubr.f32.mxu0 %v5901_v21  ;;  %1690 = vmatprep.mubr.f32.mxu1 %v5901_v21 }
 0x31e   : > { %3526 = vmatpush1.bf16.msra.mxu0 %v5056_v13  ;;  %3558 = vmatpush1.bf16.msra.mxu1 %v5060_v16 }
 0x31f   : > { %3528 = vmatprep.subr.bf16.mxu0 %v5062_v17  ;;  %3560 = vmatprep.subr.bf16.mxu1 %v5065_v23 }
 0x322   : > { %3530 = vmatpush1.bf16.msra.mxu0 %v5070_v37  ;;  %3562 = vmatpush1.bf16.msra.mxu1 %v5944_v29 }
 0x323   : > { %3532 = vmatprep.subr.bf16.mxu0 %v5945_v7  ;;  %3564 = vmatprep.subr.bf16.mxu1 %v5946_v54 }
 0x326   : > { %3534 = vmatpush1.bf16.msra.mxu0 %v5947_v8  ;;  %3566 = vmatpush1.bf16.msra.mxu1 %v5948_v39 }
 0x327   : > { %3536 = vmatprep.subr.bf16.mxu0 %v5949_v6  ;;  %3568 = vmatprep.subr.bf16.mxu1 %v5950_v44  ;;  %v5960_v44 = vld [vmem:[#allocation49_spill] sm:$0xff] }
 0x32a   : > { %3538 = vmatpush1.bf16.msra.mxu0 %v5951_v24  ;;  %3570 = vmatpush1.bf16.msra.mxu1 %v5952_v20  ;;  %v5961_v24 = vld [vmem:[#allocation50_spill] sm:$0xff]  ;;  %v5962_v20 = vld [vmem:[#allocation51_spill] sm:$0xff] }
 0x32b   : > { %3540 = vmatprep.subr.bf16.mxu0 %v5100_v60  ;;  %3572 = vmatprep.subr.bf16.mxu1 %v5953_v2  ;;  %v5963_v60 = vld [vmem:[#allocation52_spill] sm:$0xff]  ;;  %v5964_v2 = vld [vmem:[#allocation53_spill] sm:$0xff] }
 0x32e   : > { %3542 = vmatpush1.bf16.msra.mxu0 %v5954_v47  ;;  %3574 = vmatpush1.bf16.msra.mxu1 %v5955_v33  ;;  %v5965_v47 = vld [vmem:[#allocation54_spill] sm:$0xff] }
 0x32f   : > { %3544 = vmatprep.subr.bf16.mxu0 %v5956_v22  ;;  %3576 = vmatprep.subr.bf16.mxu1 %v5957_v43  ;;  %v5966_v43 = vld [vmem:[#allocation55_spill] sm:$0xff]  ;;  %v5980_v22 = vld [vmem:[#allocation69_spill] sm:$0xff]  ;;  %v5997_v33 = vld [vmem:[#allocation86_spill] sm:$0xff] }
 0x332   : > { %3546 = vmatpush1.bf16.msra.mxu0 %v5958_v34  ;;  %3578 = vmatpush1.bf16.msra.mxu1 %v5959_v30  ;;  %v5967_v34 = vld [vmem:[#allocation56_spill] sm:$0xff]  ;;  %v5968_v30 = vld [vmem:[#allocation57_spill] sm:$0xff] }
 0x333   : > { %3548 = vmatprep.subr.bf16.mxu0 %v5960_v44  ;;  %3580 = vmatprep.subr.bf16.mxu1 %v5961_v24  ;;  %v5969_v44 = vld [vmem:[#allocation58_spill] sm:$0xff]  ;;  %v5979_v24 = vld [vmem:[#allocation68_spill] sm:$0xff] }
 0x336   : > { %3550 = vmatpush1.bf16.msra.mxu0 %v5962_v20  ;;  %3582 = vmatpush1.bf16.msra.mxu1 %v5963_v60  ;;  %v5970_v60 = vld [vmem:[#allocation59_spill] sm:$0xff]  ;;  %v5973_v20 = vld [vmem:[#allocation62_spill] sm:$0xff] }
 0x337   : > { %3584 = vmatprep.subr.bf16.mxu0 %v5964_v2  ;;  %3616 = vmatprep.subr.bf16.mxu1 %v5965_v47  ;;  %v5971_v2 = vld [vmem:[#allocation60_spill] sm:$0xff]  ;;  %v5972_v47 = vld [vmem:[#allocation61_spill] sm:$0xff] }
 0x339   : > { %1620 = vmatmul.mubr.f32.vlgmr.msra.gmra.mrb[2].mxu0 %v5271_v3  ;;  %1691 = vmatmul.mubr.f32.vlgmr.msra.gmra.mrb[2].mxu1 %v5271_v3  ;;  %v5974_v3 = vld [vmem:[#allocation63_spill] sm:$0xff] }
 0x33a   : > { %3586 = vmatpush1.bf16.msra.mxu0 %v5966_v43  ;;  %3618 = vmatpush1.bf16.msra.mxu1 %v5967_v34  ;;  %v5975_v43 = vld [vmem:[#allocation64_spill] sm:$0xff]  ;;  %v5976_v34 = vld [vmem:[#allocation65_spill] sm:$0xff] }
 0x33b   : > { %3588 = vmatprep.subr.bf16.mxu0 %v5968_v30  ;;  %3620 = vmatprep.subr.bf16.mxu1 %v5969_v44  ;;  %v5977_v30 = vld [vmem:[#allocation66_spill] sm:$0xff]  ;;  %v5978_v44 = vld [vmem:[#allocation67_spill] sm:$0xff] }
 0x33c   : > { %1789 = vmatprep.mubr.f32.mxu0 %v5901_v21  ;;  %1860 = vmatprep.mubr.f32.mxu1 %v5901_v21 }
 0x33e   : > { %3590 = vmatpush1.bf16.msra.mxu0 %v5970_v60  ;;  %3622 = vmatpush1.bf16.msra.mxu1 %v5971_v2  ;;  %v5981_v60 = vld [vmem:[#allocation70_spill] sm:$0xff]  ;;  %v5982_v2 = vld [vmem:[#allocation71_spill] sm:$0xff] }
 0x33f   : > { %3592 = vmatprep.subr.bf16.mxu0 %v5972_v47  ;;  %3624 = vmatprep.subr.bf16.mxu1 %v5973_v20  ;;  %v5983_v47 = vld [vmem:[#allocation72_spill] sm:$0xff]  ;;  %v5984_v20 = vld [vmem:[#allocation73_spill] sm:$0xff] }
 0x342   : > { %3594 = vmatpush1.bf16.msra.mxu0 %v5974_v3  ;;  %3626 = vmatpush1.bf16.msra.mxu1 %v5975_v43  ;;  %v5985_v3 = vld [vmem:[#allocation74_spill] sm:$0xff]  ;;  %v5986_v43 = vld [vmem:[#allocation75_spill] sm:$0xff] }
 0x343   : > { %3596 = vmatprep.subr.bf16.mxu0 %v5976_v34  ;;  %3628 = vmatprep.subr.bf16.mxu1 %v5977_v30  ;;  %v5996_v30 = vld [vmem:[#allocation85_spill] sm:$0xff] }
 0x346   : > { %3598 = vmatpush1.bf16.msra.mxu0 %v5978_v44  ;;  %3630 = vmatpush1.bf16.msra.mxu1 %v5979_v24  ;;  %v5987_v44 = vld [vmem:[#allocation78_spill] sm:$0xff]  ;;  %v5988_v24 = vld [vmem:[#allocation79_spill] sm:$0xff] }
 0x347   : > { %3600 = vmatprep.subr.bf16.mxu0 %v5980_v22  ;;  %3632 = vmatprep.subr.bf16.mxu1 %v5981_v60  ;;  %v5989_v22 = vld [vmem:[#allocation80_spill] sm:$0xff]  ;;  %v5990_v60 = vld [vmem:[#allocation81_spill] sm:$0xff] }
 0x34a   : > { %3602 = vmatpush1.bf16.msra.mxu0 %v5982_v2  ;;  %3634 = vmatpush1.bf16.msra.mxu1 %v5983_v47  ;;  %v5991_v2 = vld [vmem:[#allocation82_spill] sm:$0xff]  ;;  %v5992_v47 = vld [vmem:[#allocation83_spill] sm:$0xff] }
 0x34b   : > { %3604 = vmatprep.subr.bf16.mxu0 %v5984_v20  ;;  %3636 = vmatprep.subr.bf16.mxu1 %v5985_v3  ;;  %v5993_v20 = vld [vmem:[#allocation84_spill] sm:$0xff]  ;;  %v5994_v3 = vld [vmem:[#allocation25_spill] sm:$0xff] }
 0x34e   : > { %3606 = vmatpush1.bf16.msra.mxu0 %v5986_v43  ;;  %3638 = vmatpush1.bf16.msra.mxu1 %v5208_v42  ;;  %v5995_v43 = vld [vmem:[#allocation26_spill] sm:$0xff] }
 0x34f   : > { %3608 = vmatprep.subr.bf16.mxu0 %v5211_v31  ;;  %3640 = vmatprep.subr.bf16.mxu1 %v5987_v44 }
 0x352   : > { %3610 = vmatpush1.bf16.msra.mxu0 %v5988_v24  ;;  %3642 = vmatpush1.bf16.msra.mxu1 %v5989_v22 }
 0x353   : > { %3612 = vmatprep.subr.bf16.mxu0 %v5990_v60  ;;  %3644 = vmatprep.subr.bf16.mxu1 %v5991_v2  ;;  %v5998_v2 = vld [vmem:[#allocation87_spill] sm:$0xff] }
 0x356   : > { %3614 = vmatpush1.bf16.msra.mxu0 %v5992_v47  ;;  %3646 = vmatpush1.bf16.msra.mxu1 %v5993_v20 }
 0x357   : > { %3648 = vmatprep.subr.bf16.mxu0 %v5994_v3  ;;  %3680 = vmatprep.subr.bf16.mxu1 %v5995_v43 }
 0x40c   : > { %v1621_v42 = vpop.f32.mrb[2].mxu0  ;;  %v1692_v31 = vpop.f32.mrb[2].mxu1 }
 0x40d   : > { %v4057_v44 = vadd.f32 %v1621_v42, %v5996_v30  ;;  %v1623_v34 = vpop.f32.mrb[3].mxu0  ;;  %v1694_v24 = vpop.f32.mrb[3].mxu1  ;;  %v4065_v20 = vadd.f32 %v1692_v31, %v5265_v59 }
 0x40e   : > { %v4058_v22 = vadd.f32 %v1623_v34, %v5997_v33  ;;  %v4066_v47 = vadd.f32 %v1694_v24, %v5998_v2 }
 0x40f   : > { %v3121_v6 = vmul.f32 -1.442695, %v4057_v44 }
 0x410   : > { %v3122_v60 = vmul.f32 -1.442695, %v4058_v22  ;;  %v3123_v39 = vmul.f32 -1.442695, %v4066_v47 }
 0x411   : > { %4264 = vpow2.f32 %v3121_v6 }
 0x412   : > { %4266 = vpow2.f32 %v3122_v60 }
 0x413   : > { %4268 = vpow2.f32 %v3123_v39 }
 0x414   : > { %4270 = vtanh.f32 %v4065_v20 }
 0x41b   : > { %v4265_v3 = vpop.eup %4264 }
 0x41c   : > { %v4267_v8 = vpop.eup %4266  ;;  %v1704_v43 = vadd.f32 1.0, %v4265_v3 }
 0x41d   : > { %v1710_v54 = vadd.f32 1.0, %v4267_v8  ;;  %v4269_v42 = vpop.eup %4268  ;;  %v6001_v8 = vld [vmem:[#allocation31_spill] sm:$0xff] }
 0x41e   : > { %4272 = vrcp.f32 %v1704_v43  ;;  %v4271_v30 = vpop.eup %4270  ;;  %v1717_v6 = vadd.f32 1.0, %v4269_v42 }
 0x41f   : > { %4274 = vrcp.f32 %v1710_v54  ;;  %v6000_v54 = vld [vmem:[#allocation30_spill] sm:$0xff] }
 0x420   : > { %4276 = vrcp.f32 %v1717_v6 }
 0x428   : > { %v4273_v34 = vpop.eup %4272 }
 0x429   : > { %v4275_v44 = vpop.eup %4274  ;;  %v1721_v22 = vmul.f32 %v4273_v34, %v4271_v30  ;;  %v6002_v30 = vld [vmem:[#allocation88_spill] sm:$0xff] }
 0x42a   : > { %v1720_v60 = vmul.f32 %v4275_v44, %v5268_v36  ;;  %v4277_v31 = vpop.eup %4276  ;;  %v5999_v36 = vld [vmem:[#allocation29_spill] sm:$0xff] }
 0x42c   : > { %v5410_v24 = vadd.f32 %v1721_v22, %v1720_v60  ;;  %v6003_v60 = vld [vmem:[#allocation89_spill] sm:$0xff] }
 0x42e   : > { %4278 = vtanh.f32 %v5410_v24 }
 0x438   : > { %v4279_v47 = vpop.eup %4278 }
 0x439   : > { %v5413_v39 = vmul.f32 %v4279_v47, %v4277_v31 }
 0x43b   : > { %1790 = vmatmul.mubr.f32.vlgmr.msra.gmra.mrb[10].mxu0 %v5413_v39  ;;  %1861 = vmatmul.mubr.f32.vlgmr.msra.gmra.mrb[10].mxu1 %v5413_v39 }
 0x43c   : > { %3650 = vmatpush1.bf16.msra.mxu0 %v4938_v50  ;;  %3682 = vmatpush1.bf16.msra.mxu1 %v4941_v51 }
 0x43d   : > { %3652 = vmatprep.subr.bf16.mxu0 %v4943_v52  ;;  %3684 = vmatprep.subr.bf16.mxu1 %v4946_v56 }
 0x43e   : > { %1959 = vmatprep.mubr.f32.mxu0 %v5901_v21  ;;  %2030 = vmatprep.mubr.f32.mxu1 %v5901_v21 }
 0x440   : > { %3654 = vmatpush1.bf16.msra.mxu0 %v4949_v62  ;;  %3686 = vmatpush1.bf16.msra.mxu1 %v4954_v0 }
 0x441   : > { %3656 = vmatprep.subr.bf16.mxu0 %v4956_v1  ;;  %3688 = vmatprep.subr.bf16.mxu1 %v4959_v5 }
 0x444   : > { %3658 = vmatpush1.bf16.msra.mxu0 %v4964_v12  ;;  %3690 = vmatpush1.bf16.msra.mxu1 %v4969_v14 }
 0x445   : > { %3660 = vmatprep.subr.bf16.mxu0 %v4971_v15  ;;  %3692 = vmatprep.subr.bf16.mxu1 %v4974_v19 }
 0x448   : > { %3662 = vmatpush1.bf16.msra.mxu0 %v4979_v25  ;;  %3694 = vmatpush1.bf16.msra.mxu1 %v4984_v27 }
 0x449   : > { %3664 = vmatprep.subr.bf16.mxu0 %v4986_v28  ;;  %3696 = vmatprep.subr.bf16.mxu1 %v4989_v32 }
 0x44c   : > { %3666 = vmatpush1.bf16.msra.mxu0 %v4994_v38  ;;  %3698 = vmatpush1.bf16.msra.mxu1 %v4998_v40 }
 0x44d   : > { %3668 = vmatprep.subr.bf16.mxu0 %v5000_v41  ;;  %3700 = vmatprep.subr.bf16.mxu1 %v5003_v46 }
 0x450   : > { %3670 = vmatpush1.bf16.msra.mxu0 %v5008_v55  ;;  %3702 = vmatpush1.bf16.msra.mxu1 %v5012_v57 }
 0x451   : > { %3672 = vmatprep.subr.bf16.mxu0 %v5014_v58  ;;  %3704 = vmatprep.subr.bf16.mxu1 %v5017_v63 }
 0x454   : > { %3674 = vmatpush1.bf16.msra.mxu0 %v5020_v9  ;;  %3706 = vmatpush1.bf16.msra.mxu1 %v5024_v10 }
 0x455   : > { %3676 = vmatprep.subr.bf16.mxu0 %v5026_v11  ;;  %3708 = vmatprep.subr.bf16.mxu1 %v5029_v18 }
 0x458   : > { %3678 = vmatpush1.bf16.msra.mxu0 %v5032_v26  ;;  %3710 = vmatpush1.bf16.msra.mxu1 %v5999_v36 }
 0x459   : > { %3712 = vmatprep.subr.bf16.mxu0 %v6000_v54  ;;  %3744 = vmatprep.subr.bf16.mxu1 %v6001_v8 }
 0x50e   : > { %v1791_v20 = vpop.f32.mrb[10].mxu0  ;;  %v1862_v43 = vpop.f32.mrb[10].mxu1 }
 0x50f   : > { %v4075_v3 = vadd.f32 %v1791_v20, %v6002_v30  ;;  %v1793_v42 = vpop.f32.mrb[11].mxu0  ;;  %v1864_v34 = vpop.f32.mrb[11].mxu1  ;;  %v4077_v36 = vadd.f32 %v1862_v43, %v5329_v35 }
 0x510   : > { %v4076_v44 = vadd.f32 %v1793_v42, %v5318_v45  ;;  %v4078_v31 = vadd.f32 %v1864_v34, %v6003_v60 }
 0x511   : > { %v3124_v22 = vmul.f32 -1.442695, %v4075_v3 }
 0x512   : > { %v3125_v6 = vmul.f32 -1.442695, %v4076_v44  ;;  %v3126_v47 = vmul.f32 -1.442695, %v4078_v31 }
 0x513   : > { %4280 = vpow2.f32 %v3124_v22 }
 0x514   : > { %4282 = vpow2.f32 %v3125_v6 }
 0x515   : > { %4284 = vpow2.f32 %v3126_v47  ;;  %v6010_v47 = vld [vmem:[#allocation40_spill] sm:$0xff] }
 0x516   : > { %4286 = vtanh.f32 %v4077_v36  ;;  %v6007_v36 = vld [vmem:[#allocation37_spill] sm:$0xff] }
 0x51d   : > { %v4281_v54 = vpop.eup %4280 }
 0x51e   : > { %v4283_v26 = vpop.eup %4282  ;;  %v1874_v8 = vadd.f32 1.0, %v4281_v54 }
 0x51f   : > { %v1880_v18 = vadd.f32 1.0, %v4283_v26  ;;  %v4285_v20 = vpop.eup %4284  ;;  %v6005_v26 = vld [vmem:[#allocation35_spill] sm:$0xff] }
 0x520   : > { %4288 = vrcp.f32 %v1874_v8  ;;  %v4287_v30 = vpop.eup %4286  ;;  %v1887_v22 = vadd.f32 1.0, %v4285_v20  ;;  %v6008_v8 = vld [vmem:[#allocation38_spill] sm:$0xff]  ;;  %v6011_v20 = vld [vmem:[#allocation41_spill] sm:$0xff] }
 0x521   : > { %4290 = vrcp.f32 %v1880_v18  ;;  %v6004_v18 = vld [vmem:[#allocation34_spill] sm:$0xff] }
 0x522   : > { %4292 = vrcp.f32 %v1887_v22  ;;  %v6015_v22 = vld [vmem:[#allocation45_spill] sm:$0xff] }
 0x52a   : > { %v4289_v42 = vpop.eup %4288 }
 0x52b   : > { %v4291_v3 = vpop.eup %4290  ;;  %v1891_v44 = vmul.f32 %v4289_v42, %v4287_v30  ;;  %v6009_v30 = vld [vmem:[#allocation39_spill] sm:$0xff]  ;;  %v6012_v42 = vld [vmem:[#allocation42_spill] sm:$0xff] }
 0x52c   : > { %v1890_v6 = vmul.f32 %v4291_v3, %v5332_v4  ;;  %v4293_v43 = vpop.eup %4292  ;;  %v6006_v4 = vld [vmem:[#allocation36_spill] sm:$0xff]  ;;  %v6013_v3 = vld [vmem:[#allocation43_spill] sm:$0xff] }
 0x52e   : > { %v5456_v34 = vadd.f32 %v1891_v44, %v1890_v6  ;;  %v6014_v44 = vld [vmem:[#allocation44_spill] sm:$0xff]  ;;  %v6016_v6 = vld [vmem:[#allocation46_spill] sm:$0xff] }
 0x530   : > { %4294 = vtanh.f32 %v5456_v34 }
 0x53a   : > { %v4295_v54 = vpop.eup %4294 }
 0x53b   : > { %v1894_v31 = vmul.f32 %v4295_v54, %v4293_v43  ;;  %v6017_v43 = vld [vmem:[#allocation47_spill] sm:$0xff]  ;;  %v6018_v54 = vld [vmem:[#allocation48_spill] sm:$0xff] }
 0x53d   : > { %1960 = vmatmul.mubr.f32.vlgmr.msra.gmra.mrb[12].mxu0 %v1894_v31  ;;  %2031 = vmatmul.mubr.f32.vlgmr.msra.gmra.mrb[12].mxu1 %v1894_v31  ;;  %v6019_v31 = vld [vmem:[#allocation49_spill] sm:$0xff] }
 0x53e   : > { %3714 = vmatpush1.bf16.msra.mxu0 %v5044_v48  ;;  %3746 = vmatpush1.bf16.msra.mxu1 %v5048_v49 }
 0x53f   : > { %3716 = vmatprep.subr.bf16.mxu0 %v5050_v53  ;;  %3748 = vmatprep.subr.bf16.mxu1 %v5053_v61 }
 0x540   : > { %2108 = vmatprep.mubr.f32.mxu0 %v5901_v21  ;;  %2179 = vmatprep.mubr.f32.mxu1 %v5901_v21 }
 0x542   : > { %3718 = vmatpush1.bf16.msra.mxu0 %v5056_v13  ;;  %3750 = vmatpush1.bf16.msra.mxu1 %v5060_v16 }
 0x543   : > { %3720 = vmatprep.subr.bf16.mxu0 %v5062_v17  ;;  %3752 = vmatprep.subr.bf16.mxu1 %v5065_v23 }
 0x546   : > { %3722 = vmatpush1.bf16.msra.mxu0 %v5070_v37  ;;  %3754 = vmatpush1.bf16.msra.mxu1 %v5944_v29 }
 0x547   : > { %3724 = vmatprep.subr.bf16.mxu0 %v5945_v7  ;;  %3756 = vmatprep.subr.bf16.mxu1 %v6004_v18 }
 0x54a   : > { %3726 = vmatpush1.bf16.msra.mxu0 %v6005_v26  ;;  %3758 = vmatpush1.bf16.msra.mxu1 %v6006_v4 }
 0x54b   : > { %3728 = vmatprep.subr.bf16.mxu0 %v6007_v36  ;;  %3760 = vmatprep.subr.bf16.mxu1 %v6008_v8 }
 0x54e   : > { %3730 = vmatpush1.bf16.msra.mxu0 %v6009_v30  ;;  %3762 = vmatpush1.bf16.msra.mxu1 %v6010_v47  ;;  %v6020_v30 = vld [vmem:[#allocation50_spill] sm:$0xff]  ;;  %v6021_v47 = vld [vmem:[#allocation51_spill] sm:$0xff] }
 0x54f   : > { %3732 = vmatprep.subr.bf16.mxu0 %v6011_v20  ;;  %3764 = vmatprep.subr.bf16.mxu1 %v6012_v42  ;;  %v6022_v20 = vld [vmem:[#allocation52_spill] sm:$0xff]  ;;  %v6023_v42 = vld [vmem:[#allocation53_spill] sm:$0xff] }
 0x552   : > { %3734 = vmatpush1.bf16.msra.mxu0 %v6013_v3  ;;  %3766 = vmatpush1.bf16.msra.mxu1 %v6014_v44  ;;  %v6024_v3 = vld [vmem:[#allocation54_spill] sm:$0xff]  ;;  %v6057_v44 = vld [vmem:[#allocation85_spill] sm:$0xff] }
 0x553   : > { %3736 = vmatprep.subr.bf16.mxu0 %v6015_v22  ;;  %3768 = vmatprep.subr.bf16.mxu1 %v6016_v6  ;;  %v6025_v6 = vld [vmem:[#allocation55_spill] sm:$0xff]  ;;  %v6039_v22 = vld [vmem:[#allocation69_spill] sm:$0xff] }
 0x556   : > { %3738 = vmatpush1.bf16.msra.mxu0 %v6017_v43  ;;  %3770 = vmatpush1.bf16.msra.mxu1 %v6018_v54  ;;  %v6026_v43 = vld [vmem:[#allocation56_spill] sm:$0xff]  ;;  %v6027_v54 = vld [vmem:[#allocation57_spill] sm:$0xff] }
 0x557   : > { %3740 = vmatprep.subr.bf16.mxu0 %v6019_v31  ;;  %3772 = vmatprep.subr.bf16.mxu1 %v6020_v30  ;;  %v6028_v31 = vld [vmem:[#allocation58_spill] sm:$0xff]  ;;  %v6038_v30 = vld [vmem:[#allocation68_spill] sm:$0xff] }
 0x55a   : > { %3742 = vmatpush1.bf16.msra.mxu0 %v6021_v47  ;;  %3774 = vmatpush1.bf16.msra.mxu1 %v6022_v20  ;;  %v6029_v20 = vld [vmem:[#allocation59_spill] sm:$0xff]  ;;  %v6032_v47 = vld [vmem:[#allocation62_spill] sm:$0xff] }
 0x55b   : > { %3776 = vmatprep.subr.bf16.mxu0 %v6023_v42  ;;  %3808 = vmatprep.subr.bf16.mxu1 %v6024_v3  ;;  %v6030_v42 = vld [vmem:[#allocation60_spill] sm:$0xff]  ;;  %v6031_v3 = vld [vmem:[#allocation61_spill] sm:$0xff] }
 0x55d   : > { %2109 = vmatmul.mubr.f32.vlgmr.msra.gmra.mrb[4].mxu0 %v5413_v39  ;;  %2180 = vmatmul.mubr.f32.vlgmr.msra.gmra.mrb[4].mxu1 %v5413_v39  ;;  %v6033_v39 = vld [vmem:[#allocation63_spill] sm:$0xff] }
 0x55e   : > { %3778 = vmatpush1.bf16.msra.mxu0 %v6025_v6  ;;  %3810 = vmatpush1.bf16.msra.mxu1 %v6026_v43  ;;  %v6034_v6 = vld [vmem:[#allocation64_spill] sm:$0xff]  ;;  %v6035_v43 = vld [vmem:[#allocation65_spill] sm:$0xff] }
 0x55f   : > { %3780 = vmatprep.subr.bf16.mxu0 %v6027_v54  ;;  %3812 = vmatprep.subr.bf16.mxu1 %v6028_v31  ;;  %v6036_v54 = vld [vmem:[#allocation66_spill] sm:$0xff]  ;;  %v6037_v31 = vld [vmem:[#allocation67_spill] sm:$0xff] }
 0x560   : > { %2278 = vmatprep.mubr.f32.mxu0 %v5901_v21  ;;  %2349 = vmatprep.mubr.f32.mxu1 %v5901_v21 }
 0x562   : > { %3782 = vmatpush1.bf16.msra.mxu0 %v6029_v20  ;;  %3814 = vmatpush1.bf16.msra.mxu1 %v6030_v42  ;;  %v6040_v20 = vld [vmem:[#allocation70_spill] sm:$0xff]  ;;  %v6041_v42 = vld [vmem:[#allocation71_spill] sm:$0xff] }
 0x563   : > { %3784 = vmatprep.subr.bf16.mxu0 %v6031_v3  ;;  %3816 = vmatprep.subr.bf16.mxu1 %v6032_v47  ;;  %v6042_v3 = vld [vmem:[#allocation72_spill] sm:$0xff]  ;;  %v6043_v47 = vld [vmem:[#allocation73_spill] sm:$0xff] }
 0x566   : > { %3786 = vmatpush1.bf16.msra.mxu0 %v6033_v39  ;;  %3818 = vmatpush1.bf16.msra.mxu1 %v6034_v6  ;;  %v6044_v39 = vld [vmem:[#allocation74_spill] sm:$0xff]  ;;  %v6045_v6 = vld [vmem:[#allocation75_spill] sm:$0xff] }
 0x567   : > { %3788 = vmatprep.subr.bf16.mxu0 %v6035_v43  ;;  %3820 = vmatprep.subr.bf16.mxu1 %v6036_v54  ;;  %v6046_v43 = vld [vmem:[#allocation76_spill] sm:$0xff]  ;;  %v6047_v54 = vld [vmem:[#allocation77_spill] sm:$0xff] }
 0x56a   : > { %3790 = vmatpush1.bf16.msra.mxu0 %v6037_v31  ;;  %3822 = vmatpush1.bf16.msra.mxu1 %v6038_v30  ;;  %v6048_v31 = vld [vmem:[#allocation78_spill] sm:$0xff]  ;;  %v6049_v30 = vld [vmem:[#allocation79_spill] sm:$0xff] }
 0x56b   : > { %3792 = vmatprep.subr.bf16.mxu0 %v6039_v22  ;;  %3824 = vmatprep.subr.bf16.mxu1 %v6040_v20  ;;  %v6050_v22 = vld [vmem:[#allocation80_spill] sm:$0xff]  ;;  %v6051_v20 = vld [vmem:[#allocation81_spill] sm:$0xff] }
 0x56e   : > { %3794 = vmatpush1.bf16.msra.mxu0 %v6041_v42  ;;  %3826 = vmatpush1.bf16.msra.mxu1 %v6042_v3  ;;  %v6052_v42 = vld [vmem:[#allocation82_spill] sm:$0xff]  ;;  %v6053_v3 = vld [vmem:[#allocation83_spill] sm:$0xff] }
 0x56f   : > { %3796 = vmatprep.subr.bf16.mxu0 %v6043_v47  ;;  %3828 = vmatprep.subr.bf16.mxu1 %v6044_v39  ;;  %v6054_v47 = vld [vmem:[#allocation84_spill] sm:$0xff]  ;;  %v6055_v39 = vld [vmem:[#allocation25_spill] sm:$0xff] }
 0x572   : > { %3798 = vmatpush1.bf16.msra.mxu0 %v6045_v6  ;;  %3830 = vmatpush1.bf16.msra.mxu1 %v6046_v43  ;;  %v6056_v6 = vld [vmem:[#allocation26_spill] sm:$0xff] }
 0x573   : > { %3800 = vmatprep.subr.bf16.mxu0 %v6047_v54  ;;  %3832 = vmatprep.subr.bf16.mxu1 %v6048_v31 }
 0x576   : > { %3802 = vmatpush1.bf16.msra.mxu0 %v6049_v30  ;;  %3834 = vmatpush1.bf16.msra.mxu1 %v6050_v22 }
 0x577   : > { %3804 = vmatprep.subr.bf16.mxu0 %v6051_v20  ;;  %3836 = vmatprep.subr.bf16.mxu1 %v6052_v42 }
 0x57a   : > { %3806 = vmatpush1.bf16.msra.mxu0 %v6053_v3  ;;  %3838 = vmatpush1.bf16.msra.mxu1 %v6054_v47 }
 0x57b   : > { %3840 = vmatprep.subr.bf16.mxu0 %v6055_v39  ;;  %3872 = vmatprep.subr.bf16.mxu1 %v6056_v6 }
 0x630   : > { %v2110_v43 = vpop.f32.mrb[4].mxu0  ;;  %v2181_v54 = vpop.f32.mrb[4].mxu1 }
 0x631   : > { %v4059_v31 = vadd.f32 %v2110_v43, %v6057_v44  ;;  %v2112_v8 = vpop.f32.mrb[5].mxu0  ;;  %v2183_v30 = vpop.f32.mrb[5].mxu1  ;;  %v4067_v47 = vadd.f32 %v2181_v54, %v5265_v59 }
 0x632   : > { %v4060_v22 = vadd.f32 %v2112_v8, %v5997_v33  ;;  %v4068_v3 = vadd.f32 %v2183_v30, %v5998_v2 }
 0x633   : > { %v3127_v36 = vmul.f32 -1.442695, %v4059_v31 }
 0x634   : > { %v3128_v20 = vmul.f32 -1.442695, %v4060_v22  ;;  %v3129_v42 = vmul.f32 -1.442695, %v4068_v3 }
 0x635   : > { %4296 = vpow2.f32 %v3127_v36 }
 0x636   : > { %4298 = vpow2.f32 %v3128_v20 }
 0x637   : > { %4300 = vpow2.f32 %v3129_v42 }
 0x638   : > { %4302 = vtanh.f32 %v4067_v47 }
 0x63f   : > { %v4297_v39 = vpop.eup %4296 }
 0x640   : > { %v4299_v4 = vpop.eup %4298  ;;  %v2193_v6 = vadd.f32 1.0, %v4297_v39  ;;  %v6077_v39 = vld [vmem:[#allocation48_spill] sm:$0xff] }
 0x641   : > { %v2199_v26 = vadd.f32 1.0, %v4299_v4  ;;  %v4301_v43 = vpop.eup %4300 }
 0x642   : > { %4304 = vrcp.f32 %v2193_v6  ;;  %v4303_v44 = vpop.eup %4302  ;;  %v2206_v36 = vadd.f32 1.0, %v4301_v43  ;;  %v6078_v6 = vld [vmem:[#allocation49_spill] sm:$0xff]  ;;  %v6079_v43 = vld [vmem:[#allocation50_spill] sm:$0xff] }
 0x643   : > { %4306 = vrcp.f32 %v2199_v26 }
 0x644   : > { %4308 = vrcp.f32 %v2206_v36  ;;  %v6083_v36 = vld [vmem:[#allocation54_spill] sm:$0xff] }
 0x64c   : > { %v4305_v8 = vpop.eup %4304 }
 0x64d   : > { %v4307_v31 = vpop.eup %4306  ;;  %v2210_v22 = vmul.f32 %v4305_v8, %v4303_v44  ;;  %v6080_v8 = vld [vmem:[#allocation51_spill] sm:$0xff] }
 0x64e   : > { %v2209_v20 = vmul.f32 %v4307_v31, %v5410_v24  ;;  %v4309_v3 = vpop.eup %4308  ;;  %v6081_v31 = vld [vmem:[#allocation52_spill] sm:$0xff] }
 0x650   : > { %v5534_v30 = vadd.f32 %v2210_v22, %v2209_v20  ;;  %v6082_v22 = vld [vmem:[#allocation53_spill] sm:$0xff]  ;;  %v6084_v20 = vld [vmem:[#allocation55_spill] sm:$0xff] }
 0x652   : > { %4310 = vtanh.f32 %v5534_v30 }
 0x65c   : > { %v4311_v54 = vpop.eup %4310 }
 0x65d   : > { %v5537_v42 = vmul.f32 %v4311_v54, %v4309_v3  ;;  %v6085_v3 = vld [vmem:[#allocation56_spill] sm:$0xff]  ;;  %v6086_v54 = vld [vmem:[#allocation57_spill] sm:$0xff] }
 0x65f   : > { %2279 = vmatmul.mubr.f32.vlgmr.msra.gmra.mrb[12].mxu0 %v5537_v42  ;;  %2350 = vmatmul.mubr.f32.vlgmr.msra.gmra.mrb[12].mxu1 %v5537_v42 }
 0x660   : > { %3842 = vmatpush1.bf16.msra.mxu0 %v4938_v50  ;;  %3874 = vmatpush1.bf16.msra.mxu1 %v4941_v51  ;;  %v6058_v50 = vld [vmem:[#allocation27_spill] sm:$0xff]  ;;  %v6059_v51 = vld [vmem:[#allocation28_spill] sm:$0xff] }
 0x661   : > { %3844 = vmatprep.subr.bf16.mxu0 %v4943_v52  ;;  %3876 = vmatprep.subr.bf16.mxu1 %v4946_v56  ;;  %v6060_v52 = vld [vmem:[#allocation29_spill] sm:$0xff]  ;;  %v6061_v56 = vld [vmem:[#allocation30_spill] sm:$0xff] }
 0x662   : > { %2448 = vmatprep.mubr.f32.mxu0 %v5901_v21  ;;  %2519 = vmatprep.mubr.f32.mxu1 %v5901_v21 }
 0x664   : > { %3846 = vmatpush1.bf16.msra.mxu0 %v4949_v62  ;;  %3878 = vmatpush1.bf16.msra.mxu1 %v4954_v0  ;;  %v6062_v62 = vld [vmem:[#allocation31_spill] sm:$0xff] }
 0x665   : > { %3848 = vmatprep.subr.bf16.mxu0 %v4956_v1  ;;  %3880 = vmatprep.subr.bf16.mxu1 %v4959_v5  ;;  %v6063_v5 = vld [vmem:[#allocation88_spill] sm:$0xff] }
 0x668   : > { %3850 = vmatpush1.bf16.msra.mxu0 %v4964_v12  ;;  %3882 = vmatpush1.bf16.msra.mxu1 %v4969_v14 }
 0x669   : > { %3852 = vmatprep.subr.bf16.mxu0 %v4971_v15  ;;  %3884 = vmatprep.subr.bf16.mxu1 %v4974_v19 }
 0x66c   : > { %3854 = vmatpush1.bf16.msra.mxu0 %v4979_v25  ;;  %3886 = vmatpush1.bf16.msra.mxu1 %v4984_v27 }
 0x66d   : > { %3856 = vmatprep.subr.bf16.mxu0 %v4986_v28  ;;  %3888 = vmatprep.subr.bf16.mxu1 %v4989_v32 }
 0x670   : > { %3858 = vmatpush1.bf16.msra.mxu0 %v4994_v38  ;;  %3890 = vmatpush1.bf16.msra.mxu1 %v4998_v40 }
 0x671   : > { %3860 = vmatprep.subr.bf16.mxu0 %v5000_v41  ;;  %3892 = vmatprep.subr.bf16.mxu1 %v5003_v46 }
 0x674   : > { %3862 = vmatpush1.bf16.msra.mxu0 %v5008_v55  ;;  %3894 = vmatpush1.bf16.msra.mxu1 %v5012_v57 }
 0x675   : > { %3864 = vmatprep.subr.bf16.mxu0 %v5014_v58  ;;  %3896 = vmatprep.subr.bf16.mxu1 %v5017_v63 }
 0x678   : > { %3866 = vmatpush1.bf16.msra.mxu0 %v5020_v9  ;;  %3898 = vmatpush1.bf16.msra.mxu1 %v5024_v10 }
 0x679   : > { %3868 = vmatprep.subr.bf16.mxu0 %v5026_v11  ;;  %3900 = vmatprep.subr.bf16.mxu1 %v6058_v50  ;;  %v6087_v50 = vld [vmem:[#allocation58_spill] sm:$0xff] }
 0x67c   : > { %3870 = vmatpush1.bf16.msra.mxu0 %v6059_v51  ;;  %3902 = vmatpush1.bf16.msra.mxu1 %v6060_v52  ;;  %v6088_v51 = vld [vmem:[#allocation59_spill] sm:$0xff]  ;;  %v6089_v52 = vld [vmem:[#allocation60_spill] sm:$0xff] }
 0x67d   : > { %3904 = vmatprep.subr.bf16.mxu0 %v6061_v56  ;;  %3936 = vmatprep.subr.bf16.mxu1 %v6062_v62  ;;  %v6090_v56 = vld [vmem:[#allocation61_spill] sm:$0xff]  ;;  %v6091_v62 = vld [vmem:[#allocation62_spill] sm:$0xff] }
 0x732   : > { %v2280_v0 = vpop.f32.mrb[12].mxu0  ;;  %v2351_v1 = vpop.f32.mrb[12].mxu1 }
 0x733   : > { %v4079_v12 = vadd.f32 %v2280_v0, %v6063_v5  ;;  %v2282_v14 = vpop.f32.mrb[13].mxu0  ;;  %v2353_v15 = vpop.f32.mrb[13].mxu1  ;;  %v4081_v38 = vadd.f32 %v2351_v1, %v5329_v35  ;;  %v6093_v0 = vld [vmem:[#allocation64_spill] sm:$0xff]  ;;  %v6094_v1 = vld [vmem:[#allocation65_spill] sm:$0xff] }
 0x734   : > { %v4080_v19 = vadd.f32 %v2282_v14, %v5318_v45  ;;  %v4082_v28 = vadd.f32 %v2353_v15, %v6003_v60  ;;  %v6096_v14 = vld [vmem:[#allocation67_spill] sm:$0xff]  ;;  %v6097_v15 = vld [vmem:[#allocation68_spill] sm:$0xff] }
 0x735   : > { %v3130_v25 = vmul.f32 -1.442695, %v4079_v12  ;;  %v6095_v12 = vld [vmem:[#allocation66_spill] sm:$0xff] }
 0x736   : > { %v3131_v27 = vmul.f32 -1.442695, %v4080_v19  ;;  %v3132_v32 = vmul.f32 -1.442695, %v4082_v28  ;;  %v6099_v19 = vld [vmem:[#allocation70_spill] sm:$0xff]  ;;  %v6102_v28 = vld [vmem:[#allocation73_spill] sm:$0xff] }
 0x737   : > { %4312 = vpow2.f32 %v3130_v25  ;;  %v6100_v25 = vld [vmem:[#allocation71_spill] sm:$0xff] }
 0x738   : > { %4314 = vpow2.f32 %v3131_v27  ;;  %v6101_v27 = vld [vmem:[#allocation72_spill] sm:$0xff] }
 0x739   : > { %4316 = vpow2.f32 %v3132_v32  ;;  %v6103_v32 = vld [vmem:[#allocation74_spill] sm:$0xff] }
 0x73a   : > { %4318 = vtanh.f32 %v4081_v38  ;;  %v6104_v38 = vld [vmem:[#allocation75_spill] sm:$0xff] }
 0x741   : > { %v4313_v40 = vpop.eup %4312 }
 0x742   : > { %v4315_v41 = vpop.eup %4314  ;;  %v2363_v46 = vadd.f32 1.0, %v4313_v40  ;;  %v6105_v40 = vld [vmem:[#allocation76_spill] sm:$0xff] }
 0x743   : > { %v2369_v55 = vadd.f32 1.0, %v4315_v41  ;;  %v4317_v57 = vpop.eup %4316  ;;  %v6106_v41 = vld [vmem:[#allocation77_spill] sm:$0xff] }
 0x744   : > { %4320 = vrcp.f32 %v2363_v46  ;;  %v4319_v58 = vpop.eup %4318  ;;  %v2376_v11 = vadd.f32 1.0, %v4317_v57  ;;  %v6107_v46 = vld [vmem:[#allocation78_spill] sm:$0xff]  ;;  %v6109_v57 = vld [vmem:[#allocation80_spill] sm:$0xff] }
 0x745   : > { %4322 = vrcp.f32 %v2369_v55  ;;  %v6108_v55 = vld [vmem:[#allocation79_spill] sm:$0xff] }
 0x746   : > { %4324 = vrcp.f32 %v2376_v11 }
 0x74e   : > { %v4321_v63 = vpop.eup %4320 }
 0x74f   : > { %v4323_v9 = vpop.eup %4322  ;;  %v2380_v10 = vmul.f32 %v4321_v63, %v4319_v58  ;;  %v6110_v58 = vld [vmem:[#allocation81_spill] sm:$0xff]  ;;  %v6111_v63 = vld [vmem:[#allocation82_spill] sm:$0xff] }
 0x750   : > { %v2379_v24 = vmul.f32 %v4323_v9, %v5456_v34  ;;  %v4325_v4 = vpop.eup %4324  ;;  %v6075_v34 = vld [vmem:[#allocation46_spill] sm:$0xff]  ;;  %v6112_v9 = vld [vmem:[#allocation83_spill] sm:$0xff] }
 0x752   : > { %v5580_v26 = vadd.f32 %v2380_v10, %v2379_v24  ;;  %v6113_v10 = vld [vmem:[#allocation84_spill] sm:$0xff] }
 0x754   : > { %4326 = vtanh.f32 %v5580_v26 }
 0x75e   : > { %v4327_v47 = vpop.eup %4326 }
 0x75f   : > { %v2383_v44 = vmul.f32 %v4327_v47, %v4325_v4  ;;  %v6114_v4 = vld [vmem:[#allocation85_spill] sm:$0xff] }
 0x761   : > { %2449 = vmatmul.mubr.f32.vlgmr.msra.gmra.mrb[14].mxu0 %v2383_v44  ;;  %2520 = vmatmul.mubr.f32.vlgmr.msra.gmra.mrb[14].mxu1 %v2383_v44 }
 0x762   : > { %3906 = vmatpush1.bf16.msra.mxu0 %v5044_v48  ;;  %3938 = vmatpush1.bf16.msra.mxu1 %v5048_v49  ;;  %v6064_v48 = vld [vmem:[#allocation35_spill] sm:$0xff]  ;;  %v6065_v49 = vld [vmem:[#allocation36_spill] sm:$0xff] }
 0x763   : > { %3908 = vmatprep.subr.bf16.mxu0 %v5050_v53  ;;  %3940 = vmatprep.subr.bf16.mxu1 %v5053_v61  ;;  %v6066_v53 = vld [vmem:[#allocation37_spill] sm:$0xff]  ;;  %v6067_v61 = vld [vmem:[#allocation38_spill] sm:$0xff] }
 0x764   : > { %2597 = vmatprep.mubr.f32.mxu0 %v5901_v21  ;;  %2668 = vmatprep.mubr.f32.mxu1 %v5901_v21 }
 0x766   : > { %3910 = vmatpush1.bf16.msra.mxu0 %v5056_v13  ;;  %3942 = vmatpush1.bf16.msra.mxu1 %v5060_v16  ;;  %v6068_v13 = vld [vmem:[#allocation39_spill] sm:$0xff]  ;;  %v6069_v16 = vld [vmem:[#allocation40_spill] sm:$0xff] }
 0x767   : > { %3912 = vmatprep.subr.bf16.mxu0 %v5062_v17  ;;  %3944 = vmatprep.subr.bf16.mxu1 %v5065_v23  ;;  %v6070_v17 = vld [vmem:[#allocation41_spill] sm:$0xff]  ;;  %v6071_v23 = vld [vmem:[#allocation42_spill] sm:$0xff] }
 0x76a   : > { %3914 = vmatpush1.bf16.msra.mxu0 %v5070_v37  ;;  %3946 = vmatpush1.bf16.msra.mxu1 %v5944_v29  ;;  %v6072_v37 = vld [vmem:[#allocation43_spill] sm:$0xff]  ;;  %v6073_v29 = vld [vmem:[#allocation44_spill] sm:$0xff] }
 0x76b   : > { %3916 = vmatprep.subr.bf16.mxu0 %v5945_v7  ;;  %3948 = vmatprep.subr.bf16.mxu1 %v6004_v18  ;;  %v6074_v7 = vld [vmem:[#allocation45_spill] sm:$0xff]  ;;  %v6076_v18 = vld [vmem:[#allocation47_spill] sm:$0xff] }
 0x76e   : > { %3918 = vmatpush1.bf16.msra.mxu0 %v6064_v48  ;;  %3950 = vmatpush1.bf16.msra.mxu1 %v6065_v49 }
 0x76f   : > { %3920 = vmatprep.subr.bf16.mxu0 %v6066_v53  ;;  %3952 = vmatprep.subr.bf16.mxu1 %v6067_v61 }
 0x772   : > { %3922 = vmatpush1.bf16.msra.mxu0 %v6068_v13  ;;  %3954 = vmatpush1.bf16.msra.mxu1 %v6069_v16 }
 0x773   : > { %3924 = vmatprep.subr.bf16.mxu0 %v6070_v17  ;;  %3956 = vmatprep.subr.bf16.mxu1 %v6071_v23 }
 0x776   : > { %3926 = vmatpush1.bf16.msra.mxu0 %v6072_v37  ;;  %3958 = vmatpush1.bf16.msra.mxu1 %v6073_v29 }
 0x777   : > { %3928 = vmatprep.subr.bf16.mxu0 %v6074_v7  ;;  %3960 = vmatprep.subr.bf16.mxu1 %v6075_v34 }
 0x77a   : > { %3930 = vmatpush1.bf16.msra.mxu0 %v6076_v18  ;;  %3962 = vmatpush1.bf16.msra.mxu1 %v6077_v39 }
 0x77b   : > { %3932 = vmatprep.subr.bf16.mxu0 %v6078_v6  ;;  %3964 = vmatprep.subr.bf16.mxu1 %v6079_v43 }
 0x77e   : > { %3934 = vmatpush1.bf16.msra.mxu0 %v6080_v8  ;;  %3966 = vmatpush1.bf16.msra.mxu1 %v6081_v31 }
 0x77f   : > { %3968 = vmatprep.subr.bf16.mxu0 %v6082_v22  ;;  %4000 = vmatprep.subr.bf16.mxu1 %v6083_v36 }
 0x781   : > { %2598 = vmatmul.mubr.f32.vlgmr.msra.gmra.mrb[6].mxu0 %v5537_v42  ;;  %2669 = vmatmul.mubr.f32.vlgmr.msra.gmra.mrb[6].mxu1 %v5537_v42  ;;  %v6092_v42 = vld [vmem:[#allocation63_spill] sm:$0xff] }
 0x782   : > { %3970 = vmatpush1.bf16.msra.mxu0 %v6084_v20  ;;  %4002 = vmatpush1.bf16.msra.mxu1 %v6085_v3 }
 0x783   : > { %3972 = vmatprep.subr.bf16.mxu0 %v6086_v54  ;;  %4004 = vmatprep.subr.bf16.mxu1 %v6087_v50 }
 0x784   : > { %2767 = vmatprep.mubr.f32.mxu0 %v5901_v21  ;;  %2838 = vmatprep.mubr.f32.mxu1 %v5901_v21  ;;  %v6098_v21 = vld [vmem:[#allocation69_spill] sm:$0xff] }
 0x786   : > { %3974 = vmatpush1.bf16.msra.mxu0 %v6088_v51  ;;  %4006 = vmatpush1.bf16.msra.mxu1 %v6089_v52 }
 0x787   : > { %3976 = vmatprep.subr.bf16.mxu0 %v6090_v56  ;;  %4008 = vmatprep.subr.bf16.mxu1 %v6091_v62 }
 0x78a   : > { %3978 = vmatpush1.bf16.msra.mxu0 %v6092_v42  ;;  %4010 = vmatpush1.bf16.msra.mxu1 %v6093_v0 }
 0x78b   : > { %3980 = vmatprep.subr.bf16.mxu0 %v6094_v1  ;;  %4012 = vmatprep.subr.bf16.mxu1 %v6095_v12 }
 0x78e   : > { %3982 = vmatpush1.bf16.msra.mxu0 %v6096_v14  ;;  %4014 = vmatpush1.bf16.msra.mxu1 %v6097_v15 }
 0x78f   : > { %3984 = vmatprep.subr.bf16.mxu0 %v6098_v21  ;;  %4016 = vmatprep.subr.bf16.mxu1 %v6099_v19 }
 0x792   : > { %3986 = vmatpush1.bf16.msra.mxu0 %v6100_v25  ;;  %4018 = vmatpush1.bf16.msra.mxu1 %v6101_v27 }
 0x793   : > { %3988 = vmatprep.subr.bf16.mxu0 %v6102_v28  ;;  %4020 = vmatprep.subr.bf16.mxu1 %v6103_v32 }
 0x796   : > { %3990 = vmatpush1.bf16.msra.mxu0 %v6104_v38  ;;  %4022 = vmatpush1.bf16.msra.mxu1 %v6105_v40 }
 0x797   : > { %3992 = vmatprep.subr.bf16.mxu0 %v6106_v41  ;;  %4024 = vmatprep.subr.bf16.mxu1 %v6107_v46 }
 0x79a   : > { %3994 = vmatpush1.bf16.msra.mxu0 %v6108_v55  ;;  %4026 = vmatpush1.bf16.msra.mxu1 %v6109_v57 }
 0x79b   : > { %3996 = vmatprep.subr.bf16.mxu0 %v6110_v58  ;;  %4028 = vmatprep.subr.bf16.mxu1 %v6111_v63 }
 0x79e   : > { %3998 = vmatpush1.bf16.msra.mxu0 %v6112_v9  ;;  %4030 = vmatpush1.bf16.msra.mxu1 %v6113_v10 }
 0x854   : > { %v2599_v11 = vpop.f32.mrb[6].mxu0  ;;  %v2670_v24 = vpop.f32.mrb[6].mxu1 }
 0x855   : > { %v4061_v47 = vadd.f32 %v2599_v11, %v6114_v4  ;;  %v2601_v44 = vpop.f32.mrb[7].mxu0  ;;  %v2672_v48 = vpop.f32.mrb[7].mxu1  ;;  %v4069_v17 = vadd.f32 %v2670_v24, %v5265_v59 }
 0x856   : > { %v4062_v49 = vadd.f32 %v2601_v44, %v5997_v33  ;;  %v4070_v13 = vadd.f32 %v2672_v48, %v5998_v2 }
 0x857   : > { %v3133_v53 = vmul.f32 -1.442695, %v4061_v47 }
 0x858   : > { %v3134_v61 = vmul.f32 -1.442695, %v4062_v49  ;;  %v3135_v16 = vmul.f32 -1.442695, %v4070_v13 }
 0x859   : > { %4328 = vpow2.f32 %v3133_v53 }
 0x85a   : > { %4330 = vpow2.f32 %v3134_v61 }
 0x85b   : > { %4332 = vpow2.f32 %v3135_v16 }
 0x85c   : > { %4334 = vtanh.f32 %v4069_v17 }
 0x863   : > { %v4329_v23 = vpop.eup %4328 }
 0x864   : > { %v4331_v37 = vpop.eup %4330  ;;  %v2682_v29 = vadd.f32 1.0, %v4329_v23 }
 0x865   : > { %v2688_v7 = vadd.f32 1.0, %v4331_v37  ;;  %v4333_v34 = vpop.eup %4332 }
 0x866   : > { %4336 = vrcp.f32 %v2682_v29  ;;  %v4335_v18 = vpop.eup %4334  ;;  %v2695_v43 = vadd.f32 1.0, %v4333_v34 }
 0x867   : > { %4338 = vrcp.f32 %v2688_v7 }
 0x868   : > { %4340 = vrcp.f32 %v2695_v43 }
 0x870   : > { %v4337_v33 = vpop.eup %4336 }
 0x871   : > { %v4339_v39 = vpop.eup %4338  ;;  %v2699_v6 = vmul.f32 %v4337_v33, %v4335_v18 }
 0x872   : > { %v2698_v8 = vmul.f32 %v4339_v39, %v5534_v30  ;;  %v4341_v59 = vpop.eup %4340 }
 0x874   : > { %v2700_v2 = vadd.f32 %v2699_v6, %v2698_v8 }
 0x876   : > { %2874 = vst [vmem:[#allocation3 + $0x8] sm:$0xff] %v2700_v2  ;;  %4342 = vtanh.f32 %v2700_v2 }
 0x880   : > { %v4343_v31 = vpop.eup %4342 }
 0x881   : > { %v2702_v22 = vmul.f32 %v4343_v31, %v4341_v59 }
 0x883   : > { %2768 = vmatmul.mubr.f32.vlgmr.msra.gmra.mrb[14].mxu0 %v2702_v22  ;;  %2873 = vst [vmem:[#allocation3] sm:$0xff] %v2702_v22  ;;  %2839 = vmatmul.mubr.f32.vlgmr.msra.gmra.mrb[14].mxu1 %v2702_v22 }
 0x956   : > { %v2769_v36 = vpop.f32.mrb[14].mxu0  ;;  %v2840_v20 = vpop.f32.mrb[14].mxu1 }
 0x957   : > { %v4083_v3 = vadd.f32 %v2769_v36, %v6063_v5  ;;  %v2771_v54 = vpop.f32.mrb[15].mxu0  ;;  %v2842_v50 = vpop.f32.mrb[15].mxu1  ;;  %v4085_v42 = vadd.f32 %v2840_v20, %v5329_v35 }
 0x958   : > { %v4084_v51 = vadd.f32 %v2771_v54, %v5318_v45  ;;  %v4086_v56 = vadd.f32 %v2842_v50, %v6003_v60 }
 0x959   : > { %v3136_v52 = vmul.f32 -1.442695, %v4083_v3 }
 0x95a   : > { %v3137_v30 = vmul.f32 -1.442695, %v4084_v51  ;;  %v3138_v62 = vmul.f32 -1.442695, %v4086_v56 }
 0x95b   : > { %4344 = vpow2.f32 %v3136_v52 }
 0x95c   : > { %4346 = vpow2.f32 %v3137_v30 }
 0x95d   : > { %4348 = vpow2.f32 %v3138_v62 }
 0x95e   : > { %4350 = vtanh.f32 %v4085_v42 }
 0x965   : > { %v4345_v0 = vpop.eup %4344 }
 0x966   : > { %v4347_v1 = vpop.eup %4346  ;;  %v2852_v12 = vadd.f32 1.0, %v4345_v0 }
 0x967   : > { %v2858_v14 = vadd.f32 1.0, %v4347_v1  ;;  %v4349_v5 = vpop.eup %4348 }
 0x968   : > { %4352 = vrcp.f32 %v2852_v12  ;;  %v4351_v15 = vpop.eup %4350  ;;  %v2865_v25 = vadd.f32 1.0, %v4349_v5 }
 0x969   : > { %4354 = vrcp.f32 %v2858_v14 }
 0x96a   : > { %4356 = vrcp.f32 %v2865_v25 }
 0x972   : > { %v4353_v45 = vpop.eup %4352 }
 0x973   : > { %v4355_v21 = vpop.eup %4354  ;;  %v2869_v19 = vmul.f32 %v4353_v45, %v4351_v15 }
 0x974   : > { %v2868_v27 = vmul.f32 %v4355_v21, %v5580_v26  ;;  %v4357_v35 = vpop.eup %4356 }
 0x976   : > { %v2870_v60 = vadd.f32 %v2869_v19, %v2868_v27 }
 0x978   : > { %4358 = vtanh.f32 %v2870_v60  ;;  %2876 = vst [vmem:[#allocation3 + $0x18] sm:$0xff] %v2870_v60 }
 0x97f   : > { %2880 = sbr.rel (%p3139_p10) target bundleno = 2689 (0xa81), region = 84 }
 0x982   : > { %v4359_v28 = vpop.eup %4358 }
 0x983   : > { %v2872_v32 = vmul.f32 %v4359_v28, %v4357_v35 }
 0x985   : > { %2875 = vst [vmem:[#allocation3 + $0x10] sm:$0xff] %v2872_v32 }
 0x986   : > { %4586 = dma.done.wait [#allocation5], 2048 }
 0x987   : > { %4587 = vsyncadd [#allocation5], 4294965248  ;;  %v4628_v38 = vmov 0.0|0.0   ;;  %vm4629_vm0 = vmmov 0   ;;  %v4630_v40 = vmov 0.0   ;;  %v2884_v41 = vld [vmem:[#allocation4] sm:$0xff] }
 0x988   : > { %4031 = vmatprep.subr.bf16.mxu0 %v4628_v38  ;;  %3196 = vmatprep.mubr.msk.f32.mxu0 %vm4629_vm0, %v4630_v40  ;;  %v2885_v26 = vld [vmem:[#allocation4 + $0x8] sm:$0xff]  ;;  %v2886_v46 = vld [vmem:[#allocation4 + $0x10] sm:$0xff]  ;;  %v2887_v57 = vld [vmem:[#allocation4 + $0x18] sm:$0xff]  ;;  %s6115_s18 = sld [smem:[#allocation91_spill]] }
 0x989   : > { %v4032_v55 = vpack.c.bf16 %v2885_v26, %v2884_v41  ;;  %v4035_v58 = vpack.c.bf16 %v2887_v57, %v2886_v46  ;;  %v2888_v63 = vld [vmem:[#allocation4 + $0x20] sm:$0xff]  ;;  %v2889_v9 = vld [vmem:[#allocation4 + $0x28] sm:$0xff]  ;;  %v2890_v11 = vld [vmem:[#allocation4 + $0x30] sm:$0xff] }
 0x98a   : > { %v4038_v10 = vpack.c.bf16 %v2889_v9, %v2888_v63  ;;  %v2891_v24 = vld [vmem:[#allocation4 + $0x38] sm:$0xff]  ;;  %v2892_v47 = vld [vmem:[#allocation4 + $0x40] sm:$0xff]  ;;  %v2893_v44 = vld [vmem:[#allocation4 + $0x48] sm:$0xff] }
 0x98b   : > { %4033 = vmatpush3.bf16.msra.mxu0 %v4032_v55  ;;  %v4041_v4 = vpack.c.bf16 %v2891_v24, %v2890_v11  ;;  %v4044_v48 = vpack.c.bf16 %v2893_v44, %v2892_v47  ;;  %v2894_v49 = vld [vmem:[#allocation4 + $0x50] sm:$0xff]  ;;  %v2895_v53 = vld [vmem:[#allocation4 + $0x58] sm:$0xff]  ;;  %v2896_v13 = vld [vmem:[#allocation4 + $0x60] sm:$0xff] }
 0x98c   : > { %4034 = vmatprep.subr.bf16.mxu0 %v4628_v38  ;;  %v4047_v61 = vpack.c.bf16 %v2895_v53, %v2894_v49  ;;  %v2897_v16 = vld [vmem:[#allocation4 + $0x68] sm:$0xff]  ;;  %v2898_v23 = vld [vmem:[#allocation4 + $0x70] sm:$0xff]  ;;  %v2899_v37 = vld [vmem:[#allocation4 + $0x78] sm:$0xff] }
 0x98d   : > { %v4050_v17 = vpack.c.bf16 %v2897_v16, %v2896_v13  ;;  %v4053_v29 = vpack.c.bf16 %v2899_v37, %v2898_v23 }
 0x98e   : > { %v3140_v7 = vld [vmem:[%s6115_s18] ss:$0 sm:$0xff] }
 0x98f   : > { %4036 = vmatpush3.bf16.msra.mxu0 %v4035_v58 }
 0x990   : > { %4037 = vmatprep.subr.bf16.mxu0 %v4628_v38 }
 0x993   : > { %4039 = vmatpush3.bf16.msra.mxu0 %v4038_v10 }
 0x994   : > { %4040 = vmatprep.subr.bf16.mxu0 %v4628_v38 }
 0x997   : > { %4042 = vmatpush3.bf16.msra.mxu0 %v4041_v4 }
 0x998   : > { %4043 = vmatprep.subr.bf16.mxu0 %v4628_v38 }
 0x99b   : > { %4045 = vmatpush3.bf16.msra.mxu0 %v4044_v48 }
 0x99c   : > { %4046 = vmatprep.subr.bf16.mxu0 %v4628_v38 }
 0x99f   : > { %4048 = vmatpush3.bf16.msra.mxu0 %v4047_v61 }
 0x9a0   : > { %4049 = vmatprep.subr.bf16.mxu0 %v4628_v38 }
 0x9a3   : > { %4051 = vmatpush3.bf16.msra.mxu0 %v4050_v17 }
 0x9a4   : > { %4052 = vmatprep.subr.bf16.mxu0 %v4628_v38 }
 0x9a7   : > { %4054 = vmatpush3.bf16.msra.mxu0 %v4053_v29 }
 0x9aa   : > { %3197 = vmatmul.mubr.f32.vlgmr.msra.gmra.mrb[0].mxu0 %v2872_v32 }
 0xa7d   : > { %v2973_v34 = vpop.f32.mrb[0].mxu0 }
 0xa7e   : > { %v2974_v18 = vadd.f32 %v3140_v7, %v2973_v34  ;;  %v3198_v33 = vpop.f32.mrb[1].mxu0 }
 0xa80   : > { %2977 = vst [vmem:[#allocation15] sm:$0xff] %v2974_v18 }
 0xa81 PF: > { %s6116_s28 = sadd.s32 4294967295, %s4614_s14   ;;  %s4631_s20 = smov [#allocation15]  }
 0xa82   : > { %p5667_p1 = scmp.eq.s32.totalorder %s6116_s28, 1  ;;  %s2987_s25 = sshll.u32 %s4631_s20, 4  ;;  %s2988_s25 = int_to_ptr.vmem [resolvable:$true] %s2987_s25 }
 0xa83   : > { %s4524_s21 = scalar_lea.vmem %s2988_s25, 128  ;;  %p4531_p7 = scmp.lt.s32.totalorder %s2988_s25, %s2988_s25 }
 0xa84   : > { %p4525_p3 = scmp.ne.s32.totalorder %s2988_s25, %s4524_s21  ;;  %p4532_p9 = scmp.lt.s32.totalorder %s4524_s21, %s4524_s21 }
 0xa86   : > { %p4526_p8 = pnand %p4525_p3, %p5667_p1  ;;  %p4533_p4 = por %p4532_p9, %p4531_p7 }
 0xa88   : > { %p4527_p11 = pneg %p4526_p8 }
 0xa8a   : > { %p4534_p5 = pnand %p4533_p4, %p4527_p11 }
 0xa8c   : > { %4537 = shalt.err (!%p4534_p5)
}
 0xa8d   : > { %s6118_s27 = sld [smem:[#allocation92_spill]] }
 0xa93   : > { %s4538_s9 = scalar_lea.hbm %s6118_s27, 128 }
 0xa94   : > { %p4539_p12 = scmp.ne.s32.totalorder %s6118_s27, %s4538_s9  ;;  %p4544_p2 = scmp.lt.u32.totalorder %s4538_s9, %s6118_s27 }
 0xa96   : > { %p4540_p13 = pnand %p4539_p12, %p5667_p1 }
 0xa98   : > { %p4541_p0 = pneg %p4540_p13 }
 0xa9a   : > { %p4546_p6 = pnand %p4544_p2, %p4541_p0 }
 0xa9c   : > { %4549 = shalt.err (!%p4546_p6)
}
 0xa9d   : > { %4138 = dma.vmem_to_hbm [thread:$0]  (%p5667_p1), %s2988_s25, 128, %s6118_s27, [#allocation8]  }
 0xa9e   : > { %4589 = dma.done.wait (%p5667_p1), [#allocation8], 128  }
 0xa9f   : > { %4591 = vsyncadd (%p5667_p1), [#allocation8], 4294967168 }
 0xaa0 PF: > { %s25_s14 = sadd.s32 1, %s4614_s14   ;;  %s6119_s30 = smov %s4598_s10 }
 0xaa1   : > { %p22_p10 = scmp.ge.s32.totalorder %s25_s14, 4   ;;  %s6120_s10 = smov %s4602_s11 }
 0xaa2   : > { %s6121_s11 = smov %s4858_s22  ;;  %s6122_s12 = smov %s4610_s13 }
 0xaa3   : > { %s6123_s13 = smov %s6125_s19  ;;  %24 = sbr.rel (!%p22_p10) target bundleno = 11 (0xb), region = 125 }
 0xaaa   :  { %3000 = vsyncpa [#allocation7], 1 }
 0xaab   :  { %3002 = vsyncpa [#allocation7 + $0x1], 1 }
 0xaac   :  { %3003 = vsyncpa [#allocation10], 1 }
 0xaad   :  { %3004 = vsyncpa [#allocation13], 1 }
 0xaae   :  { %3005 = vsyncpa [#allocation8], 1 }
 0xaaf   :  { %3007 = vsyncpa [#allocation8 + $0x1], 1 }
 0xab0   :  { %3008 = vsyncmov [#allocation5] }
 0xab3   :  { %s3009_s17 = vpop.sfrf %3008 }
 0xab4   :  { %p3145_p1 = scmp.ne.s32.totalorder %s3009_s17, 0 }
 0xab6   :  { %3013 = shalt.err (%p3145_p1)  }

</bundles_post_ra>
